<compile_context>
chip_gen: v5e
topology: v5e:2x2
jax: 0.10.0
libtpu: 0.0.40
codegen_flags: <defaults>
</compile_context>

<pallas_src>
import functools
import math

import jax
import jax.numpy as jnp
from jax import lax
from jax.experimental import pallas as pl
from jax.experimental.pallas import tpu as pltpu


# -------------------- small synthetic config --------------------
class Config:
    vocab_size = 512
    embedding_dim = 128
    layer_num = 2
    head_dim = 64
    att_heads = 4
    kv_heads = 2
    base = 10000
    intermediate_size = 256
    rms_eps = 1e-6


# -------------------- in-kernel helpers --------------------
def _rmsnorm_f32(h, gamma, eps):
    # h: (S, E) f32, gamma: (1, E) f32
    rms = lax.rsqrt(jnp.mean(h * h, axis=-1, keepdims=True) + eps)
    return h * rms * gamma


def _rope_2d(t, cos, sin, half):
    # t, cos, sin: (S, D) f32; rotate_half(t) = [-t2, t1]
    t1 = t[:, :half]
    t2 = t[:, half:]
    rot = jnp.concatenate([-t2, t1], axis=-1)
    return t * cos + rot * sin


# -------------------- fused attention block kernel --------------------
def _attn_block_kernel(h_ref, g_ref, wqkv_ref, wo_ref, cos_ref, sin_ref, o_ref,
                       *, eps, head_dim, q_heads, kv_heads):
    D = head_dim
    Hq = q_heads
    Hkv = kv_heads
    G = Hq // Hkv
    scale = 1.0 / math.sqrt(D)

    h = h_ref[0].astype(jnp.float32)                       # (S, E) residual
    S = h.shape[0]

    # RMSNorm folded into this kernel (f32 math).
    x = _rmsnorm_f32(h, g_ref[...], eps)

    # Single fused QKV matmul on the MXU in bf16, f32 accumulation.
    qkv = jnp.dot(x.astype(jnp.bfloat16), wqkv_ref[...],
                  preferred_element_type=jnp.float32)      # (S, (Hq+2*Hkv)*D)

    q = qkv[:, : Hq * D]                                   # (S, Hq*D)
    k = qkv[:, Hq * D: (Hq + Hkv) * D]                     # (S, Hkv*D)
    v = qkv[:, (Hq + Hkv) * D:]                            # (S, Hkv*D)

    cos = cos_ref[...]
    sin = sin_ref[...]

    # Causal mask (scores stay in f32, so -1e30 is safe).
    row = lax.broadcasted_iota(jnp.int32, (S, S), 0)
    col = lax.broadcasted_iota(jnp.int32, (S, S), 1)
    causal = col <= row

    # RoPE K per kv head; keep bf16 copies for the MXU.
    k_heads = []
    v_heads = []
    for hk in range(Hkv):
        kh = _rope_2d(k[:, hk * D:(hk + 1) * D], cos, sin, D // 2)
        k_heads.append(kh.astype(jnp.bfloat16))
        v_heads.append(v[:, hk * D:(hk + 1) * D].astype(jnp.bfloat16))

    # Per q-head attention (static unrolled loop inside one kernel invocation);
    # GQA: q head hq uses kv head hq // G (matches repeat_kv grouping).
    head_outs = []
    for hq in range(Hq):
        qh = _rope_2d(q[:, hq * D:(hq + 1) * D], cos, sin, D // 2)
        kh = k_heads[hq // G]
        vh = v_heads[hq // G]
        # q @ k^T via dot_general (contract D directly, no explicit transpose).
        s = lax.dot_general(qh.astype(jnp.bfloat16), kh,
                            (((1,), (1,)), ((), ())),
                            preferred_element_type=jnp.float32) * scale
        s = jnp.where(causal, s, jnp.float32(-1e30))
        m = jnp.max(s, axis=-1, keepdims=True)
        p = jnp.exp(s - m)
        p = p / jnp.sum(p, axis=-1, keepdims=True)          # f32 softmax
        o_h = jnp.dot(p.astype(jnp.bfloat16), vh,
                      preferred_element_type=jnp.float32)   # (S, D)
        head_outs.append(o_h)

    attn = jnp.concatenate(head_outs, axis=-1)               # (S, Hq*D) lane-dense
    out = jnp.dot(attn.astype(jnp.bfloat16), wo_ref[...],
                  preferred_element_type=jnp.float32)        # (S, E)

    o_ref[0] = (h + out).astype(o_ref.dtype)                 # residual add, lane-dense store


def attention_block(h, gamma, wqkv, wo, cos, sin, cfg):
    B, S, E = h.shape
    D, Hq, Hkv = cfg.head_dim, cfg.att_heads, cfg.kv_heads
    kernel = functools.partial(_attn_block_kernel, eps=cfg.rms_eps,
                               head_dim=D, q_heads=Hq, kv_heads=Hkv)
    return pl.pallas_call(
        kernel,
        out_shape=jax.ShapeDtypeStruct((B, S, E), jnp.float32),
        grid=(B,),
        in_specs=[
            pl.BlockSpec((1, S, E), lambda b: (b, 0, 0)),
            pl.BlockSpec((1, E), lambda b: (0, 0)),
            pl.BlockSpec(wqkv.shape, lambda b: (0, 0)),
            pl.BlockSpec(wo.shape, lambda b: (0, 0)),
            pl.BlockSpec((S, D), lambda b: (0, 0)),
            pl.BlockSpec((S, D), lambda b: (0, 0)),
        ],
        out_specs=pl.BlockSpec((1, S, E), lambda b: (b, 0, 0)),
        compiler_params=pltpu.CompilerParams(dimension_semantics=("parallel",)),
    )(h, gamma, wqkv, wo, cos, sin)


# -------------------- fused MLP block kernel --------------------
def _mlp_block_kernel(h_ref, g_ref, wgu_ref, wd_ref, o_ref, *, eps, inter):
    h = h_ref[0].astype(jnp.float32)                         # (S, E) residual
    x = _rmsnorm_f32(h, g_ref[...], eps)
    # Fused gate+up matmul ([E, 2I] weight), bf16 on the MXU, f32 acc.
    gu = jnp.dot(x.astype(jnp.bfloat16), wgu_ref[...],
                 preferred_element_type=jnp.float32)         # (S, 2I)
    gate = gu[:, :inter]
    up = gu[:, inter:]
    act = (gate * jax.nn.sigmoid(gate)) * up                  # SiLU(gate) * up, f32
    out = jnp.dot(act.astype(jnp.bfloat16), wd_ref[...],
                  preferred_element_type=jnp.float32)         # (S, E)
    o_ref[0] = (h + out).astype(o_ref.dtype)


def mlp_block(h, gamma, wgu, wd, cfg):
    B, S, E = h.shape
    kernel = functools.partial(_mlp_block_kernel, eps=cfg.rms_eps,
                               inter=cfg.intermediate_size)
    return pl.pallas_call(
        kernel,
        out_shape=jax.ShapeDtypeStruct((B, S, E), jnp.float32),
        grid=(B,),
        in_specs=[
            pl.BlockSpec((1, S, E), lambda b: (b, 0, 0)),
            pl.BlockSpec((1, E), lambda b: (0, 0)),
            pl.BlockSpec(wgu.shape, lambda b: (0, 0)),
            pl.BlockSpec(wd.shape, lambda b: (0, 0)),
        ],
        out_specs=pl.BlockSpec((1, S, E), lambda b: (b, 0, 0)),
        compiler_params=pltpu.CompilerParams(dimension_semantics=("parallel",)),
    )(h, gamma, wgu, wd)


# -------------------- fused final norm + lm_head kernel --------------------
def _final_head_kernel(h_ref, g_ref, w_ref, o_ref, *, eps):
    h = h_ref[0].astype(jnp.float32)
    x = _rmsnorm_f32(h, g_ref[...], eps)
    o_ref[0] = jnp.dot(x.astype(jnp.bfloat16), w_ref[...],
                       preferred_element_type=jnp.float32).astype(o_ref.dtype)


def final_norm_head(h, gamma, w_head, cfg):
    B, S, E = h.shape
    V = w_head.shape[1]
    kernel = functools.partial(_final_head_kernel, eps=cfg.rms_eps)
    return pl.pallas_call(
        kernel,
        out_shape=jax.ShapeDtypeStruct((B, S, V), jnp.float32),
        grid=(B,),
        in_specs=[
            pl.BlockSpec((1, S, E), lambda b: (b, 0, 0)),
            pl.BlockSpec((1, E), lambda b: (0, 0)),
            pl.BlockSpec(w_head.shape, lambda b: (0, 0)),
        ],
        out_specs=pl.BlockSpec((1, S, V), lambda b: (b, 0, 0)),
        compiler_params=pltpu.CompilerParams(dimension_semantics=("parallel",)),
    )(h, gamma, w_head)


# -------------------- glue (plain JAX) --------------------
def rope_tables(seq_len, head_dim, base):
    ids = jnp.arange(head_dim // 2, dtype=jnp.float32)
    theta = jnp.power(jnp.float32(base), -2.0 * ids / head_dim)
    pos = jnp.arange(seq_len, dtype=jnp.float32)[:, None]
    emb = pos * theta[None, :]                                # (S, D/2)
    cos = jnp.concatenate([jnp.cos(emb), jnp.cos(emb)], axis=-1)  # (S, D)
    sin = jnp.concatenate([jnp.sin(emb), jnp.sin(emb)], axis=-1)
    return cos, sin


def init_params(cfg, key):
    def nrm(k, shape, scale=0.02):
        return scale * jax.random.normal(k, shape, dtype=jnp.float32)

    keys = jax.random.split(key, 2 + cfg.layer_num)
    params = {
        "embed": nrm(keys[0], (cfg.vocab_size, cfg.embedding_dim)),
        "lm_head": nrm(keys[1], (cfg.embedding_dim, cfg.vocab_size)).astype(jnp.bfloat16),
        "norm_g": jnp.ones((1, cfg.embedding_dim), jnp.float32),
        "layers": [],
    }
    E, D, Hq, Hkv, I = (cfg.embedding_dim, cfg.head_dim, cfg.att_heads,
                        cfg.kv_heads, cfg.intermediate_size)
    for l in range(cfg.layer_num):
        lk = jax.random.split(keys[2 + l], 7)
        wq = nrm(lk[0], (E, Hq * D))
        wk = nrm(lk[1], (E, Hkv * D))
        wv = nrm(lk[2], (E, Hkv * D))
        wo = nrm(lk[3], (Hq * D, E))
        wg = nrm(lk[4], (E, I))
        wu = nrm(lk[5], (E, I))
        wd = nrm(lk[6], (I, E))
        params["layers"].append(
            {
                # fused, bf16 weights for the MXU
                "wqkv": jnp.concatenate([wq, wk, wv], axis=1).astype(jnp.bfloat16),
                "wo": wo.astype(jnp.bfloat16),
                "wgu": jnp.concatenate([wg, wu], axis=1).astype(jnp.bfloat16),
                "wd": wd.astype(jnp.bfloat16),
                "ln1_g": jnp.ones((1, E), jnp.float32),
                "ln2_g": jnp.ones((1, E), jnp.float32),
            }
        )
    return params


def llama3_forward(params, ids, cfg):
    B, S = ids.shape
    h = jnp.take(params["embed"], ids, axis=0)                # (B, S, E) f32 residual stream
    cos, sin = rope_tables(S, cfg.head_dim, cfg.base)         # (S, D)

    for layer in params["layers"]:
        h = attention_block(h, layer["ln1_g"], layer["wqkv"], layer["wo"],
                            cos, sin, cfg)
        h = mlp_block(h, layer["ln2_g"], layer["wgu"], layer["wd"], cfg)

    logits = final_norm_head(h, params["norm_g"], params["lm_head"], cfg)
    # TODO(synk): optional cross-entropy loss (targets path) not implemented.
    return logits


if __name__ == "__main__":
    cfg = Config()
    key = jax.random.PRNGKey(0)
    pkey, ikey = jax.random.split(key)
    params = init_params(cfg, pkey)

    batch, seq = 2, 8
    ids = jax.random.randint(ikey, (batch, seq), 0, cfg.vocab_size, dtype=jnp.int32)

    fwd = jax.jit(functools.partial(llama3_forward, cfg=cfg))
    logits = fwd(params, ids)
    jax.block_until_ready(logits)

    assert logits.shape == (batch, seq, cfg.vocab_size)
    assert bool(jnp.all(jnp.isfinite(logits)))
    print("KERNEL_OK")
</pallas_src>

<mosaic_0001>
module attributes {stable_mosaic.version = 11 : i64} {
  func.func @_attn_block_kernel(%arg0: i32, %arg1: memref<1x8x128xf32, #tpu.memory_space<vmem>>, %arg2: memref<1x128xf32, #tpu.memory_space<vmem>>, %arg3: memref<128x512xbf16, #tpu.memory_space<vmem>>, %arg4: memref<256x128xbf16, #tpu.memory_space<vmem>>, %arg5: memref<8x64xf32, #tpu.memory_space<vmem>>, %arg6: memref<8x64xf32, #tpu.memory_space<vmem>>, %arg7: memref<1x8x128xf32, #tpu.memory_space<vmem>>) attributes {dimension_semantics = [#tpu.dimension_semantics<parallel>], iteration_bounds = array<i64: 2>, scalar_prefetch = 0 : i64, scratch_operands = 0 : i64, tpu.core_type = #tpu.core_type<tc>, window_params = [{transform_indices = @transform_0, window_bounds = array<i64: 1, 8, 128>}, {pipeline_mode = #tpu.pipeline_mode<synchronous>, transform_indices = @transform_1, window_bounds = array<i64: 1, 128>}, {pipeline_mode = #tpu.pipeline_mode<synchronous>, transform_indices = @transform_2, window_bounds = array<i64: 128, 512>}, {pipeline_mode = #tpu.pipeline_mode<synchronous>, transform_indices = @transform_3, window_bounds = array<i64: 256, 128>}, {pipeline_mode = #tpu.pipeline_mode<synchronous>, transform_indices = @transform_4, window_bounds = array<i64: 8, 64>}, {pipeline_mode = #tpu.pipeline_mode<synchronous>, transform_indices = @transform_5, window_bounds = array<i64: 8, 64>}, {transform_indices = @transform_6, window_bounds = array<i64: 1, 8, 128>}]} {
    %c0 = arith.constant 0 : index
    %c0_0 = arith.constant 0 : index
    %c0_1 = arith.constant 0 : index
    %0 = vector.load %arg1[%c0, %c0_0, %c0_1] : memref<1x8x128xf32, #tpu.memory_space<vmem>>, vector<1x8x128xf32>
    %1 = vector.shape_cast %0 : vector<1x8x128xf32> to vector<8x128xf32>
    %c0_2 = arith.constant 0 : index
    %c0_3 = arith.constant 0 : index
    %2 = vector.load %arg2[%c0_2, %c0_3] : memref<1x128xf32, #tpu.memory_space<vmem>>, vector<1x128xf32>
    %3 = arith.mulf %1, %1 : vector<8x128xf32>
    %cst = arith.constant dense<0.000000e+00> : vector<8xf32>
    %4 = vector.multi_reduction <add>, %3, %cst [1] : vector<8x128xf32> to vector<8xf32>
    %5 = vector.shape_cast %4 : vector<8xf32> to vector<8x1xf32>
    %cst_4 = arith.constant 1.280000e+02 : f32
    %6 = vector.broadcast %cst_4 : f32 to vector<8x1xf32>
    %7 = arith.divf %5, %6 : vector<8x1xf32>
    %cst_5 = arith.constant 9.99999997E-7 : f32
    %8 = vector.broadcast %cst_5 : f32 to vector<8x1xf32>
    %9 = arith.addf %7, %8 : vector<8x1xf32>
    %10 = math.rsqrt %9 : vector<8x1xf32>
    %11 = vector.broadcast %10 : vector<8x1xf32> to vector<8x128xf32>
    %12 = arith.mulf %1, %11 : vector<8x128xf32>
    %13 = vector.broadcast %2 : vector<1x128xf32> to vector<8x128xf32>
    %14 = arith.mulf %12, %13 : vector<8x128xf32>
    %15 = arith.truncf %14 : vector<8x128xf32> to vector<8x128xbf16>
    %c0_6 = arith.constant 0 : index
    %c0_7 = arith.constant 0 : index
    %16 = vector.load %arg3[%c0_6, %c0_7] : memref<128x512xbf16, #tpu.memory_space<vmem>>, vector<128x512xbf16>
    %cst_8 = arith.constant dense<0.000000e+00> : vector<8x512xf32>
    %17 = tpu.matmul %15, %16, %cst_8 {dimension_numbers = #tpu.dot_dimension_numbers<[1], [0], [0], [1], [0, 0, 1, 1], [], []>} : vector<8x128xbf16>, vector<128x512xbf16>, vector<8x512xf32> -> vector<8x512xf32>
    %18 = vector.extract_strided_slice %17 {offsets = [0, 0], sizes = [8, 256], strides = [1, 1]} : vector<8x512xf32> to vector<8x256xf32>
    %19 = vector.extract_strided_slice %17 {offsets = [0, 256], sizes = [8, 128], strides = [1, 1]} : vector<8x512xf32> to vector<8x128xf32>
    %20 = vector.extract_strided_slice %17 {offsets = [0, 384], sizes = [8, 128], strides = [1, 1]} : vector<8x512xf32> to vector<8x128xf32>
    %c0_9 = arith.constant 0 : index
    %c0_10 = arith.constant 0 : index
    %21 = vector.load %arg5[%c0_9, %c0_10] : memref<8x64xf32, #tpu.memory_space<vmem>>, vector<8x64xf32>
    %c0_11 = arith.constant 0 : index
    %c0_12 = arith.constant 0 : index
    %22 = vector.load %arg6[%c0_11, %c0_12] : memref<8x64xf32, #tpu.memory_space<vmem>>, vector<8x64xf32>
    %23 = tpu.iota {dimensions = array<i32: 0>} : vector<8x8xi32>
    %24 = tpu.iota {dimensions = array<i32: 1>} : vector<8x8xi32>
    %25 = arith.cmpi sle, %24, %23 : vector<8x8xi32>
    %26 = vector.extract_strided_slice %19 {offsets = [0, 0], sizes = [8, 64], strides = [1, 1]} : vector<8x128xf32> to vector<8x64xf32>
    %27 = vector.extract_strided_slice %26 {offsets = [0, 0], sizes = [8, 32], strides = [1, 1]} : vector<8x64xf32> to vector<8x32xf32>
    %28 = vector.extract_strided_slice %26 {offsets = [0, 32], sizes = [8, 32], strides = [1, 1]} : vector<8x64xf32> to vector<8x32xf32>
    %cst_13 = arith.constant 0.000000e+00 : f32
    %29 = vector.broadcast %cst_13 : f32 to vector<8x32xf32>
    %30 = arith.subf %29, %28 : vector<8x32xf32>
    %31 = tpu.concatenate %30, %27 in 1 : vector<8x32xf32>, vector<8x32xf32> -> vector<8x64xf32>
    %32 = arith.mulf %26, %21 : vector<8x64xf32>
    %33 = arith.mulf %31, %22 : vector<8x64xf32>
    %34 = arith.addf %32, %33 : vector<8x64xf32>
    %35 = arith.truncf %34 : vector<8x64xf32> to vector<8x64xbf16>
    %36 = vector.extract_strided_slice %20 {offsets = [0, 0], sizes = [8, 64], strides = [1, 1]} : vector<8x128xf32> to vector<8x64xf32>
    %37 = arith.truncf %36 : vector<8x64xf32> to vector<8x64xbf16>
    %38 = vector.extract_strided_slice %19 {offsets = [0, 64], sizes = [8, 64], strides = [1, 1]} : vector<8x128xf32> to vector<8x64xf32>
    %39 = vector.extract_strided_slice %38 {offsets = [0, 0], sizes = [8, 32], strides = [1, 1]} : vector<8x64xf32> to vector<8x32xf32>
    %40 = vector.extract_strided_slice %38 {offsets = [0, 32], sizes = [8, 32], strides = [1, 1]} : vector<8x64xf32> to vector<8x32xf32>
    %cst_14 = arith.constant 0.000000e+00 : f32
    %41 = vector.broadcast %cst_14 : f32 to vector<8x32xf32>
    %42 = arith.subf %41, %40 : vector<8x32xf32>
    %43 = tpu.concatenate %42, %39 in 1 : vector<8x32xf32>, vector<8x32xf32> -> vector<8x64xf32>
    %44 = arith.mulf %38, %21 : vector<8x64xf32>
    %45 = arith.mulf %43, %22 : vector<8x64xf32>
    %46 = arith.addf %44, %45 : vector<8x64xf32>
    %47 = arith.truncf %46 : vector<8x64xf32> to vector<8x64xbf16>
    %48 = vector.extract_strided_slice %20 {offsets = [0, 64], sizes = [8, 64], strides = [1, 1]} : vector<8x128xf32> to vector<8x64xf32>
    %49 = arith.truncf %48 : vector<8x64xf32> to vector<8x64xbf16>
    %50 = vector.extract_strided_slice %18 {offsets = [0, 0], sizes = [8, 64], strides = [1, 1]} : vector<8x256xf32> to vector<8x64xf32>
    %51 = vector.extract_strided_slice %50 {offsets = [0, 0], sizes = [8, 32], strides = [1, 1]} : vector<8x64xf32> to vector<8x32xf32>
    %52 = vector.extract_strided_slice %50 {offsets = [0, 32], sizes = [8, 32], strides = [1, 1]} : vector<8x64xf32> to vector<8x32xf32>
    %cst_15 = arith.constant 0.000000e+00 : f32
    %53 = vector.broadcast %cst_15 : f32 to vector<8x32xf32>
    %54 = arith.subf %53, %52 : vector<8x32xf32>
    %55 = tpu.concatenate %54, %51 in 1 : vector<8x32xf32>, vector<8x32xf32> -> vector<8x64xf32>
    %56 = arith.mulf %50, %21 : vector<8x64xf32>
    %57 = arith.mulf %55, %22 : vector<8x64xf32>
    %58 = arith.addf %56, %57 : vector<8x64xf32>
    %59 = arith.truncf %58 : vector<8x64xf32> to vector<8x64xbf16>
    %cst_16 = arith.constant dense<0.000000e+00> : vector<8x8xf32>
    %60 = tpu.matmul %59, %35, %cst_16 {dimension_numbers = #tpu.dot_dimension_numbers<[1], [1], [0], [0], [0, 0, 1, 0], [], []>} : vector<8x64xbf16>, vector<8x64xbf16>, vector<8x8xf32> -> vector<8x8xf32>
    %cst_17 = arith.constant 1.250000e-01 : f32
    %61 = vector.broadcast %cst_17 : f32 to vector<8x8xf32>
    %62 = arith.mulf %60, %61 : vector<8x8xf32>
    %cst_18 = arith.constant -1.000000e+30 : f32
    %63 = vector.broadcast %cst_18 : f32 to vector<8x8xf32>
    %64 = arith.select %25, %62, %63 : vector<8x8xi1>, vector<8x8xf32>
    %cst_19 = arith.constant dense<0xFF800000> : vector<8xf32>
    %65 = vector.multi_reduction <maximumf>, %64, %cst_19 [1] : vector<8x8xf32> to vector<8xf32>
    %66 = vector.shape_cast %65 : vector<8xf32> to vector<8x1xf32>
    %67 = vector.broadcast %66 : vector<8x1xf32> to vector<8x8xf32>
    %68 = arith.subf %64, %67 : vector<8x8xf32>
    %69 = math.exp %68 : vector<8x8xf32>
    %cst_20 = arith.constant dense<0.000000e+00> : vector<8xf32>
    %70 = vector.multi_reduction <add>, %69, %cst_20 [1] : vector<8x8xf32> to vector<8xf32>
    %71 = vector.shape_cast %70 : vector<8xf32> to vector<8x1xf32>
    %72 = vector.broadcast %71 : vector<8x1xf32> to vector<8x8xf32>
    %73 = arith.divf %69, %72 : vector<8x8xf32>
    %74 = arith.truncf %73 : vector<8x8xf32> to vector<8x8xbf16>
    %cst_21 = arith.constant dense<0.000000e+00> : vector<8x64xf32>
    %75 = tpu.matmul %74, %37, %cst_21 {dimension_numbers = #tpu.dot_dimension_numbers<[1], [0], [0], [1], [0, 0, 1, 1], [], []>} : vector<8x8xbf16>, vector<8x64xbf16>, vector<8x64xf32> -> vector<8x64xf32>
    %76 = vector.extract_strided_slice %18 {offsets = [0, 64], sizes = [8, 64], strides = [1, 1]} : vector<8x256xf32> to vector<8x64xf32>
    %77 = vector.extract_strided_slice %76 {offsets = [0, 0], sizes = [8, 32], strides = [1, 1]} : vector<8x64xf32> to vector<8x32xf32>
    %78 = vector.extract_strided_slice %76 {offsets = [0, 32], sizes = [8, 32], strides = [1, 1]} : vector<8x64xf32> to vector<8x32xf32>
    %cst_22 = arith.constant 0.000000e+00 : f32
    %79 = vector.broadcast %cst_22 : f32 to vector<8x32xf32>
    %80 = arith.subf %79, %78 : vector<8x32xf32>
    %81 = tpu.concatenate %80, %77 in 1 : vector<8x32xf32>, vector<8x32xf32> -> vector<8x64xf32>
    %82 = arith.mulf %76, %21 : vector<8x64xf32>
    %83 = arith.mulf %81, %22 : vector<8x64xf32>
    %84 = arith.addf %82, %83 : vector<8x64xf32>
    %85 = arith.truncf %84 : vector<8x64xf32> to vector<8x64xbf16>
    %cst_23 = arith.constant dense<0.000000e+00> : vector<8x8xf32>
    %86 = tpu.matmul %85, %35, %cst_23 {dimension_numbers = #tpu.dot_dimension_numbers<[1], [1], [0], [0], [0, 0, 1, 0], [], []>} : vector<8x64xbf16>, vector<8x64xbf16>, vector<8x8xf32> -> vector<8x8xf32>
    %cst_24 = arith.constant 1.250000e-01 : f32
    %87 = vector.broadcast %cst_24 : f32 to vector<8x8xf32>
    %88 = arith.mulf %86, %87 : vector<8x8xf32>
    %cst_25 = arith.constant -1.000000e+30 : f32
    %89 = vector.broadcast %cst_25 : f32 to vector<8x8xf32>
    %90 = arith.select %25, %88, %89 : vector<8x8xi1>, vector<8x8xf32>
    %cst_26 = arith.constant dense<0xFF800000> : vector<8xf32>
    %91 = vector.multi_reduction <maximumf>, %90, %cst_26 [1] : vector<8x8xf32> to vector<8xf32>
    %92 = vector.shape_cast %91 : vector<8xf32> to vector<8x1xf32>
    %93 = vector.broadcast %92 : vector<8x1xf32> to vector<8x8xf32>
    %94 = arith.subf %90, %93 : vector<8x8xf32>
    %95 = math.exp %94 : vector<8x8xf32>
    %cst_27 = arith.constant dense<0.000000e+00> : vector<8xf32>
    %96 = vector.multi_reduction <add>, %95, %cst_27 [1] : vector<8x8xf32> to vector<8xf32>
    %97 = vector.shape_cast %96 : vector<8xf32> to vector<8x1xf32>
    %98 = vector.broadcast %97 : vector<8x1xf32> to vector<8x8xf32>
    %99 = arith.divf %95, %98 : vector<8x8xf32>
    %100 = arith.truncf %99 : vector<8x8xf32> to vector<8x8xbf16>
    %cst_28 = arith.constant dense<0.000000e+00> : vector<8x64xf32>
    %101 = tpu.matmul %100, %37, %cst_28 {dimension_numbers = #tpu.dot_dimension_numbers<[1], [0], [0], [1], [0, 0, 1, 1], [], []>} : vector<8x8xbf16>, vector<8x64xbf16>, vector<8x64xf32> -> vector<8x64xf32>
    %102 = vector.extract_strided_slice %18 {offsets = [0, 128], sizes = [8, 64], strides = [1, 1]} : vector<8x256xf32> to vector<8x64xf32>
    %103 = vector.extract_strided_slice %102 {offsets = [0, 0], sizes = [8, 32], strides = [1, 1]} : vector<8x64xf32> to vector<8x32xf32>
    %104 = vector.extract_strided_slice %102 {offsets = [0, 32], sizes = [8, 32], strides = [1, 1]} : vector<8x64xf32> to vector<8x32xf32>
    %cst_29 = arith.constant 0.000000e+00 : f32
    %105 = vector.broadcast %cst_29 : f32 to vector<8x32xf32>
    %106 = arith.subf %105, %104 : vector<8x32xf32>
    %107 = tpu.concatenate %106, %103 in 1 : vector<8x32xf32>, vector<8x32xf32> -> vector<8x64xf32>
    %108 = arith.mulf %102, %21 : vector<8x64xf32>
    %109 = arith.mulf %107, %22 : vector<8x64xf32>
    %110 = arith.addf %108, %109 : vector<8x64xf32>
    %111 = arith.truncf %110 : vector<8x64xf32> to vector<8x64xbf16>
    %cst_30 = arith.constant dense<0.000000e+00> : vector<8x8xf32>
    %112 = tpu.matmul %111, %47, %cst_30 {dimension_numbers = #tpu.dot_dimension_numbers<[1], [1], [0], [0], [0, 0, 1, 0], [], []>} : vector<8x64xbf16>, vector<8x64xbf16>, vector<8x8xf32> -> vector<8x8xf32>
    %cst_31 = arith.constant 1.250000e-01 : f32
    %113 = vector.broadcast %cst_31 : f32 to vector<8x8xf32>
    %114 = arith.mulf %112, %113 : vector<8x8xf32>
    %cst_32 = arith.constant -1.000000e+30 : f32
    %115 = vector.broadcast %cst_32 : f32 to vector<8x8xf32>
    %116 = arith.select %25, %114, %115 : vector<8x8xi1>, vector<8x8xf32>
    %cst_33 = arith.constant dense<0xFF800000> : vector<8xf32>
    %117 = vector.multi_reduction <maximumf>, %116, %cst_33 [1] : vector<8x8xf32> to vector<8xf32>
    %118 = vector.shape_cast %117 : vector<8xf32> to vector<8x1xf32>
    %119 = vector.broadcast %118 : vector<8x1xf32> to vector<8x8xf32>
    %120 = arith.subf %116, %119 : vector<8x8xf32>
    %121 = math.exp %120 : vector<8x8xf32>
    %cst_34 = arith.constant dense<0.000000e+00> : vector<8xf32>
    %122 = vector.multi_reduction <add>, %121, %cst_34 [1] : vector<8x8xf32> to vector<8xf32>
    %123 = vector.shape_cast %122 : vector<8xf32> to vector<8x1xf32>
    %124 = vector.broadcast %123 : vector<8x1xf32> to vector<8x8xf32>
    %125 = arith.divf %121, %124 : vector<8x8xf32>
    %126 = arith.truncf %125 : vector<8x8xf32> to vector<8x8xbf16>
    %cst_35 = arith.constant dense<0.000000e+00> : vector<8x64xf32>
    %127 = tpu.matmul %126, %49, %cst_35 {dimension_numbers = #tpu.dot_dimension_numbers<[1], [0], [0], [1], [0, 0, 1, 1], [], []>} : vector<8x8xbf16>, vector<8x64xbf16>, vector<8x64xf32> -> vector<8x64xf32>
    %128 = vector.extract_strided_slice %18 {offsets = [0, 192], sizes = [8, 64], strides = [1, 1]} : vector<8x256xf32> to vector<8x64xf32>
    %129 = vector.extract_strided_slice %128 {offsets = [0, 0], sizes = [8, 32], strides = [1, 1]} : vector<8x64xf32> to vector<8x32xf32>
    %130 = vector.extract_strided_slice %128 {offsets = [0, 32], sizes = [8, 32], strides = [1, 1]} : vector<8x64xf32> to vector<8x32xf32>
    %cst_36 = arith.constant 0.000000e+00 : f32
    %131 = vector.broadcast %cst_36 : f32 to vector<8x32xf32>
    %132 = arith.subf %131, %130 : vector<8x32xf32>
    %133 = tpu.concatenate %132, %129 in 1 : vector<8x32xf32>, vector<8x32xf32> -> vector<8x64xf32>
    %134 = arith.mulf %128, %21 : vector<8x64xf32>
    %135 = arith.mulf %133, %22 : vector<8x64xf32>
    %136 = arith.addf %134, %135 : vector<8x64xf32>
    %137 = arith.truncf %136 : vector<8x64xf32> to vector<8x64xbf16>
    %cst_37 = arith.constant dense<0.000000e+00> : vector<8x8xf32>
    %138 = tpu.matmul %137, %47, %cst_37 {dimension_numbers = #tpu.dot_dimension_numbers<[1], [1], [0], [0], [0, 0, 1, 0], [], []>} : vector<8x64xbf16>, vector<8x64xbf16>, vector<8x8xf32> -> vector<8x8xf32>
    %cst_38 = arith.constant 1.250000e-01 : f32
    %139 = vector.broadcast %cst_38 : f32 to vector<8x8xf32>
    %140 = arith.mulf %138, %139 : vector<8x8xf32>
    %cst_39 = arith.constant -1.000000e+30 : f32
    %141 = vector.broadcast %cst_39 : f32 to vector<8x8xf32>
    %142 = arith.select %25, %140, %141 : vector<8x8xi1>, vector<8x8xf32>
    %cst_40 = arith.constant dense<0xFF800000> : vector<8xf32>
    %143 = vector.multi_reduction <maximumf>, %142, %cst_40 [1] : vector<8x8xf32> to vector<8xf32>
    %144 = vector.shape_cast %143 : vector<8xf32> to vector<8x1xf32>
    %145 = vector.broadcast %144 : vector<8x1xf32> to vector<8x8xf32>
    %146 = arith.subf %142, %145 : vector<8x8xf32>
    %147 = math.exp %146 : vector<8x8xf32>
    %cst_41 = arith.constant dense<0.000000e+00> : vector<8xf32>
    %148 = vector.multi_reduction <add>, %147, %cst_41 [1] : vector<8x8xf32> to vector<8xf32>
    %149 = vector.shape_cast %148 : vector<8xf32> to vector<8x1xf32>
    %150 = vector.broadcast %149 : vector<8x1xf32> to vector<8x8xf32>
    %151 = arith.divf %147, %150 : vector<8x8xf32>
    %152 = arith.truncf %151 : vector<8x8xf32> to vector<8x8xbf16>
    %cst_42 = arith.constant dense<0.000000e+00> : vector<8x64xf32>
    %153 = tpu.matmul %152, %49, %cst_42 {dimension_numbers = #tpu.dot_dimension_numbers<[1], [0], [0], [1], [0, 0, 1, 1], [], []>} : vector<8x8xbf16>, vector<8x64xbf16>, vector<8x64xf32> -> vector<8x64xf32>
    %154 = tpu.concatenate %75, %101, %127, %153 in 1 : vector<8x64xf32>, vector<8x64xf32>, vector<8x64xf32>, vector<8x64xf32> -> vector<8x256xf32>
    %155 = arith.truncf %154 : vector<8x256xf32> to vector<8x256xbf16>
    %c0_43 = arith.constant 0 : index
    %c0_44 = arith.constant 0 : index
    %156 = vector.load %arg4[%c0_43, %c0_44] : memref<256x128xbf16, #tpu.memory_space<vmem>>, vector<256x128xbf16>
    %cst_45 = arith.constant dense<0.000000e+00> : vector<8x128xf32>
    %157 = tpu.matmul %155, %156, %cst_45 {dimension_numbers = #tpu.dot_dimension_numbers<[1], [0], [0], [1], [0, 0, 1, 1], [], []>} : vector<8x256xbf16>, vector<256x128xbf16>, vector<8x128xf32> -> vector<8x128xf32>
    %158 = arith.addf %1, %157 : vector<8x128xf32>
    %c0_46 = arith.constant 0 : index
    %c0_47 = arith.constant 0 : index
    %c0_48 = arith.constant 0 : index
    %159 = vector.load %arg7[%c0_46, %c0_47, %c0_48] : memref<1x8x128xf32, #tpu.memory_space<vmem>>, vector<1x8x128xf32>
    %160 = vector.shape_cast %159 : vector<1x8x128xf32> to vector<8x128xf32>
    %161 = vector.shape_cast %158 : vector<8x128xf32> to vector<1x8x128xf32>
    tpu.vector_store %arg7[%c0_46, %c0_47, %c0_48], %161 {strides = array<i32>} : memref<1x8x128xf32, #tpu.memory_space<vmem>>, vector<1x8x128xf32>,
    return
  }
  func.func @transform_0(%arg0: i32) -> (i32, i32, i32) {
    %c0_i32 = arith.constant 0 : i32
    %c0_i32_0 = arith.constant 0 : i32
    %c0_i32_1 = arith.constant 0 : i32
    return %arg0, %c0_i32, %c0_i32_0 : i32, i32, i32
  }
  func.func @transform_1(%arg0: i32) -> (i32, i32) {
    %c0_i32 = arith.constant 0 : i32
    %c0_i32_0 = arith.constant 0 : i32
    %c0_i32_1 = arith.constant 0 : i32
    return %c0_i32, %c0_i32_0 : i32, i32
  }
  func.func @transform_2(%arg0: i32) -> (i32, i32) {
    %c0_i32 = arith.constant 0 : i32
    %c0_i32_0 = arith.constant 0 : i32
    %c0_i32_1 = arith.constant 0 : i32
    return %c0_i32, %c0_i32_0 : i32, i32
  }
  func.func @transform_3(%arg0: i32) -> (i32, i32) {
    %c0_i32 = arith.constant 0 : i32
    %c0_i32_0 = arith.constant 0 : i32
    %c0_i32_1 = arith.constant 0 : i32
    return %c0_i32, %c0_i32_0 : i32, i32
  }
  func.func @transform_4(%arg0: i32) -> (i32, i32) {
    %c0_i32 = arith.constant 0 : i32
    %c0_i32_0 = arith.constant 0 : i32
    %c0_i32_1 = arith.constant 0 : i32
    return %c0_i32, %c0_i32_0 : i32, i32
  }
  func.func @transform_5(%arg0: i32) -> (i32, i32) {
    %c0_i32 = arith.constant 0 : i32
    %c0_i32_0 = arith.constant 0 : i32
    %c0_i32_1 = arith.constant 0 : i32
    return %c0_i32, %c0_i32_0 : i32, i32
  }
  func.func @transform_6(%arg0: i32) -> (i32, i32, i32) {
    %c0_i32 = arith.constant 0 : i32
    %c0_i32_0 = arith.constant 0 : i32
    %c0_i32_1 = arith.constant 0 : i32
    return %arg0, %c0_i32, %c0_i32_0 : i32, i32, i32
  }
}

module attributes {stable_mosaic.version = 11 : i64} {
  func.func @_final_head_kernel(%arg0: i32, %arg1: memref<1x8x128xf32, #tpu.memory_space<vmem>>, %arg2: memref<1x128xf32, #tpu.memory_space<vmem>>, %arg3: memref<128x512xbf16, #tpu.memory_space<vmem>>, %arg4: memref<1x8x512xf32, #tpu.memory_space<vmem>>) attributes {dimension_semantics = [#tpu.dimension_semantics<parallel>], iteration_bounds = array<i64: 2>, scalar_prefetch = 0 : i64, scratch_operands = 0 : i64, tpu.core_type = #tpu.core_type<tc>, window_params = [{transform_indices = @transform_0, window_bounds = array<i64: 1, 8, 128>}, {pipeline_mode = #tpu.pipeline_mode<synchronous>, transform_indices = @transform_1, window_bounds = array<i64: 1, 128>}, {pipeline_mode = #tpu.pipeline_mode<synchronous>, transform_indices = @transform_2, window_bounds = array<i64: 128, 512>}, {transform_indices = @transform_3, window_bounds = array<i64: 1, 8, 512>}]} {
    %c0 = arith.constant 0 : index
    %c0_0 = arith.constant 0 : index
    %c0_1 = arith.constant 0 : index
    %0 = vector.load %arg1[%c0, %c0_0, %c0_1] : memref<1x8x128xf32, #tpu.memory_space<vmem>>, vector<1x8x128xf32>
    %1 = vector.shape_cast %0 : vector<1x8x128xf32> to vector<8x128xf32>
    %c0_2 = arith.constant 0 : index
    %c0_3 = arith.constant 0 : index
    %2 = vector.load %arg2[%c0_2, %c0_3] : memref<1x128xf32, #tpu.memory_space<vmem>>, vector<1x128xf32>
    %3 = arith.mulf %1, %1 : vector<8x128xf32>
    %cst = arith.constant dense<0.000000e+00> : vector<8xf32>
    %4 = vector.multi_reduction <add>, %3, %cst [1] : vector<8x128xf32> to vector<8xf32>
    %5 = vector.shape_cast %4 : vector<8xf32> to vector<8x1xf32>
    %cst_4 = arith.constant 1.280000e+02 : f32
    %6 = vector.broadcast %cst_4 : f32 to vector<8x1xf32>
    %7 = arith.divf %5, %6 : vector<8x1xf32>
    %cst_5 = arith.constant 9.99999997E-7 : f32
    %8 = vector.broadcast %cst_5 : f32 to vector<8x1xf32>
    %9 = arith.addf %7, %8 : vector<8x1xf32>
    %10 = math.rsqrt %9 : vector<8x1xf32>
    %11 = vector.broadcast %10 : vector<8x1xf32> to vector<8x128xf32>
    %12 = arith.mulf %1, %11 : vector<8x128xf32>
    %13 = vector.broadcast %2 : vector<1x128xf32> to vector<8x128xf32>
    %14 = arith.mulf %12, %13 : vector<8x128xf32>
    %15 = arith.truncf %14 : vector<8x128xf32> to vector<8x128xbf16>
    %c0_6 = arith.constant 0 : index
    %c0_7 = arith.constant 0 : index
    %16 = vector.load %arg3[%c0_6, %c0_7] : memref<128x512xbf16, #tpu.memory_space<vmem>>, vector<128x512xbf16>
    %cst_8 = arith.constant dense<0.000000e+00> : vector<8x512xf32>
    %17 = tpu.matmul %15, %16, %cst_8 {dimension_numbers = #tpu.dot_dimension_numbers<[1], [0], [0], [1], [0, 0, 1, 1], [], []>} : vector<8x128xbf16>, vector<128x512xbf16>, vector<8x512xf32> -> vector<8x512xf32>
    %c0_9 = arith.constant 0 : index
    %c0_10 = arith.constant 0 : index
    %c0_11 = arith.constant 0 : index
    %18 = vector.load %arg4[%c0_9, %c0_10, %c0_11] : memref<1x8x512xf32, #tpu.memory_space<vmem>>, vector<1x8x512xf32>
    %19 = vector.shape_cast %18 : vector<1x8x512xf32> to vector<8x512xf32>
    %20 = vector.shape_cast %17 : vector<8x512xf32> to vector<1x8x512xf32>
    tpu.vector_store %arg4[%c0_9, %c0_10, %c0_11], %20 {strides = array<i32>} : memref<1x8x512xf32, #tpu.memory_space<vmem>>, vector<1x8x512xf32>,
    return
  }
  func.func @transform_0(%arg0: i32) -> (i32, i32, i32) {
    %c0_i32 = arith.constant 0 : i32
    %c0_i32_0 = arith.constant 0 : i32
    %c0_i32_1 = arith.constant 0 : i32
    return %arg0, %c0_i32, %c0_i32_0 : i32, i32, i32
  }
  func.func @transform_1(%arg0: i32) -> (i32, i32) {
    %c0_i32 = arith.constant 0 : i32
    %c0_i32_0 = arith.constant 0 : i32
    %c0_i32_1 = arith.constant 0 : i32
    return %c0_i32, %c0_i32_0 : i32, i32
  }
  func.func @transform_2(%arg0: i32) -> (i32, i32) {
    %c0_i32 = arith.constant 0 : i32
    %c0_i32_0 = arith.constant 0 : i32
    %c0_i32_1 = arith.constant 0 : i32
    return %c0_i32, %c0_i32_0 : i32, i32
  }
  func.func @transform_3(%arg0: i32) -> (i32, i32, i32) {
    %c0_i32 = arith.constant 0 : i32
    %c0_i32_0 = arith.constant 0 : i32
    %c0_i32_1 = arith.constant 0 : i32
    return %arg0, %c0_i32, %c0_i32_0 : i32, i32, i32
  }
}

module attributes {stable_mosaic.version = 11 : i64} {
  func.func @_mlp_block_kernel(%arg0: i32, %arg1: memref<1x8x128xf32, #tpu.memory_space<vmem>>, %arg2: memref<1x128xf32, #tpu.memory_space<vmem>>, %arg3: memref<128x512xbf16, #tpu.memory_space<vmem>>, %arg4: memref<256x128xbf16, #tpu.memory_space<vmem>>, %arg5: memref<1x8x128xf32, #tpu.memory_space<vmem>>) attributes {dimension_semantics = [#tpu.dimension_semantics<parallel>], iteration_bounds = array<i64: 2>, scalar_prefetch = 0 : i64, scratch_operands = 0 : i64, tpu.core_type = #tpu.core_type<tc>, window_params = [{transform_indices = @transform_0, window_bounds = array<i64: 1, 8, 128>}, {pipeline_mode = #tpu.pipeline_mode<synchronous>, transform_indices = @transform_1, window_bounds = array<i64: 1, 128>}, {pipeline_mode = #tpu.pipeline_mode<synchronous>, transform_indices = @transform_2, window_bounds = array<i64: 128, 512>}, {pipeline_mode = #tpu.pipeline_mode<synchronous>, transform_indices = @transform_3, window_bounds = array<i64: 256, 128>}, {transform_indices = @transform_4, window_bounds = array<i64: 1, 8, 128>}]} {
    %c0 = arith.constant 0 : index
    %c0_0 = arith.constant 0 : index
    %c0_1 = arith.constant 0 : index
    %0 = vector.load %arg1[%c0, %c0_0, %c0_1] : memref<1x8x128xf32, #tpu.memory_space<vmem>>, vector<1x8x128xf32>
    %1 = vector.shape_cast %0 : vector<1x8x128xf32> to vector<8x128xf32>
    %c0_2 = arith.constant 0 : index
    %c0_3 = arith.constant 0 : index
    %2 = vector.load %arg2[%c0_2, %c0_3] : memref<1x128xf32, #tpu.memory_space<vmem>>, vector<1x128xf32>
    %3 = arith.mulf %1, %1 : vector<8x128xf32>
    %cst = arith.constant dense<0.000000e+00> : vector<8xf32>
    %4 = vector.multi_reduction <add>, %3, %cst [1] : vector<8x128xf32> to vector<8xf32>
    %5 = vector.shape_cast %4 : vector<8xf32> to vector<8x1xf32>
    %cst_4 = arith.constant 1.280000e+02 : f32
    %6 = vector.broadcast %cst_4 : f32 to vector<8x1xf32>
    %7 = arith.divf %5, %6 : vector<8x1xf32>
    %cst_5 = arith.constant 9.99999997E-7 : f32
    %8 = vector.broadcast %cst_5 : f32 to vector<8x1xf32>
    %9 = arith.addf %7, %8 : vector<8x1xf32>
    %10 = math.rsqrt %9 : vector<8x1xf32>
    %11 = vector.broadcast %10 : vector<8x1xf32> to vector<8x128xf32>
    %12 = arith.mulf %1, %11 : vector<8x128xf32>
    %13 = vector.broadcast %2 : vector<1x128xf32> to vector<8x128xf32>
    %14 = arith.mulf %12, %13 : vector<8x128xf32>
    %15 = arith.truncf %14 : vector<8x128xf32> to vector<8x128xbf16>
    %c0_6 = arith.constant 0 : index
    %c0_7 = arith.constant 0 : index
    %16 = vector.load %arg3[%c0_6, %c0_7] : memref<128x512xbf16, #tpu.memory_space<vmem>>, vector<128x512xbf16>
    %cst_8 = arith.constant dense<0.000000e+00> : vector<8x512xf32>
    %17 = tpu.matmul %15, %16, %cst_8 {dimension_numbers = #tpu.dot_dimension_numbers<[1], [0], [0], [1], [0, 0, 1, 1], [], []>} : vector<8x128xbf16>, vector<128x512xbf16>, vector<8x512xf32> -> vector<8x512xf32>
    %18 = vector.extract_strided_slice %17 {offsets = [0, 0], sizes = [8, 256], strides = [1, 1]} : vector<8x512xf32> to vector<8x256xf32>
    %19 = vector.extract_strided_slice %17 {offsets = [0, 256], sizes = [8, 256], strides = [1, 1]} : vector<8x512xf32> to vector<8x256xf32>
    %20 = arith.negf %18 : vector<8x256xf32>
    %21 = math.exp %20 : vector<8x256xf32>
    %cst_9 = arith.constant 1.000000e+00 : f32
    %22 = vector.broadcast %cst_9 : f32 to vector<8x256xf32>
    %23 = arith.addf %22, %21 : vector<8x256xf32>
    %24 = arith.divf %22, %23 : vector<8x256xf32>
    %25 = arith.mulf %18, %24 : vector<8x256xf32>
    %26 = arith.mulf %25, %19 : vector<8x256xf32>
    %27 = arith.truncf %26 : vector<8x256xf32> to vector<8x256xbf16>
    %c0_10 = arith.constant 0 : index
    %c0_11 = arith.constant 0 : index
    %28 = vector.load %arg4[%c0_10, %c0_11] : memref<256x128xbf16, #tpu.memory_space<vmem>>, vector<256x128xbf16>
    %cst_12 = arith.constant dense<0.000000e+00> : vector<8x128xf32>
    %29 = tpu.matmul %27, %28, %cst_12 {dimension_numbers = #tpu.dot_dimension_numbers<[1], [0], [0], [1], [0, 0, 1, 1], [], []>} : vector<8x256xbf16>, vector<256x128xbf16>, vector<8x128xf32> -> vector<8x128xf32>
    %30 = arith.addf %1, %29 : vector<8x128xf32>
    %c0_13 = arith.constant 0 : index
    %c0_14 = arith.constant 0 : index
    %c0_15 = arith.constant 0 : index
    %31 = vector.load %arg5[%c0_13, %c0_14, %c0_15] : memref<1x8x128xf32, #tpu.memory_space<vmem>>, vector<1x8x128xf32>
    %32 = vector.shape_cast %31 : vector<1x8x128xf32> to vector<8x128xf32>
    %33 = vector.shape_cast %30 : vector<8x128xf32> to vector<1x8x128xf32>
    tpu.vector_store %arg5[%c0_13, %c0_14, %c0_15], %33 {strides = array<i32>} : memref<1x8x128xf32, #tpu.memory_space<vmem>>, vector<1x8x128xf32>,
    return
  }
  func.func @transform_0(%arg0: i32) -> (i32, i32, i32) {
    %c0_i32 = arith.constant 0 : i32
    %c0_i32_0 = arith.constant 0 : i32
    %c0_i32_1 = arith.constant 0 : i32
    return %arg0, %c0_i32, %c0_i32_0 : i32, i32, i32
  }
  func.func @transform_1(%arg0: i32) -> (i32, i32) {
    %c0_i32 = arith.constant 0 : i32
    %c0_i32_0 = arith.constant 0 : i32
    %c0_i32_1 = arith.constant 0 : i32
    return %c0_i32, %c0_i32_0 : i32, i32
  }
  func.func @transform_2(%arg0: i32) -> (i32, i32) {
    %c0_i32 = arith.constant 0 : i32
    %c0_i32_0 = arith.constant 0 : i32
    %c0_i32_1 = arith.constant 0 : i32
    return %c0_i32, %c0_i32_0 : i32, i32
  }
  func.func @transform_3(%arg0: i32) -> (i32, i32) {
    %c0_i32 = arith.constant 0 : i32
    %c0_i32_0 = arith.constant 0 : i32
    %c0_i32_1 = arith.constant 0 : i32
    return %c0_i32, %c0_i32_0 : i32, i32
  }
  func.func @transform_4(%arg0: i32) -> (i32, i32, i32) {
    %c0_i32 = arith.constant 0 : i32
    %c0_i32_0 = arith.constant 0 : i32
    %c0_i32_1 = arith.constant 0 : i32
    return %arg0, %c0_i32, %c0_i32_0 : i32, i32, i32
  }
}

module attributes {stable_mosaic.version = 11 : i64} {
  func.func @_attn_block_kernel(%arg0: i32, %arg1: memref<1x8x128xf32, #tpu.memory_space<vmem>>, %arg2: memref<1x128xf32, #tpu.memory_space<vmem>>, %arg3: memref<128x512xbf16, #tpu.memory_space<vmem>>, %arg4: memref<256x128xbf16, #tpu.memory_space<vmem>>, %arg5: memref<8x64xf32, #tpu.memory_space<vmem>>, %arg6: memref<8x64xf32, #tpu.memory_space<vmem>>, %arg7: memref<1x8x128xf32, #tpu.memory_space<vmem>>) attributes {dimension_semantics = [#tpu.dimension_semantics<parallel>], iteration_bounds = array<i64: 2>, scalar_prefetch = 0 : i64, scratch_operands = 0 : i64, tpu.core_type = #tpu.core_type<tc>, window_params = [{transform_indices = @transform_0, window_bounds = array<i64: 1, 8, 128>}, {pipeline_mode = #tpu.pipeline_mode<synchronous>, transform_indices = @transform_1, window_bounds = array<i64: 1, 128>}, {pipeline_mode = #tpu.pipeline_mode<synchronous>, transform_indices = @transform_2, window_bounds = array<i64: 128, 512>}, {pipeline_mode = #tpu.pipeline_mode<synchronous>, transform_indices = @transform_3, window_bounds = array<i64: 256, 128>}, {pipeline_mode = #tpu.pipeline_mode<synchronous>, transform_indices = @transform_4, window_bounds = array<i64: 8, 64>}, {pipeline_mode = #tpu.pipeline_mode<synchronous>, transform_indices = @transform_5, window_bounds = array<i64: 8, 64>}, {transform_indices = @transform_6, window_bounds = array<i64: 1, 8, 128>}]} {
    %c0 = arith.constant 0 : index
    %c0_0 = arith.constant 0 : index
    %c0_1 = arith.constant 0 : index
    %0 = vector.load %arg1[%c0, %c0_0, %c0_1] : memref<1x8x128xf32, #tpu.memory_space<vmem>>, vector<1x8x128xf32>
    %1 = vector.shape_cast %0 : vector<1x8x128xf32> to vector<8x128xf32>
    %c0_2 = arith.constant 0 : index
    %c0_3 = arith.constant 0 : index
    %2 = vector.load %arg2[%c0_2, %c0_3] : memref<1x128xf32, #tpu.memory_space<vmem>>, vector<1x128xf32>
    %3 = arith.mulf %1, %1 : vector<8x128xf32>
    %cst = arith.constant dense<0.000000e+00> : vector<8xf32>
    %4 = vector.multi_reduction <add>, %3, %cst [1] : vector<8x128xf32> to vector<8xf32>
    %5 = vector.shape_cast %4 : vector<8xf32> to vector<8x1xf32>
    %cst_4 = arith.constant 1.280000e+02 : f32
    %6 = vector.broadcast %cst_4 : f32 to vector<8x1xf32>
    %7 = arith.divf %5, %6 : vector<8x1xf32>
    %cst_5 = arith.constant 9.99999997E-7 : f32
    %8 = vector.broadcast %cst_5 : f32 to vector<8x1xf32>
    %9 = arith.addf %7, %8 : vector<8x1xf32>
    %10 = math.rsqrt %9 : vector<8x1xf32>
    %11 = vector.broadcast %10 : vector<8x1xf32> to vector<8x128xf32>
    %12 = arith.mulf %1, %11 : vector<8x128xf32>
    %13 = vector.broadcast %2 : vector<1x128xf32> to vector<8x128xf32>
    %14 = arith.mulf %12, %13 : vector<8x128xf32>
    %15 = arith.truncf %14 : vector<8x128xf32> to vector<8x128xbf16>
    %c0_6 = arith.constant 0 : index
    %c0_7 = arith.constant 0 : index
    %16 = vector.load %arg3[%c0_6, %c0_7] : memref<128x512xbf16, #tpu.memory_space<vmem>>, vector<128x512xbf16>
    %cst_8 = arith.constant dense<0.000000e+00> : vector<8x512xf32>
    %17 = tpu.matmul %15, %16, %cst_8 {dimension_numbers = #tpu.dot_dimension_numbers<[1], [0], [0], [1], [0, 0, 1, 1], [], []>} : vector<8x128xbf16>, vector<128x512xbf16>, vector<8x512xf32> -> vector<8x512xf32>
    %18 = vector.extract_strided_slice %17 {offsets = [0, 0], sizes = [8, 256], strides = [1, 1]} : vector<8x512xf32> to vector<8x256xf32>
    %19 = vector.extract_strided_slice %17 {offsets = [0, 256], sizes = [8, 128], strides = [1, 1]} : vector<8x512xf32> to vector<8x128xf32>
    %20 = vector.extract_strided_slice %17 {offsets = [0, 384], sizes = [8, 128], strides = [1, 1]} : vector<8x512xf32> to vector<8x128xf32>
    %c0_9 = arith.constant 0 : index
    %c0_10 = arith.constant 0 : index
    %21 = vector.load %arg5[%c0_9, %c0_10] : memref<8x64xf32, #tpu.memory_space<vmem>>, vector<8x64xf32>
    %c0_11 = arith.constant 0 : index
    %c0_12 = arith.constant 0 : index
    %22 = vector.load %arg6[%c0_11, %c0_12] : memref<8x64xf32, #tpu.memory_space<vmem>>, vector<8x64xf32>
    %23 = tpu.iota {dimensions = array<i32: 0>} : vector<8x8xi32>
    %24 = tpu.iota {dimensions = array<i32: 1>} : vector<8x8xi32>
    %25 = arith.cmpi sle, %24, %23 : vector<8x8xi32>
    %26 = vector.extract_strided_slice %19 {offsets = [0, 0], sizes = [8, 64], strides = [1, 1]} : vector<8x128xf32> to vector<8x64xf32>
    %27 = vector.extract_strided_slice %26 {offsets = [0, 0], sizes = [8, 32], strides = [1, 1]} : vector<8x64xf32> to vector<8x32xf32>
    %28 = vector.extract_strided_slice %26 {offsets = [0, 32], sizes = [8, 32], strides = [1, 1]} : vector<8x64xf32> to vector<8x32xf32>
    %cst_13 = arith.constant 0.000000e+00 : f32
    %29 = vector.broadcast %cst_13 : f32 to vector<8x32xf32>
    %30 = arith.subf %29, %28 : vector<8x32xf32>
    %31 = tpu.concatenate %30, %27 in 1 : vector<8x32xf32>, vector<8x32xf32> -> vector<8x64xf32>
    %32 = arith.mulf %26, %21 : vector<8x64xf32>
    %33 = arith.mulf %31, %22 : vector<8x64xf32>
    %34 = arith.addf %32, %33 : vector<8x64xf32>
    %35 = arith.truncf %34 : vector<8x64xf32> to vector<8x64xbf16>
    %36 = vector.extract_strided_slice %20 {offsets = [0, 0], sizes = [8, 64], strides = [1, 1]} : vector<8x128xf32> to vector<8x64xf32>
    %37 = arith.truncf %36 : vector<8x64xf32> to vector<8x64xbf16>
    %38 = vector.extract_strided_slice %19 {offsets = [0, 64], sizes = [8, 64], strides = [1, 1]} : vector<8x128xf32> to vector<8x64xf32>
    %39 = vector.extract_strided_slice %38 {offsets = [0, 0], sizes = [8, 32], strides = [1, 1]} : vector<8x64xf32> to vector<8x32xf32>
    %40 = vector.extract_strided_slice %38 {offsets = [0, 32], sizes = [8, 32], strides = [1, 1]} : vector<8x64xf32> to vector<8x32xf32>
    %cst_14 = arith.constant 0.000000e+00 : f32
    %41 = vector.broadcast %cst_14 : f32 to vector<8x32xf32>
    %42 = arith.subf %41, %40 : vector<8x32xf32>
    %43 = tpu.concatenate %42, %39 in 1 : vector<8x32xf32>, vector<8x32xf32> -> vector<8x64xf32>
    %44 = arith.mulf %38, %21 : vector<8x64xf32>
    %45 = arith.mulf %43, %22 : vector<8x64xf32>
    %46 = arith.addf %44, %45 : vector<8x64xf32>
    %47 = arith.truncf %46 : vector<8x64xf32> to vector<8x64xbf16>
    %48 = vector.extract_strided_slice %20 {offsets = [0, 64], sizes = [8, 64], strides = [1, 1]} : vector<8x128xf32> to vector<8x64xf32>
    %49 = arith.truncf %48 : vector<8x64xf32> to vector<8x64xbf16>
    %50 = vector.extract_strided_slice %18 {offsets = [0, 0], sizes = [8, 64], strides = [1, 1]} : vector<8x256xf32> to vector<8x64xf32>
    %51 = vector.extract_strided_slice %50 {offsets = [0, 0], sizes = [8, 32], strides = [1, 1]} : vector<8x64xf32> to vector<8x32xf32>
    %52 = vector.extract_strided_slice %50 {offsets = [0, 32], sizes = [8, 32], strides = [1, 1]} : vector<8x64xf32> to vector<8x32xf32>
    %cst_15 = arith.constant 0.000000e+00 : f32
    %53 = vector.broadcast %cst_15 : f32 to vector<8x32xf32>
    %54 = arith.subf %53, %52 : vector<8x32xf32>
    %55 = tpu.concatenate %54, %51 in 1 : vector<8x32xf32>, vector<8x32xf32> -> vector<8x64xf32>
    %56 = arith.mulf %50, %21 : vector<8x64xf32>
    %57 = arith.mulf %55, %22 : vector<8x64xf32>
    %58 = arith.addf %56, %57 : vector<8x64xf32>
    %59 = arith.truncf %58 : vector<8x64xf32> to vector<8x64xbf16>
    %cst_16 = arith.constant dense<0.000000e+00> : vector<8x8xf32>
    %60 = tpu.matmul %59, %35, %cst_16 {dimension_numbers = #tpu.dot_dimension_numbers<[1], [1], [0], [0], [0, 0, 1, 0], [], []>} : vector<8x64xbf16>, vector<8x64xbf16>, vector<8x8xf32> -> vector<8x8xf32>
    %cst_17 = arith.constant 1.250000e-01 : f32
    %61 = vector.broadcast %cst_17 : f32 to vector<8x8xf32>
    %62 = arith.mulf %60, %61 : vector<8x8xf32>
    %cst_18 = arith.constant -1.000000e+30 : f32
    %63 = vector.broadcast %cst_18 : f32 to vector<8x8xf32>
    %64 = arith.select %25, %62, %63 : vector<8x8xi1>, vector<8x8xf32>
    %cst_19 = arith.constant dense<0xFF800000> : vector<8xf32>
    %65 = vector.multi_reduction <maximumf>, %64, %cst_19 [1] : vector<8x8xf32> to vector<8xf32>
    %66 = vector.shape_cast %65 : vector<8xf32> to vector<8x1xf32>
    %67 = vector.broadcast %66 : vector<8x1xf32> to vector<8x8xf32>
    %68 = arith.subf %64, %67 : vector<8x8xf32>
    %69 = math.exp %68 : vector<8x8xf32>
    %cst_20 = arith.constant dense<0.000000e+00> : vector<8xf32>
    %70 = vector.multi_reduction <add>, %69, %cst_20 [1] : vector<8x8xf32> to vector<8xf32>
    %71 = vector.shape_cast %70 : vector<8xf32> to vector<8x1xf32>
    %72 = vector.broadcast %71 : vector<8x1xf32> to vector<8x8xf32>
    %73 = arith.divf %69, %72 : vector<8x8xf32>
    %74 = arith.truncf %73 : vector<8x8xf32> to vector<8x8xbf16>
    %cst_21 = arith.constant dense<0.000000e+00> : vector<8x64xf32>
    %75 = tpu.matmul %74, %37, %cst_21 {dimension_numbers = #tpu.dot_dimension_numbers<[1], [0], [0], [1], [0, 0, 1, 1], [], []>} : vector<8x8xbf16>, vector<8x64xbf16>, vector<8x64xf32> -> vector<8x64xf32>
    %76 = vector.extract_strided_slice %18 {offsets = [0, 64], sizes = [8, 64], strides = [1, 1]} : vector<8x256xf32> to vector<8x64xf32>
    %77 = vector.extract_strided_slice %76 {offsets = [0, 0], sizes = [8, 32], strides = [1, 1]} : vector<8x64xf32> to vector<8x32xf32>
    %78 = vector.extract_strided_slice %76 {offsets = [0, 32], sizes = [8, 32], strides = [1, 1]} : vector<8x64xf32> to vector<8x32xf32>
    %cst_22 = arith.constant 0.000000e+00 : f32
    %79 = vector.broadcast %cst_22 : f32 to vector<8x32xf32>
    %80 = arith.subf %79, %78 : vector<8x32xf32>
    %81 = tpu.concatenate %80, %77 in 1 : vector<8x32xf32>, vector<8x32xf32> -> vector<8x64xf32>
    %82 = arith.mulf %76, %21 : vector<8x64xf32>
    %83 = arith.mulf %81, %22 : vector<8x64xf32>
    %84 = arith.addf %82, %83 : vector<8x64xf32>
    %85 = arith.truncf %84 : vector<8x64xf32> to vector<8x64xbf16>
    %cst_23 = arith.constant dense<0.000000e+00> : vector<8x8xf32>
    %86 = tpu.matmul %85, %35, %cst_23 {dimension_numbers = #tpu.dot_dimension_numbers<[1], [1], [0], [0], [0, 0, 1, 0], [], []>} : vector<8x64xbf16>, vector<8x64xbf16>, vector<8x8xf32> -> vector<8x8xf32>
    %cst_24 = arith.constant 1.250000e-01 : f32
    %87 = vector.broadcast %cst_24 : f32 to vector<8x8xf32>
    %88 = arith.mulf %86, %87 : vector<8x8xf32>
    %cst_25 = arith.constant -1.000000e+30 : f32
    %89 = vector.broadcast %cst_25 : f32 to vector<8x8xf32>
    %90 = arith.select %25, %88, %89 : vector<8x8xi1>, vector<8x8xf32>
    %cst_26 = arith.constant dense<0xFF800000> : vector<8xf32>
    %91 = vector.multi_reduction <maximumf>, %90, %cst_26 [1] : vector<8x8xf32> to vector<8xf32>
    %92 = vector.shape_cast %91 : vector<8xf32> to vector<8x1xf32>
    %93 = vector.broadcast %92 : vector<8x1xf32> to vector<8x8xf32>
    %94 = arith.subf %90, %93 : vector<8x8xf32>
    %95 = math.exp %94 : vector<8x8xf32>
    %cst_27 = arith.constant dense<0.000000e+00> : vector<8xf32>
    %96 = vector.multi_reduction <add>, %95, %cst_27 [1] : vector<8x8xf32> to vector<8xf32>
    %97 = vector.shape_cast %96 : vector<8xf32> to vector<8x1xf32>
    %98 = vector.broadcast %97 : vector<8x1xf32> to vector<8x8xf32>
    %99 = arith.divf %95, %98 : vector<8x8xf32>
    %100 = arith.truncf %99 : vector<8x8xf32> to vector<8x8xbf16>
    %cst_28 = arith.constant dense<0.000000e+00> : vector<8x64xf32>
    %101 = tpu.matmul %100, %37, %cst_28 {dimension_numbers = #tpu.dot_dimension_numbers<[1], [0], [0], [1], [0, 0, 1, 1], [], []>} : vector<8x8xbf16>, vector<8x64xbf16>, vector<8x64xf32> -> vector<8x64xf32>
    %102 = vector.extract_strided_slice %18 {offsets = [0, 128], sizes = [8, 64], strides = [1, 1]} : vector<8x256xf32> to vector<8x64xf32>
    %103 = vector.extract_strided_slice %102 {offsets = [0, 0], sizes = [8, 32], strides = [1, 1]} : vector<8x64xf32> to vector<8x32xf32>
    %104 = vector.extract_strided_slice %102 {offsets = [0, 32], sizes = [8, 32], strides = [1, 1]} : vector<8x64xf32> to vector<8x32xf32>
    %cst_29 = arith.constant 0.000000e+00 : f32
    %105 = vector.broadcast %cst_29 : f32 to vector<8x32xf32>
    %106 = arith.subf %105, %104 : vector<8x32xf32>
    %107 = tpu.concatenate %106, %103 in 1 : vector<8x32xf32>, vector<8x32xf32> -> vector<8x64xf32>
    %108 = arith.mulf %102, %21 : vector<8x64xf32>
    %109 = arith.mulf %107, %22 : vector<8x64xf32>
    %110 = arith.addf %108, %109 : vector<8x64xf32>
    %111 = arith.truncf %110 : vector<8x64xf32> to vector<8x64xbf16>
    %cst_30 = arith.constant dense<0.000000e+00> : vector<8x8xf32>
    %112 = tpu.matmul %111, %47, %cst_30 {dimension_numbers = #tpu.dot_dimension_numbers<[1], [1], [0], [0], [0, 0, 1, 0], [], []>} : vector<8x64xbf16>, vector<8x64xbf16>, vector<8x8xf32> -> vector<8x8xf32>
    %cst_31 = arith.constant 1.250000e-01 : f32
    %113 = vector.broadcast %cst_31 : f32 to vector<8x8xf32>
    %114 = arith.mulf %112, %113 : vector<8x8xf32>
    %cst_32 = arith.constant -1.000000e+30 : f32
    %115 = vector.broadcast %cst_32 : f32 to vector<8x8xf32>
    %116 = arith.select %25, %114, %115 : vector<8x8xi1>, vector<8x8xf32>
    %cst_33 = arith.constant dense<0xFF800000> : vector<8xf32>
    %117 = vector.multi_reduction <maximumf>, %116, %cst_33 [1] : vector<8x8xf32> to vector<8xf32>
    %118 = vector.shape_cast %117 : vector<8xf32> to vector<8x1xf32>
    %119 = vector.broadcast %118 : vector<8x1xf32> to vector<8x8xf32>
    %120 = arith.subf %116, %119 : vector<8x8xf32>
    %121 = math.exp %120 : vector<8x8xf32>
    %cst_34 = arith.constant dense<0.000000e+00> : vector<8xf32>
    %122 = vector.multi_reduction <add>, %121, %cst_34 [1] : vector<8x8xf32> to vector<8xf32>
    %123 = vector.shape_cast %122 : vector<8xf32> to vector<8x1xf32>
    %124 = vector.broadcast %123 : vector<8x1xf32> to vector<8x8xf32>
    %125 = arith.divf %121, %124 : vector<8x8xf32>
    %126 = arith.truncf %125 : vector<8x8xf32> to vector<8x8xbf16>
    %cst_35 = arith.constant dense<0.000000e+00> : vector<8x64xf32>
    %127 = tpu.matmul %126, %49, %cst_35 {dimension_numbers = #tpu.dot_dimension_numbers<[1], [0], [0], [1], [0, 0, 1, 1], [], []>} : vector<8x8xbf16>, vector<8x64xbf16>, vector<8x64xf32> -> vector<8x64xf32>
    %128 = vector.extract_strided_slice %18 {offsets = [0, 192], sizes = [8, 64], strides = [1, 1]} : vector<8x256xf32> to vector<8x64xf32>
    %129 = vector.extract_strided_slice %128 {offsets = [0, 0], sizes = [8, 32], strides = [1, 1]} : vector<8x64xf32> to vector<8x32xf32>
    %130 = vector.extract_strided_slice %128 {offsets = [0, 32], sizes = [8, 32], strides = [1, 1]} : vector<8x64xf32> to vector<8x32xf32>
    %cst_36 = arith.constant 0.000000e+00 : f32
    %131 = vector.broadcast %cst_36 : f32 to vector<8x32xf32>
    %132 = arith.subf %131, %130 : vector<8x32xf32>
    %133 = tpu.concatenate %132, %129 in 1 : vector<8x32xf32>, vector<8x32xf32> -> vector<8x64xf32>
    %134 = arith.mulf %128, %21 : vector<8x64xf32>
    %135 = arith.mulf %133, %22 : vector<8x64xf32>
    %136 = arith.addf %134, %135 : vector<8x64xf32>
    %137 = arith.truncf %136 : vector<8x64xf32> to vector<8x64xbf16>
    %cst_37 = arith.constant dense<0.000000e+00> : vector<8x8xf32>
    %138 = tpu.matmul %137, %47, %cst_37 {dimension_numbers = #tpu.dot_dimension_numbers<[1], [1], [0], [0], [0, 0, 1, 0], [], []>} : vector<8x64xbf16>, vector<8x64xbf16>, vector<8x8xf32> -> vector<8x8xf32>
    %cst_38 = arith.constant 1.250000e-01 : f32
    %139 = vector.broadcast %cst_38 : f32 to vector<8x8xf32>
    %140 = arith.mulf %138, %139 : vector<8x8xf32>
    %cst_39 = arith.constant -1.000000e+30 : f32
    %141 = vector.broadcast %cst_39 : f32 to vector<8x8xf32>
    %142 = arith.select %25, %140, %141 : vector<8x8xi1>, vector<8x8xf32>
    %cst_40 = arith.constant dense<0xFF800000> : vector<8xf32>
    %143 = vector.multi_reduction <maximumf>, %142, %cst_40 [1] : vector<8x8xf32> to vector<8xf32>
    %144 = vector.shape_cast %143 : vector<8xf32> to vector<8x1xf32>
    %145 = vector.broadcast %144 : vector<8x1xf32> to vector<8x8xf32>
    %146 = arith.subf %142, %145 : vector<8x8xf32>
    %147 = math.exp %146 : vector<8x8xf32>
    %cst_41 = arith.constant dense<0.000000e+00> : vector<8xf32>
    %148 = vector.multi_reduction <add>, %147, %cst_41 [1] : vector<8x8xf32> to vector<8xf32>
    %149 = vector.shape_cast %148 : vector<8xf32> to vector<8x1xf32>
    %150 = vector.broadcast %149 : vector<8x1xf32> to vector<8x8xf32>
    %151 = arith.divf %147, %150 : vector<8x8xf32>
    %152 = arith.truncf %151 : vector<8x8xf32> to vector<8x8xbf16>
    %cst_42 = arith.constant dense<0.000000e+00> : vector<8x64xf32>
    %153 = tpu.matmul %152, %49, %cst_42 {dimension_numbers = #tpu.dot_dimension_numbers<[1], [0], [0], [1], [0, 0, 1, 1], [], []>} : vector<8x8xbf16>, vector<8x64xbf16>, vector<8x64xf32> -> vector<8x64xf32>
    %154 = tpu.concatenate %75, %101, %127, %153 in 1 : vector<8x64xf32>, vector<8x64xf32>, vector<8x64xf32>, vector<8x64xf32> -> vector<8x256xf32>
    %155 = arith.truncf %154 : vector<8x256xf32> to vector<8x256xbf16>
    %c0_43 = arith.constant 0 : index
    %c0_44 = arith.constant 0 : index
    %156 = vector.load %arg4[%c0_43, %c0_44] : memref<256x128xbf16, #tpu.memory_space<vmem>>, vector<256x128xbf16>
    %cst_45 = arith.constant dense<0.000000e+00> : vector<8x128xf32>
    %157 = tpu.matmul %155, %156, %cst_45 {dimension_numbers = #tpu.dot_dimension_numbers<[1], [0], [0], [1], [0, 0, 1, 1], [], []>} : vector<8x256xbf16>, vector<256x128xbf16>, vector<8x128xf32> -> vector<8x128xf32>
    %158 = arith.addf %1, %157 : vector<8x128xf32>
    %c0_46 = arith.constant 0 : index
    %c0_47 = arith.constant 0 : index
    %c0_48 = arith.constant 0 : index
    %159 = vector.load %arg7[%c0_46, %c0_47, %c0_48] : memref<1x8x128xf32, #tpu.memory_space<vmem>>, vector<1x8x128xf32>
    %160 = vector.shape_cast %159 : vector<1x8x128xf32> to vector<8x128xf32>
    %161 = vector.shape_cast %158 : vector<8x128xf32> to vector<1x8x128xf32>
    tpu.vector_store %arg7[%c0_46, %c0_47, %c0_48], %161 {strides = array<i32>} : memref<1x8x128xf32, #tpu.memory_space<vmem>>, vector<1x8x128xf32>,
    return
  }
  func.func @transform_0(%arg0: i32) -> (i32, i32, i32) {
    %c0_i32 = arith.constant 0 : i32
    %c0_i32_0 = arith.constant 0 : i32
    %c0_i32_1 = arith.constant 0 : i32
    return %arg0, %c0_i32, %c0_i32_0 : i32, i32, i32
  }
  func.func @transform_1(%arg0: i32) -> (i32, i32) {
    %c0_i32 = arith.constant 0 : i32
    %c0_i32_0 = arith.constant 0 : i32
    %c0_i32_1 = arith.constant 0 : i32
    return %c0_i32, %c0_i32_0 : i32, i32
  }
  func.func @transform_2(%arg0: i32) -> (i32, i32) {
    %c0_i32 = arith.constant 0 : i32
    %c0_i32_0 = arith.constant 0 : i32
    %c0_i32_1 = arith.constant 0 : i32
    return %c0_i32, %c0_i32_0 : i32, i32
  }
  func.func @transform_3(%arg0: i32) -> (i32, i32) {
    %c0_i32 = arith.constant 0 : i32
    %c0_i32_0 = arith.constant 0 : i32
    %c0_i32_1 = arith.constant 0 : i32
    return %c0_i32, %c0_i32_0 : i32, i32
  }
  func.func @transform_4(%arg0: i32) -> (i32, i32) {
    %c0_i32 = arith.constant 0 : i32
    %c0_i32_0 = arith.constant 0 : i32
    %c0_i32_1 = arith.constant 0 : i32
    return %c0_i32, %c0_i32_0 : i32, i32
  }
  func.func @transform_5(%arg0: i32) -> (i32, i32) {
    %c0_i32 = arith.constant 0 : i32
    %c0_i32_0 = arith.constant 0 : i32
    %c0_i32_1 = arith.constant 0 : i32
    return %c0_i32, %c0_i32_0 : i32, i32
  }
  func.func @transform_6(%arg0: i32) -> (i32, i32, i32) {
    %c0_i32 = arith.constant 0 : i32
    %c0_i32_0 = arith.constant 0 : i32
    %c0_i32_1 = arith.constant 0 : i32
    return %arg0, %c0_i32, %c0_i32_0 : i32, i32, i32
  }
}

</mosaic_0001>

<bundles_post_ra>
// kernel: llama3_forward.9
= control target key start
LH: loop header
LB: loop body
LE: loop exit
PB: predicated region body
PF: predicated region fallthrough
CT: control target
= control target key end

     0   :  { %8 = vsyncpa [#allocation3], 0  ;;  %s1013_s0 = inlined_call_operand.vmem [shape: f32[2,8,128], index: 0, kind: input, shape index: {}]   ;;  %s1014_s1 = inlined_call_operand.vmem [shape: f32[1,128], index: 1, kind: input, shape index: {}]   ;;  %s1015_s2 = inlined_call_operand.hbm [shape: bf16[128,512], index: 2, kind: input, shape index: {}]   ;;  %s1016_s3 = inlined_call_operand.hbm [shape: f32[2,8,512], index: 3, kind: output, shape index: {}]  }
   0x1   :  { %9 = vsyncpa [#allocation4], 0 }
   0x2   :  { %11 = vsyncpa [#allocation4 + $0x1], 0  ;;  %s903_s12 = smov 0   ;;  %s905_s13 = smov 0  }
   0x3   :  { %s907_s14 = smov 0   ;;  %s909_s15 = smov 0  }
   0x4 LB: > { %s924_s16 = sadd.s32 4294967295, %s877_s15   ;;  %s549_s17 = sadd.s32 4294967294, %s877_s15   ;;  %s877_s15 = sphi %s909_s15, %s1022_s15   ;;  %s873_s14 = sphi %s907_s14, %s1021_s14   ;;  %s869_s13 = sphi %s905_s13, %s1020_s13   ;;  %s865_s12 = sphi %s903_s12, %s1019_s12  }
   0x5   : > { %s928_s18 = sadd.s32 1, %s877_s15   ;;  %s92_s19 = sadd.s32 1, %s873_s14 }
   0x6   : > { %s89_s20 = ssub.s32 %s877_s15, %s928_s18  ;;  %p102_p0 = scmp.ne.s32.totalorder %s873_s14, %s869_s13 }
   0x7   : > { %p90_p1 = scmp.eq.s32.totalorder %s89_s20, 0  ;;  %p103_p2 = scmp.eq.s32.totalorder %s924_s16, 1 }
   0x8   : > { %p108_p3 = scmp.ne.s32.totalorder %s869_s13, %s865_s12  ;;  %p109_p4 = scmp.eq.s32.totalorder %s549_s17, 1 }
   0x9   : > { %s939_s21 = scalar_select %p90_p1, %s873_s14, %s92_s19  }
   0xa   : > { %p941_p5 = por %p103_p2, %p102_p0  ;;  %p945_p6 = por %p109_p4, %p108_p3 }
   0xb   : > { %p550_p7 = scmp.ge.s32.totalorder %s877_s15, 1  ;;  %p116_p8 = scmp.lt.s32.totalorder %s877_s15, 3 }
   0xc   : > { %p737_p9 = scmp.eq.s32.totalorder %s924_s16, 0  ;;  %s130_s26 = sshll.u32 %s1015_s2, 4  ;;  %s131_s26 = int_to_ptr.hbm [resolvable:$true] %s130_s26 }
   0xd   : > { %p117_p10 = pnand %p550_p7, %p116_p8  ;;  %s879_s27 = smov [#allocation2]  }
   0xe   : > { %s132_s28 = sshll.u32 %s879_s27, 4  ;;  %s880_s29 = smov 256   ;;  %s133_s28 = int_to_ptr.vmem [resolvable:$true] %s132_s28 }
   0xf   : > { %p729_p11 = pneg %p117_p10  ;;  %s881_s30 = smov 16  }
  0x10   : > { %155 = sbr.rel (%p117_p10) target bundleno = 316 (0x13c), region = 32 }
  0x11   : > { %p730_p12 = pnand %p737_p9, %p729_p11 }
  0x13   : > { %732 = dma.hbm_to_vmem [thread:$0]  (!%p730_p12), %s131_s26, 4096, %s133_s28, [#allocation3], %s880_s29, %s880_s29, %s881_s30  }
  0x15   : > { %856 = dma.done.wait (%p737_p9), [#allocation3], 4096  }
  0x16   : > { %858 = vsyncadd (%p737_p9), [#allocation3], 4294963200  ;;  %p179_p13 = scmp.lt.s32.totalorder %s924_s16, 1  ;;  %v671_v1 = vld [vmem:[#allocation2 + $0xe0] sm:$0xf]  ;;  %v882_v33 = vmov 128.0  }
  0x17   : > { %v720_v2 = vld [vmem:[#allocation2 + $0xec] sm:$0xf0]  ;;  %v718_v5 = vld [vmem:[#allocation2 + $0xe4] sm:$0xf]  ;;  %v673_v6 = vld [vmem:[#allocation2 + $0xf0] sm:$0xf0]  ;;  %777 = vrcp.f32 %v882_v33 }
  0x18   : > { %s180_s4 = scalar_select %p179_p13, %s924_s16, 1  ;;  %v672_v4 = vor.u32 %v720_v2, %v671_v1  ;;  %v679_v7 = vld [vmem:[#allocation2 + $0xe8] sm:$0xf]  ;;  %v676_v8 = vor.u32 %v718_v5, %v673_v6  ;;  %v721_v9 = vld [vmem:[#allocation2 + $0xf4] sm:$0xf0] }
  0x19   : > { %v719_v10 = vld [vmem:[#allocation2 + $0xec] sm:$0xf]  ;;  %v681_v11 = vld [vmem:[#allocation2 + $0xf8] sm:$0xf0]  ;;  %v680_v12 = vor.u32 %v721_v9, %v679_v7  ;;  %v655_v14 = vld [vmem:[#allocation2 + $0xc0] sm:$0xf] }
  0x1a   : > { %s556_s5 = sshll.u32 %s180_s4, 3  ;;  %405 = vmatpush.bf16.msra.mxu0 %v672_v4  ;;  %v684_v13 = vor.u32 %v719_v10, %v681_v11  ;;  %418 = vmatpush.bf16.msra.mxu1 %v676_v8  ;;  %v716_v15 = vld [vmem:[#allocation2 + $0xcc] sm:$0xf0]  ;;  %v714_v16 = vld [vmem:[#allocation2 + $0xc4] sm:$0xf]  ;;  %s176_s11 = sand.u32 1, %s869_s13  }
  0x1b   : > { %s182_s8 = scalar_lea.vmem %s1013_s0, %s556_s5  ;;  %431 = vmatpush.bf16.msra.mxu2 %v680_v12  ;;  %v656_v17 = vor.u32 %v716_v15, %v655_v14  ;;  %v657_v18 = vld [vmem:[#allocation2 + $0xd0] sm:$0xf0]  ;;  %v663_v19 = vld [vmem:[#allocation2 + $0xc8] sm:$0xf]  ;;  %v717_v20 = vld [vmem:[#allocation2 + $0xd4] sm:$0xf0] }
  0x1c   : > { %v966_v0 = vld [vmem:[%s182_s8] sm:$0xff]  ;;  %444 = vmatpush.bf16.msra.mxu3 %v684_v13  ;;  %v660_v21 = vor.u32 %v714_v16, %v657_v18  ;;  %v664_v22 = vor.u32 %v717_v20, %v663_v19  ;;  %v715_v23 = vld [vmem:[#allocation2 + $0xcc] sm:$0xf]  ;;  %v665_v24 = vld [vmem:[#allocation2 + $0xd8] sm:$0xf0]  ;;  %s555_s17 = sshll.u32 %s176_s11, 5 }
  0x1d   : > { %v185_v3 = vmul.f32 %v966_v0, %v966_v0  ;;  %v668_v25 = vor.u32 %v715_v23, %v665_v24  ;;  %v639_v26 = vld [vmem:[#allocation2 + $0xa0] sm:$0xf]  ;;  %v712_v27 = vld [vmem:[#allocation2 + $0xac] sm:$0xf0]  ;;  %v710_v28 = vld [vmem:[#allocation2 + $0xa4] sm:$0xf]  ;;  %v970_v51 = vpop.eup %777 }
  0x1e   : > { %406 = vmatpush.bf16.msra.mxu0 %v656_v17  ;;  %419 = vmatpush.bf16.msra.mxu1 %v660_v21  ;;  %v640_v29 = vor.u32 %v712_v27, %v639_v26  ;;  %v641_v30 = vld [vmem:[#allocation2 + $0xb0] sm:$0xf0]  ;;  %v647_v31 = vld [vmem:[#allocation2 + $0xa8] sm:$0xf]  ;;  %v713_v32 = vld [vmem:[#allocation2 + $0xb4] sm:$0xf0]  ;;  %vm193_vm0 = vweird.f32 %v970_v51 }
  0x1f   : > { %186 = vadd.xlane.f32.xlu0 %v185_v3  ;;  %432 = vmatpush.bf16.msra.mxu2 %v664_v22  ;;  %v644_v34 = vor.u32 %v710_v28, %v641_v30  ;;  %v648_v35 = vor.u32 %v713_v32, %v647_v31  ;;  %v711_v36 = vld [vmem:[#allocation2 + $0xac] sm:$0xf]  ;;  %v649_v37 = vld [vmem:[#allocation2 + $0xb8] sm:$0xf0]  ;;  %v623_v39 = vld [vmem:[#allocation2 + $0x80] sm:$0xf] }
  0x20   : > { %445 = vmatpush.bf16.msra.mxu3 %v668_v25  ;;  %v652_v38 = vor.u32 %v711_v36, %v649_v37  ;;  %v708_v40 = vld [vmem:[#allocation2 + $0x8c] sm:$0xf0]  ;;  %v706_v41 = vld [vmem:[#allocation2 + $0x84] sm:$0xf]  ;;  %v625_v43 = vld [vmem:[#allocation2 + $0x90] sm:$0xf0] }
  0x21   : > { %v624_v42 = vor.u32 %v708_v40, %v623_v39  ;;  %v631_v44 = vld [vmem:[#allocation2 + $0x88] sm:$0xf]  ;;  %v709_v45 = vld [vmem:[#allocation2 + $0x94] sm:$0xf0]  ;;  %v628_v46 = vor.u32 %v706_v41, %v625_v43  ;;  %v707_v48 = vld [vmem:[#allocation2 + $0x8c] sm:$0xf] }
  0x22   : > { %407 = vmatpush.bf16.msra.mxu0 %v640_v29  ;;  %420 = vmatpush.bf16.msra.mxu1 %v644_v34  ;;  %v632_v47 = vor.u32 %v709_v45, %v631_v44  ;;  %v633_v49 = vld [vmem:[#allocation2 + $0x98] sm:$0xf0]  ;;  %v607_v52 = vld [vmem:[#allocation2 + $0x60] sm:$0xf]  ;;  %v704_v53 = vld [vmem:[#allocation2 + $0x6c] sm:$0xf0] }
  0x23   : > { %433 = vmatpush.bf16.msra.mxu2 %v648_v35  ;;  %v636_v50 = vor.u32 %v707_v48, %v633_v49  ;;  %v702_v54 = vld [vmem:[#allocation2 + $0x64] sm:$0xf]  ;;  %v608_v55 = vor.u32 %v704_v53, %v607_v52  ;;  %v609_v56 = vld [vmem:[#allocation2 + $0x70] sm:$0xf0]  ;;  %v615_v57 = vld [vmem:[#allocation2 + $0x68] sm:$0xf] }
  0x24   : > { %446 = vmatpush.bf16.msra.mxu3 %v652_v38  ;;  %v705_v58 = vld [vmem:[#allocation2 + $0x74] sm:$0xf0]  ;;  %v612_v59 = vor.u32 %v702_v54, %v609_v56  ;;  %v703_v61 = vld [vmem:[#allocation2 + $0x6c] sm:$0xf]  ;;  %v617_v62 = vld [vmem:[#allocation2 + $0x78] sm:$0xf0] }
  0x25   : > { %v616_v60 = vor.u32 %v705_v58, %v615_v57  ;;  %v189_v63 = vmul.f32 128.0, %v970_v51  ;;  %v620_v1 = vor.u32 %v703_v61, %v617_v62  ;;  %v591_v2 = vld [vmem:[#allocation2 + $0x40] sm:$0xf]  ;;  %v700_v3 = vld [vmem:[#allocation2 + $0x4c] sm:$0xf0]  ;;  %s722_s19 = sshll.u32 %s924_s16, 5 }
  0x26   : > { %408 = vmatpush.bf16.msra.mxu0 %v624_v42  ;;  %421 = vmatpush.bf16.msra.mxu1 %v628_v46  ;;  %v698_v4 = vld [vmem:[#allocation2 + $0x44] sm:$0xf]  ;;  %v592_v5 = vor.u32 %v700_v3, %v591_v2  ;;  %v593_v6 = vld [vmem:[#allocation2 + $0x50] sm:$0xf0]  ;;  %v599_v7 = vld [vmem:[#allocation2 + $0x48] sm:$0xf]  ;;  %s473_s26 = scalar_lea.hbm %s1016_s3, %s722_s19 }
  0x27   : > { %434 = vmatpush.bf16.msra.mxu2 %v632_v47  ;;  %v701_v8 = vld [vmem:[#allocation2 + $0x54] sm:$0xf0]  ;;  %v596_v9 = vor.u32 %v698_v4, %v593_v6  ;;  %v699_v11 = vld [vmem:[#allocation2 + $0x4c] sm:$0xf]  ;;  %v601_v12 = vld [vmem:[#allocation2 + $0x58] sm:$0xf0] }
  0x28   : > { %447 = vmatpush.bf16.msra.mxu3 %v636_v50  ;;  %v600_v10 = vor.u32 %v701_v8, %v599_v7  ;;  %v190_v13 = vsub.f32 1.0, %v189_v63  ;;  %v604_v14 = vor.u32 %v699_v11, %v601_v12  ;;  %v575_v15 = vld [vmem:[#allocation2 + $0x20] sm:$0xf]  ;;  %v696_v16 = vld [vmem:[#allocation2 + $0x2c] sm:$0xf0]  ;;  %s178_s20 = scalar_lea.vmem [#allocation5], %s555_s17 }
  0x29   : > { %v694_v17 = vld [vmem:[#allocation2 + $0x24] sm:$0xf]  ;;  %v576_v18 = vor.u32 %v696_v16, %v575_v15  ;;  %v577_v19 = vld [vmem:[#allocation2 + $0x30] sm:$0xf0]  ;;  %v583_v20 = vld [vmem:[#allocation2 + $0x28] sm:$0xf] }
  0x2a   : > { %409 = vmatpush.bf16.msra.mxu0 %v608_v55  ;;  %422 = vmatpush.bf16.msra.mxu1 %v612_v59  ;;  %v697_v21 = vld [vmem:[#allocation2 + $0x34] sm:$0xf0]  ;;  %v580_v22 = vor.u32 %v694_v17, %v577_v19  ;;  %v695_v24 = vld [vmem:[#allocation2 + $0x2c] sm:$0xf]  ;;  %v585_v25 = vld [vmem:[#allocation2 + $0x38] sm:$0xf0]  ;;  %v191_v26 = vmul.f32 %v970_v51, %v190_v13 }
  0x2b   : > { %435 = vmatpush.bf16.msra.mxu2 %v616_v60  ;;  %v584_v23 = vor.u32 %v697_v21, %v583_v20  ;;  %v588_v27 = vor.u32 %v695_v24, %v585_v25  ;;  %v559_v28 = vld [vmem:[#allocation2] sm:$0xf]  ;;  %v692_v29 = vld [vmem:[#allocation2 + $0xc] sm:$0xf0]  ;;  %v690_v30 = vld [vmem:[#allocation2 + $0x4] sm:$0xf] }
  0x2c   : > { %448 = vmatpush.bf16.msra.mxu3 %v620_v1  ;;  %v560_v31 = vor.u32 %v692_v29, %v559_v28  ;;  %v561_v32 = vld [vmem:[#allocation2 + $0x10] sm:$0xf0]  ;;  %v567_v33 = vld [vmem:[#allocation2 + $0x8] sm:$0xf]  ;;  %v693_v34 = vld [vmem:[#allocation2 + $0x14] sm:$0xf0]  ;;  %v192_v39 = vadd.f32 %v970_v51, %v191_v26 }
  0x2d   : > { %v564_v35 = vor.u32 %v690_v30, %v561_v32  ;;  %v568_v36 = vor.u32 %v693_v34, %v567_v33  ;;  %v691_v37 = vld [vmem:[#allocation2 + $0xc] sm:$0xf]  ;;  %v569_v38 = vld [vmem:[#allocation2 + $0x18] sm:$0xf0]  ;;  %v776_v52 = vld [vmem:[%s1014_s1] ss:$0 sm:$0xff] }
  0x2e   : > { %410 = vmatpush.bf16.msra.mxu0 %v592_v5  ;;  %423 = vmatpush.bf16.msra.mxu1 %v596_v9  ;;  %v572_v40 = vor.u32 %v691_v37, %v569_v38  ;;  %v194_v41 = vsel %vm193_vm0, %v970_v51, %v192_v39  ;;  %s475_s27 = sshll.u32 %s178_s20, 4  ;;  %s477_s28 = sshll.u32 %s473_s26, 4  ;;  %s476_s27 = int_to_ptr.vmem [resolvable:$true] %s475_s27  ;;  %s478_s28 = int_to_ptr.hbm [resolvable:$true] %s477_s28 }
  0x2f   : > { %436 = vmatpush.bf16.msra.mxu2 %v600_v10  ;;  %s462_s16 = scalar_lea.sflag [#allocation4], %s176_s11  ;;  %s825_s29 = sshra.s32 %s478_s28, 4  ;;  %s826_s29 = int_to_ptr.hbm [resolvable:$true] %s825_s29 }
  0x30   : > { %449 = vmatpush.bf16.msra.mxu3 %v604_v14  ;;  %s827_s30 = scalar_lea.hbm %s826_s29, 32  ;;  %s831_s6 = scalar_lea.hbm %s1016_s3, 64 }
  0x31   : > { %p828_p0 = scmp.ne.s32.totalorder %s826_s29, %s827_s30  ;;  %p832_p3 = scmp.lt.s32.totalorder %s826_s29, %s1016_s3 }
  0x32   : > { %411 = vmatpush.bf16.msra.mxu0 %v576_v18  ;;  %424 = vmatpush.bf16.msra.mxu1 %v580_v22  ;;  %p833_p4 = scmp.lt.s32.totalorder %s831_s6, %s827_s30 }
  0x33   : > { %437 = vmatpush.bf16.msra.mxu2 %v584_v23  ;;  %p829_p1 = pnand %p828_p0, %p941_p5 }
  0x34   : > { %450 = vmatpush.bf16.msra.mxu3 %v588_v27  ;;  %p834_p7 = por %p833_p4, %p832_p3 }
  0x35   : > { %p830_p2 = pneg %p829_p1 }
  0x36   : > { %412 = vmatpush.bf16.msra.mxu0 %v560_v31  ;;  %425 = vmatpush.bf16.msra.mxu1 %v564_v35 }
  0x37   : > { %438 = vmatpush.bf16.msra.mxu2 %v568_v36  ;;  %p835_p8 = pnand %p834_p7, %p830_p2 }
  0x38   : > { %451 = vmatpush.bf16.msra.mxu3 %v572_v40 }
  0x92   : > { %v187_v42 = vpop.xlane.xlu0 %186 }
  0x93   : > { %v195_v43 = vmul.f32 %v194_v41, %v187_v42 }
  0x95   : > { %v196_v44 = vadd.f32 1e-06, %v195_v43 }
  0x97   : > { %779 = vrsqrt.f32 %v196_v44  ;;  %vm203_vm2 = vweird.f32 %v196_v44 }
  0x9d   : > { %v780_v45 = vpop.eup %779 }
  0x9e   : > { %v198_v46 = vmul.f32 %v780_v45, %v196_v44  ;;  %vm204_vm1 = vweird.f32 %v780_v45 }
  0x9f   : > { %vm205_vm3 = vmor %vm203_vm2, %vm204_vm1 }
  0xa0   : > { %v199_v47 = vmul.f32 %v780_v45, %v198_v46 }
  0xa2   : > { %v200_v48 = vmul.f32 0.5, %v199_v47 }
  0xa4   : > { %v201_v49 = vsub.f32 1.5, %v200_v48 }
  0xa6   : > { %v202_v50 = vmul.f32 %v780_v45, %v201_v49 }
  0xa8   : > { %v206_v51 = vsel %vm205_vm3, %v780_v45, %v202_v50 }
  0xa9   : > { %v207_v53 = vmul.f32 %v206_v51, %v966_v0 }
  0xab   : > { %v211_v54 = vmul.f32 %v776_v52, %v207_v53 }
  0xad   : > { %v212_v55 = vpack.c.bf16 %v211_v54, %v211_v54 }
  0xaf   : > { %413 = vmatmul.bf16.vlgmr.msra.gmra.mxu0 %v212_v55  ;;  %426 = vmatmul.bf16.vlgmr.msra.gmra.mxu1 %v212_v55 }
  0xb0   : > { %439 = vmatmul.bf16.vlgmr.msra.gmra.mxu2 %v212_v55  ;;  %452 = vmatmul.bf16.vlgmr.msra.gmra.mxu3 %v212_v55 }
 0x12c   : > { %v414_v56 = vpop.f32.mrf.mxu0  ;;  %v427_v57 = vpop.f32.mrf.mxu1 }
 0x12d   : > { %457 = vst [vmem:[%s178_s20] sm:$0xff] %v414_v56 }
 0x12e   : > { %458 = vst [vmem:[%s178_s20 + $0x8] sm:$0xff] %v427_v57 }
 0x133   : > { %v440_v0 = vpop.f32.mrf.mxu2  ;;  %v453_v58 = vpop.f32.mrf.mxu3 }
 0x134   : > { %459 = vst [vmem:[%s178_s20 + $0x10] sm:$0xff] %v440_v0  ;;  %v416_v59 = vpop.f32.mrf.mxu0  ;;  %v429_v60 = vpop.f32.mrf.mxu1 }
 0x135   : > { %460 = vst [vmem:[%s178_s20 + $0x18] sm:$0xff] %v453_v58 }
 0x136   : > { %838 = shalt.err (!%p835_p8)
}
 0x137   : > { %727 = dma.vmem_to_hbm [thread:$0]  (%p941_p5), %s476_s27, 512, %s478_s28, %s462_s16  }
 0x13b   : > { %v442_v61 = vpop.f32.mrf.mxu2  ;;  %v455_v62 = vpop.f32.mrf.mxu3 }
 0x13c PF: > { %p739_p9 = scmp.ge.s32.totalorder %s877_s15, 2  ;;  %s489_s9 = sand.u32 1, %s865_s12  }
 0x13d   : > { %s490_s10 = scalar_lea.sflag [#allocation4], %s489_s9 }
 0x13e   : > { %p734_p10 = pnand %p739_p9, %p945_p6 }
 0x140   : > { %p735_p11 = pneg %p734_p10 }
 0x142   : > { %860 = dma.done.wait (%p735_p11), %s490_s10, 512  }
 0x143   : > { %862 = vsyncadd (%p735_p11), %s490_s10, 4294966784  ;;  %p14_p5 = scmp.ge.s32.totalorder %s928_s18, 4   ;;  %s1019_s12 = smov %s869_s13 }
 0x144   : > { %s1020_s13 = smov %s873_s14  ;;  %s1021_s14 = smov %s939_s21 }
 0x145   : > { %s1022_s15 = smov %s928_s18  ;;  %16 = sbr.rel (!%p14_p5) target bundleno = 4 (0x4), region = 72 }
 0x14a   :  { %496 = vsyncpa [#allocation3], 1 }
 0x14b   :  { %498 = vsyncpa [#allocation3 + $0x1], 1 }
 0x14c   :  { %499 = vsyncpa [#allocation4], 1 }
 0x14d   :  { %501 = vsyncpa [#allocation4 + $0x1], 1 }

// kernel: llama3_forward.6
= control target key start
LH: loop header
LB: loop body
LE: loop exit
PB: predicated region body
PF: predicated region fallthrough
CT: control target
= control target key end

     0   :  { %9 = vsyncpa [#allocation3], 0  ;;  %s1245_s0 = inlined_call_operand.vmem [shape: f32[2,8,128], index: 0, kind: input, shape index: {}]   ;;  %s1246_s1 = inlined_call_operand.vmem [shape: f32[1,128], index: 1, kind: input, shape index: {}]   ;;  %s1247_s2 = inlined_call_operand.hbm [shape: bf16[128,512], index: 2, kind: input, shape index: {}]   ;;  %s1248_s3 = inlined_call_operand.hbm [shape: bf16[256,128], index: 3, kind: input, shape index: {}]   ;;  %s1249_s4 = inlined_call_operand.vmem [shape: f32[2,8,128], index: 4, kind: output, shape index: {}]  }
   0x1   :  { %10 = vsyncpa [#allocation5], 0  ;;  %s1186_s15 = smov 0  }
   0x2 LB: > { %s150_s18 = sshll.u32 %s1247_s2, 4  ;;  %s776_s19 = sadd.s32 4294967295, %s1152_s15   ;;  %s1152_s15 = sphi %s1186_s15, %s16_s15   ;;  %s151_s18 = int_to_ptr.hbm [resolvable:$true] %s150_s18 }
   0x3   : > { %p778_p0 = scmp.ge.s32.totalorder %s1152_s15, 1  ;;  %p136_p1 = scmp.lt.s32.totalorder %s1152_s15, 3 }
   0x4   : > { %p1046_p2 = scmp.eq.s32.totalorder %s776_s19, 0  ;;  %s1154_s21 = smov [#allocation2]  }
   0x5   : > { %p1197_p3 = pnand %p778_p0, %p136_p1  ;;  %s152_s22 = sshll.u32 %s1154_s21, 4  ;;  %s153_s22 = int_to_ptr.vmem [resolvable:$true] %s152_s22 }
   0x6   : > { %s164_s25 = sshll.u32 %s1248_s3, 4  ;;  %s1155_s26 = smov [#allocation4]   ;;  %s165_s25 = int_to_ptr.hbm [resolvable:$true] %s164_s25 }
   0x7   : > { %p1039_p4 = pneg %p1197_p3  ;;  %s166_s27 = sshll.u32 %s1155_s26, 4  ;;  %s167_s27 = int_to_ptr.vmem [resolvable:$true] %s166_s27 }
   0x8   : > { %s1156_s28 = smov 256   ;;  %s1157_s29 = smov 16  }
   0x9   : > { %p1040_p5 = pnand %p1046_p2, %p1039_p4  ;;  %s1158_s30 = smov 64  }
   0xa   : > { %s1159_s5 = smov 4   ;;  %189 = sbr.rel (%p1197_p3) target bundleno = 465 (0x1d1), region = 36 }
   0xb   : > { %1042 = dma.hbm_to_vmem [thread:$0]  (!%p1040_p5), %s151_s18, 4096, %s153_s22, [#allocation3], %s1156_s28, %s1156_s28, %s1157_s29  }
   0xc   : > { %1045 = dma.hbm_to_vmem [thread:$0]  (!%p1040_p5), %s165_s25, 2048, %s167_s27, [#allocation5], %s1158_s30, %s1158_s30, %s1159_s5  }
   0xf   : > { %1143 = dma.done.wait (%p1046_p2), [#allocation3], 4096  }
  0x10   : > { %1145 = vsyncadd (%p1046_p2), [#allocation3], 4294963200 }
  0x11   : > { %1147 = dma.done.wait (%p1046_p2), [#allocation5], 2048  }
  0x12   : > { %1149 = vsyncadd (%p1046_p2), [#allocation5], 4294965248  ;;  %p219_p6 = scmp.lt.s32.totalorder %s776_s19, 1  ;;  %v901_v1 = vld [vmem:[#allocation2 + $0xe0] sm:$0xf]  ;;  %v1160_v33 = vmov 128.0  }
  0x13   : > { %v1013_v2 = vld [vmem:[#allocation2 + $0xec] sm:$0xf0]  ;;  %v1011_v5 = vld [vmem:[#allocation2 + $0xe4] sm:$0xf]  ;;  %v903_v6 = vld [vmem:[#allocation2 + $0xf0] sm:$0xf0]  ;;  %1066 = vrcp.f32 %v1160_v33 }
  0x14   : > { %s1252_s19 = smov (!%p219_p6, %s776_s19), 1  ;;  %v902_v4 = vor.u32 %v1013_v2, %v901_v1  ;;  %v909_v7 = vld [vmem:[#allocation2 + $0xe8] sm:$0xf]  ;;  %v906_v8 = vor.u32 %v1011_v5, %v903_v6  ;;  %v1014_v9 = vld [vmem:[#allocation2 + $0xf4] sm:$0xf0] }
  0x15   : > { %s785_s6 = sshll.u32 %s1252_s19, 3  ;;  %v1012_v10 = vld [vmem:[#allocation2 + $0xec] sm:$0xf]  ;;  %v911_v11 = vld [vmem:[#allocation2 + $0xf8] sm:$0xf0]  ;;  %v910_v12 = vor.u32 %v1014_v9, %v909_v7 }
  0x16   : > { %s222_s9 = scalar_lea.vmem %s1245_s0, %s785_s6  ;;  %449 = vmatpush.bf16.msra.mxu0 %v902_v4  ;;  %v914_v13 = vor.u32 %v1012_v10, %v911_v11  ;;  %462 = vmatpush.bf16.msra.mxu1 %v906_v8  ;;  %v885_v14 = vld [vmem:[#allocation2 + $0xc0] sm:$0xf]  ;;  %v1009_v15 = vld [vmem:[#allocation2 + $0xcc] sm:$0xf0]  ;;  %v1007_v16 = vld [vmem:[#allocation2 + $0xc4] sm:$0xf]  ;;  %s226_s14 = scalar_lea.vmem %s1249_s4, %s785_s6 }
  0x17   : > { %v1221_v0 = vld [vmem:[%s222_s9] sm:$0xff]  ;;  %475 = vmatpush.bf16.msra.mxu2 %v910_v12  ;;  %v886_v17 = vor.u32 %v1009_v15, %v885_v14  ;;  %v887_v18 = vld [vmem:[#allocation2 + $0xd0] sm:$0xf0]  ;;  %v893_v19 = vld [vmem:[#allocation2 + $0xc8] sm:$0xf] }
  0x18   : > { %v229_v3 = vmul.f32 %v1221_v0, %v1221_v0  ;;  %488 = vmatpush.bf16.msra.mxu3 %v914_v13  ;;  %v1010_v20 = vld [vmem:[#allocation2 + $0xd4] sm:$0xf0]  ;;  %v890_v21 = vor.u32 %v1007_v16, %v887_v18  ;;  %v1008_v23 = vld [vmem:[#allocation2 + $0xcc] sm:$0xf]  ;;  %v895_v24 = vld [vmem:[#allocation2 + $0xd8] sm:$0xf0] }
  0x19   : > { %v894_v22 = vor.u32 %v1010_v20, %v893_v19  ;;  %v898_v25 = vor.u32 %v1008_v23, %v895_v24  ;;  %v869_v26 = vld [vmem:[#allocation2 + $0xa0] sm:$0xf]  ;;  %v1005_v27 = vld [vmem:[#allocation2 + $0xac] sm:$0xf0]  ;;  %v1003_v28 = vld [vmem:[#allocation2 + $0xa4] sm:$0xf]  ;;  %v1225_v51 = vpop.eup %1066 }
  0x1a   : > { %230 = vadd.xlane.f32.xlu0 %v229_v3  ;;  %450 = vmatpush.bf16.msra.mxu0 %v886_v17  ;;  %v870_v29 = vor.u32 %v1005_v27, %v869_v26  ;;  %v871_v30 = vld [vmem:[#allocation2 + $0xb0] sm:$0xf0]  ;;  %v877_v31 = vld [vmem:[#allocation2 + $0xa8] sm:$0xf]  ;;  %v1006_v32 = vld [vmem:[#allocation2 + $0xb4] sm:$0xf0]  ;;  %vm237_vm0 = vweird.f32 %v1225_v51 }
  0x1b   : > { %463 = vmatpush.bf16.msra.mxu1 %v890_v21  ;;  %476 = vmatpush.bf16.msra.mxu2 %v894_v22  ;;  %v874_v34 = vor.u32 %v1003_v28, %v871_v30  ;;  %v878_v35 = vor.u32 %v1006_v32, %v877_v31  ;;  %v1004_v36 = vld [vmem:[#allocation2 + $0xac] sm:$0xf]  ;;  %v879_v37 = vld [vmem:[#allocation2 + $0xb8] sm:$0xf0]  ;;  %v853_v39 = vld [vmem:[#allocation2 + $0x80] sm:$0xf] }
  0x1c   : > { %489 = vmatpush.bf16.msra.mxu3 %v898_v25  ;;  %v882_v38 = vor.u32 %v1004_v36, %v879_v37  ;;  %v1001_v40 = vld [vmem:[#allocation2 + $0x8c] sm:$0xf0]  ;;  %v999_v41 = vld [vmem:[#allocation2 + $0x84] sm:$0xf]  ;;  %v855_v43 = vld [vmem:[#allocation2 + $0x90] sm:$0xf0] }
  0x1d   : > { %v854_v42 = vor.u32 %v1001_v40, %v853_v39  ;;  %v861_v44 = vld [vmem:[#allocation2 + $0x88] sm:$0xf]  ;;  %v1002_v45 = vld [vmem:[#allocation2 + $0x94] sm:$0xf0]  ;;  %v858_v46 = vor.u32 %v999_v41, %v855_v43  ;;  %v1000_v48 = vld [vmem:[#allocation2 + $0x8c] sm:$0xf] }
  0x1e   : > { %451 = vmatpush.bf16.msra.mxu0 %v870_v29  ;;  %v862_v47 = vor.u32 %v1002_v45, %v861_v44  ;;  %v863_v49 = vld [vmem:[#allocation2 + $0x98] sm:$0xf0]  ;;  %v837_v52 = vld [vmem:[#allocation2 + $0x60] sm:$0xf]  ;;  %v997_v53 = vld [vmem:[#allocation2 + $0x6c] sm:$0xf0] }
  0x1f   : > { %464 = vmatpush.bf16.msra.mxu1 %v874_v34  ;;  %477 = vmatpush.bf16.msra.mxu2 %v878_v35  ;;  %v866_v50 = vor.u32 %v1000_v48, %v863_v49  ;;  %v995_v54 = vld [vmem:[#allocation2 + $0x64] sm:$0xf]  ;;  %v838_v55 = vor.u32 %v997_v53, %v837_v52  ;;  %v839_v56 = vld [vmem:[#allocation2 + $0x70] sm:$0xf0]  ;;  %v845_v57 = vld [vmem:[#allocation2 + $0x68] sm:$0xf] }
  0x20   : > { %490 = vmatpush.bf16.msra.mxu3 %v882_v38  ;;  %v998_v58 = vld [vmem:[#allocation2 + $0x74] sm:$0xf0]  ;;  %v842_v59 = vor.u32 %v995_v54, %v839_v56  ;;  %v996_v61 = vld [vmem:[#allocation2 + $0x6c] sm:$0xf]  ;;  %v847_v62 = vld [vmem:[#allocation2 + $0x78] sm:$0xf0] }
  0x21   : > { %v846_v60 = vor.u32 %v998_v58, %v845_v57  ;;  %v233_v63 = vmul.f32 128.0, %v1225_v51  ;;  %v850_v1 = vor.u32 %v996_v61, %v847_v62  ;;  %v821_v2 = vld [vmem:[#allocation2 + $0x40] sm:$0xf]  ;;  %v993_v3 = vld [vmem:[#allocation2 + $0x4c] sm:$0xf0]  ;;  %v1022_v56 = vld [vmem:[#allocation4 + $0x38] sm:$0xff] }
  0x22   : > { %452 = vmatpush.bf16.msra.mxu0 %v854_v42  ;;  %v991_v4 = vld [vmem:[#allocation2 + $0x44] sm:$0xf]  ;;  %v822_v5 = vor.u32 %v993_v3, %v821_v2  ;;  %v823_v6 = vld [vmem:[#allocation2 + $0x50] sm:$0xf0]  ;;  %v829_v7 = vld [vmem:[#allocation2 + $0x48] sm:$0xf] }
  0x23   : > { %465 = vmatpush.bf16.msra.mxu1 %v858_v46  ;;  %478 = vmatpush.bf16.msra.mxu2 %v862_v47  ;;  %v994_v8 = vld [vmem:[#allocation2 + $0x54] sm:$0xf0]  ;;  %v826_v9 = vor.u32 %v991_v4, %v823_v6  ;;  %v992_v11 = vld [vmem:[#allocation2 + $0x4c] sm:$0xf]  ;;  %v831_v12 = vld [vmem:[#allocation2 + $0x58] sm:$0xf0] }
  0x24   : > { %491 = vmatpush.bf16.msra.mxu3 %v866_v50  ;;  %v830_v10 = vor.u32 %v994_v8, %v829_v7  ;;  %v234_v13 = vsub.f32 1.0, %v233_v63  ;;  %v834_v14 = vor.u32 %v992_v11, %v831_v12  ;;  %v805_v15 = vld [vmem:[#allocation2 + $0x20] sm:$0xf]  ;;  %v989_v16 = vld [vmem:[#allocation2 + $0x2c] sm:$0xf0]  ;;  %v1030_v57 = vld [vmem:[#allocation4 + $0x78] sm:$0xff] }
  0x25   : > { %v987_v17 = vld [vmem:[#allocation2 + $0x24] sm:$0xf]  ;;  %v806_v18 = vor.u32 %v989_v16, %v805_v15  ;;  %v807_v19 = vld [vmem:[#allocation2 + $0x30] sm:$0xf0]  ;;  %v813_v20 = vld [vmem:[#allocation2 + $0x28] sm:$0xf] }
  0x26   : > { %453 = vmatpush.bf16.msra.mxu0 %v838_v55  ;;  %v990_v21 = vld [vmem:[#allocation2 + $0x34] sm:$0xf0]  ;;  %v810_v22 = vor.u32 %v987_v17, %v807_v19  ;;  %v988_v24 = vld [vmem:[#allocation2 + $0x2c] sm:$0xf]  ;;  %v815_v25 = vld [vmem:[#allocation2 + $0x38] sm:$0xf0]  ;;  %v235_v26 = vmul.f32 %v1225_v51, %v234_v13 }
  0x27   : > { %466 = vmatpush.bf16.msra.mxu1 %v842_v59  ;;  %479 = vmatpush.bf16.msra.mxu2 %v846_v60  ;;  %v814_v23 = vor.u32 %v990_v21, %v813_v20  ;;  %v818_v27 = vor.u32 %v988_v24, %v815_v25  ;;  %v789_v28 = vld [vmem:[#allocation2] sm:$0xf]  ;;  %v985_v29 = vld [vmem:[#allocation2 + $0xc] sm:$0xf0]  ;;  %v983_v30 = vld [vmem:[#allocation2 + $0x4] sm:$0xf] }
  0x28   : > { %492 = vmatpush.bf16.msra.mxu3 %v850_v1  ;;  %v790_v31 = vor.u32 %v985_v29, %v789_v28  ;;  %v791_v32 = vld [vmem:[#allocation2 + $0x10] sm:$0xf0]  ;;  %v797_v33 = vld [vmem:[#allocation2 + $0x8] sm:$0xf]  ;;  %v986_v34 = vld [vmem:[#allocation2 + $0x14] sm:$0xf0]  ;;  %v236_v39 = vadd.f32 %v1225_v51, %v235_v26 }
  0x29   : > { %v794_v35 = vor.u32 %v983_v30, %v791_v32  ;;  %v798_v36 = vor.u32 %v986_v34, %v797_v33  ;;  %v984_v37 = vld [vmem:[#allocation2 + $0xc] sm:$0xf]  ;;  %v799_v38 = vld [vmem:[#allocation2 + $0x18] sm:$0xf0]  ;;  %v1065_v52 = vld [vmem:[%s1246_s1] ss:$0 sm:$0xff] }
  0x2a   : > { %454 = vmatpush.bf16.msra.mxu0 %v822_v5  ;;  %v802_v40 = vor.u32 %v984_v37, %v799_v38  ;;  %v238_v41 = vsel %vm237_vm0, %v1225_v51, %v236_v39  ;;  %v1021_v58 = vld [vmem:[#allocation4 + $0x30] sm:$0xff]  ;;  %v1020_v60 = vld [vmem:[#allocation4 + $0x28] sm:$0xff]  ;;  %v1019_v62 = vld [vmem:[#allocation4 + $0x20] sm:$0xff] }
  0x2b   : > { %467 = vmatpush.bf16.msra.mxu1 %v826_v9  ;;  %480 = vmatpush.bf16.msra.mxu2 %v830_v10  ;;  %v1029_v59 = vld [vmem:[#allocation4 + $0x70] sm:$0xff]  ;;  %v1028_v61 = vld [vmem:[#allocation4 + $0x68] sm:$0xff]  ;;  %v1027_v63 = vld [vmem:[#allocation4 + $0x60] sm:$0xff] }
  0x2c   : > { %493 = vmatpush.bf16.msra.mxu3 %v834_v14  ;;  %v1018_v1 = vld [vmem:[#allocation4 + $0x18] sm:$0xff]  ;;  %v1017_v3 = vld [vmem:[#allocation4 + $0x10] sm:$0xff]  ;;  %v1016_v5 = vld [vmem:[#allocation4 + $0x8] sm:$0xff] }
  0x2d   : > { %v1026_v2 = vld [vmem:[#allocation4 + $0x58] sm:$0xff]  ;;  %v1025_v4 = vld [vmem:[#allocation4 + $0x50] sm:$0xff]  ;;  %v1024_v6 = vld [vmem:[#allocation4 + $0x48] sm:$0xff] }
  0x2e   : > { %455 = vmatpush.bf16.msra.mxu0 %v806_v18  ;;  %v1015_v7 = vld [vmem:[#allocation4] sm:$0xff] }
  0x2f   : > { %468 = vmatpush.bf16.msra.mxu1 %v810_v22  ;;  %481 = vmatpush.bf16.msra.mxu2 %v814_v23  ;;  %v1023_v8 = vld [vmem:[#allocation4 + $0x40] sm:$0xff] }
  0x30   : > { %494 = vmatpush.bf16.msra.mxu3 %v818_v27 }
  0x32   : > { %456 = vmatpush.bf16.msra.mxu0 %v790_v31 }
  0x33   : > { %469 = vmatpush.bf16.msra.mxu1 %v794_v35  ;;  %482 = vmatpush.bf16.msra.mxu2 %v798_v36 }
  0x34   : > { %495 = vmatpush.bf16.msra.mxu3 %v802_v40 }
  0x36   : > { %673 = vmatpush.bf16.msrb.mxu0 %v1022_v56 }
  0x37   : > { %686 = vmatpush.bf16.msrb.mxu1 %v1030_v57 }
  0x3a   : > { %674 = vmatpush.bf16.msrb.mxu0 %v1021_v58 }
  0x3b   : > { %687 = vmatpush.bf16.msrb.mxu1 %v1029_v59 }
  0x3e   : > { %675 = vmatpush.bf16.msrb.mxu0 %v1020_v60 }
  0x3f   : > { %688 = vmatpush.bf16.msrb.mxu1 %v1028_v61 }
  0x42   : > { %676 = vmatpush.bf16.msrb.mxu0 %v1019_v62 }
  0x43   : > { %689 = vmatpush.bf16.msrb.mxu1 %v1027_v63 }
  0x46   : > { %677 = vmatpush.bf16.msrb.mxu0 %v1018_v1 }
  0x47   : > { %690 = vmatpush.bf16.msrb.mxu1 %v1026_v2 }
  0x4a   : > { %678 = vmatpush.bf16.msrb.mxu0 %v1017_v3 }
  0x4b   : > { %691 = vmatpush.bf16.msrb.mxu1 %v1025_v4 }
  0x4e   : > { %679 = vmatpush.bf16.msrb.mxu0 %v1016_v5 }
  0x4f   : > { %692 = vmatpush.bf16.msrb.mxu1 %v1024_v6 }
  0x52   : > { %680 = vmatpush.bf16.msrb.mxu0 %v1015_v7 }
  0x53   : > { %693 = vmatpush.bf16.msrb.mxu1 %v1023_v8 }
  0x8d   : > { %v231_v42 = vpop.xlane.xlu0 %230 }
  0x8e   : > { %v239_v43 = vmul.f32 %v238_v41, %v231_v42 }
  0x90   : > { %v240_v44 = vadd.f32 1e-06, %v239_v43 }
  0x92   : > { %1068 = vrsqrt.f32 %v240_v44  ;;  %vm247_vm2 = vweird.f32 %v240_v44 }
  0x98   : > { %v1069_v45 = vpop.eup %1068 }
  0x99   : > { %v242_v46 = vmul.f32 %v1069_v45, %v240_v44  ;;  %vm248_vm1 = vweird.f32 %v1069_v45 }
  0x9a   : > { %vm249_vm3 = vmor %vm247_vm2, %vm248_vm1 }
  0x9b   : > { %v243_v47 = vmul.f32 %v1069_v45, %v242_v46 }
  0x9d   : > { %v244_v48 = vmul.f32 0.5, %v243_v47 }
  0x9f   : > { %v245_v49 = vsub.f32 1.5, %v244_v48 }
  0xa1   : > { %v246_v50 = vmul.f32 %v1069_v45, %v245_v49 }
  0xa3   : > { %v250_v53 = vsel %vm249_vm3, %v1069_v45, %v246_v50 }
  0xa4   : > { %v251_v51 = vmul.f32 %v250_v53, %v1221_v0 }
  0xa6   : > { %v255_v54 = vmul.f32 %v1065_v52, %v251_v51 }
  0xa8   : > { %v256_v55 = vpack.c.bf16 %v255_v54, %v255_v54 }
  0xaa   : > { %457 = vmatmul.bf16.vlgmr.msra.gmra.mxu0 %v256_v55  ;;  %470 = vmatmul.bf16.vlgmr.msra.gmra.mxu1 %v256_v55 }
  0xab   : > { %483 = vmatmul.bf16.vlgmr.msra.gmra.mxu2 %v256_v55  ;;  %496 = vmatmul.bf16.vlgmr.msra.gmra.mxu3 %v256_v55 }
 0x127   : > { %v458_v9 = vpop.f32.mrf.mxu0  ;;  %v471_v10 = vpop.f32.mrf.mxu1 }
 0x128   : > { %v915_v11 = vmul.f32 -1.442695, %v458_v9  ;;  %v916_v12 = vmul.f32 -1.442695, %v471_v10 }
 0x12a   : > { %1070 = vpow2.f32 %v915_v11 }
 0x12b   : > { %1072 = vpow2.f32 %v916_v12 }
 0x12e   : > { %v484_v13 = vpop.f32.mrf.mxu2  ;;  %v497_v14 = vpop.f32.mrf.mxu3 }
 0x12f   : > { %v460_v15 = vpop.f32.mrf.mxu0  ;;  %v473_v16 = vpop.f32.mrf.mxu1 }
 0x130   : > { %v1071_v17 = vpop.eup %1070 }
 0x131   : > { %v1073_v18 = vpop.eup %1072  ;;  %v507_v19 = vadd.f32 1.0, %v1071_v17 }
 0x132   : > { %v508_v20 = vadd.f32 1.0, %v1073_v18 }
 0x133   : > { %1074 = vrcp.f32 %v507_v19  ;;  %v520_v28 = vand.u32 2147483648, %v507_v19  ;;  %v518_v31 = vand.u32 2147483647, %v507_v19  ;;  %vm514_vm6 = vweird.f32 %v507_v19 }
 0x134   : > { %1076 = vrcp.f32 %v508_v20  ;;  %v535_v32 = vand.u32 2147483648, %v508_v20  ;;  %v533_v34 = vand.u32 2147483647, %v508_v20  ;;  %vm529_vm8 = vweird.f32 %v508_v20 }
 0x135   : > { %v521_v36 = vor.u32 1.1754944e-38, %v520_v28  ;;  %vm519_vm9 = vcmp.eq.f32.partialorder %v518_v31, 8.507059e+37 }
 0x136   : > { %v486_v21 = vpop.f32.mrf.mxu2  ;;  %v499_v22 = vpop.f32.mrf.mxu3  ;;  %v536_v39 = vor.u32 1.1754944e-38, %v535_v32  ;;  %vm534_vm11 = vcmp.eq.f32.partialorder %v533_v34, 8.507059e+37 }
 0x139   : > { %v1075_v23 = vpop.eup %1074 }
 0x13a   : > { %v1077_v24 = vpop.eup %1076  ;;  %v510_v25 = vmul.f32 %v1075_v23, %v507_v19  ;;  %vm515_vm4 = vweird.f32 %v1075_v23 }
 0x13b   : > { %v525_v26 = vmul.f32 %v1077_v24, %v508_v20  ;;  %vm530_vm5 = vweird.f32 %v1077_v24  ;;  %vm516_vm7 = vmor %vm514_vm6, %vm515_vm4 }
 0x13c   : > { %v511_v27 = vsub.f32 1.0, %v510_v25  ;;  %vm531_vm10 = vmor %vm529_vm8, %vm530_vm5 }
 0x13d   : > { %v526_v29 = vsub.f32 1.0, %v525_v26 }
 0x13e   : > { %v512_v30 = vmul.f32 %v1075_v23, %v511_v27 }
 0x13f   : > { %v527_v33 = vmul.f32 %v1077_v24, %v526_v29 }
 0x140   : > { %v513_v35 = vadd.f32 %v1075_v23, %v512_v30 }
 0x141   : > { %v528_v37 = vadd.f32 %v1077_v24, %v527_v33 }
 0x142   : > { %v517_v38 = vsel %vm516_vm7, %v1075_v23, %v513_v35 }
 0x143   : > { %v522_v40 = vsel %vm519_vm9, %v521_v36, %v517_v38  ;;  %v532_v41 = vsel %vm531_vm10, %v1077_v24, %v528_v37 }
 0x144   : > { %v539_v42 = vmul.f32 %v522_v40, %v458_v9  ;;  %v537_v43 = vsel %vm534_vm11, %v536_v39, %v532_v41 }
 0x145   : > { %v540_v44 = vmul.f32 %v537_v43, %v471_v10 }
 0x146   : > { %v541_v45 = vmul.f32 %v539_v42, %v484_v13 }
 0x147   : > { %v542_v46 = vmul.f32 %v540_v44, %v497_v14 }
 0x148   : > { %v543_v47 = vpack.c.bf16 %v541_v45, %v541_v45 }
 0x149   : > { %v544_v48 = vpack.c.bf16 %v542_v46, %v542_v46 }
 0x14a   : > { %681 = vmatmul.bf16.vlgmr.msrb.gmra.mxu0 %v543_v47 }
 0x14b   : > { %694 = vmatmul.bf16.vlgmr.msrb.gmra.mxu1 %v544_v48 }
 0x1c7   : > { %v682_v49 = vpop.f32.mrf.mxu0 }
 0x1c8   : > { %v695_v50 = vpop.f32.mrf.mxu1 }
 0x1c9   : > { %v696_v52 = vadd.f32 %v695_v50, %v682_v49 }
 0x1cb   : > { %v699_v53 = vadd.f32 %v696_v52, %v1221_v0 }
 0x1cd   : > { %700 = vst [vmem:[%s226_s14] sm:$0xff] %v699_v53 }
 0x1cf   : > { %v684_v51 = vpop.f32.mrf.mxu0 }
 0x1d0   : > { %v697_v54 = vpop.f32.mrf.mxu1 }
 0x1d1 PF: > { %s16_s15 = sadd.s32 1, %s1152_s15  }
 0x1d2   : > { %p13_p7 = scmp.ge.s32.totalorder %s16_s15, 4  }
 0x1d4   :  { %15 = sbr.rel (!%p13_p7) target bundleno = 2 (0x2), region = 75 }
 0x1d9   :  { %720 = vsyncpa [#allocation3], 1 }
 0x1da   :  { %722 = vsyncpa [#allocation3 + $0x1], 1 }
 0x1db   :  { %723 = vsyncpa [#allocation5], 1 }

// kernel: llama3_forward.7
= control target key start
LH: loop header
LB: loop body
LE: loop exit
PB: predicated region body
PF: predicated region fallthrough
CT: control target
= control target key end

     0   :  { %11 = vsyncpa [#allocation3], 0  ;;  %s1765_s0 = inlined_call_operand.vmem [shape: f32[2,8,128], index: 0, kind: input, shape index: {}]   ;;  %s1766_s1 = inlined_call_operand.vmem [shape: f32[1,128], index: 1, kind: input, shape index: {}]   ;;  %s1767_s2 = inlined_call_operand.hbm [shape: bf16[128,512], index: 2, kind: input, shape index: {}]   ;;  %s1768_s3 = inlined_call_operand.hbm [shape: bf16[256,128], index: 3, kind: input, shape index: {}]   ;;  %s1769_s4 = inlined_call_operand.vmem [shape: f32[8,64], index: 4, kind: input, shape index: {}]   ;;  %s1770_s5 = inlined_call_operand.vmem [shape: f32[8,64], index: 5, kind: input, shape index: {}]   ;;  %s1771_s6 = inlined_call_operand.vmem [shape: f32[2,8,128], index: 6, kind: output, shape index: {}]  }
   0x1   :  { %12 = vsyncpa [#allocation5], 0  ;;  %s1607_s21 = smov 0  }
   0x2 LB: > { %s194_s24 = sshll.u32 %s1767_s2, 4  ;;  %s1162_s25 = sadd.s32 4294967295, %s1560_s21   ;;  %s1560_s21 = sphi %s1607_s21, %s18_s21   ;;  %s195_s24 = int_to_ptr.hbm [resolvable:$true] %s194_s24 }
   0x3   : > { %p1164_p0 = scmp.ge.s32.totalorder %s1560_s21, 1  ;;  %p180_p1 = scmp.lt.s32.totalorder %s1560_s21, 3 }
   0x4   : > { %p1438_p2 = scmp.eq.s32.totalorder %s1162_s25, 0  ;;  %s1562_s27 = smov [#allocation2]  }
   0x5   : > { %p1618_p3 = pnand %p1164_p0, %p180_p1  ;;  %s196_s28 = sshll.u32 %s1562_s27, 4  ;;  %s197_s28 = int_to_ptr.vmem [resolvable:$true] %s196_s28 }
   0x6   : > { %s208_s7 = sshll.u32 %s1768_s3, 4  ;;  %s1563_s8 = smov [#allocation4]   ;;  %s209_s7 = int_to_ptr.hbm [resolvable:$true] %s208_s7 }
   0x7   : > { %p1431_p4 = pneg %p1618_p3  ;;  %s210_s9 = sshll.u32 %s1563_s8, 4  ;;  %s211_s9 = int_to_ptr.vmem [resolvable:$true] %s210_s9 }
   0x8   : > { %s1564_s10 = smov 256   ;;  %s1565_s11 = smov 16  }
   0x9   : > { %p1432_p5 = pnand %p1438_p2, %p1431_p4  ;;  %s1566_s12 = smov 64  }
   0xa   : > { %s1567_s13 = smov 4   ;;  %239 = sbr.rel (%p1618_p3) target bundleno = 1407 (0x57f), region = 44 }
   0xb   : > { %1434 = dma.hbm_to_vmem [thread:$0]  (!%p1432_p5), %s195_s24, 4096, %s197_s28, [#allocation3], %s1564_s10, %s1564_s10, %s1565_s11  }
   0xc   : > { %1437 = dma.hbm_to_vmem [thread:$0]  (!%p1432_p5), %s209_s7, 2048, %s211_s9, [#allocation5], %s1566_s12, %s1566_s12, %s1567_s13  }
   0xf   : > { %1551 = dma.done.wait (%p1438_p2), [#allocation3], 4096  }
  0x10   : > { %1553 = vsyncadd (%p1438_p2), [#allocation3], 4294963200 }
  0x11   : > { %1555 = dma.done.wait (%p1438_p2), [#allocation5], 2048  }
  0x12   : > { %1557 = vsyncadd (%p1438_p2), [#allocation5], 4294965248  ;;  %p273_p6 = scmp.lt.s32.totalorder %s1162_s25, 1  ;;  %v1287_v1 = vld [vmem:[#allocation2 + $0xe0] sm:$0xf]  ;;  %v1568_v33 = vmov 128.0  }
  0x13   : > { %v1405_v2 = vld [vmem:[#allocation2 + $0xec] sm:$0xf0]  ;;  %v1403_v5 = vld [vmem:[#allocation2 + $0xe4] sm:$0xf]  ;;  %v1289_v6 = vld [vmem:[#allocation2 + $0xf0] sm:$0xf0]  ;;  %1466 = vrcp.f32 %v1568_v33 }
  0x14   : > { %s1774_s25 = smov (!%p273_p6, %s1162_s25), 1  ;;  %v1288_v4 = vor.u32 %v1405_v2, %v1287_v1  ;;  %v1295_v7 = vld [vmem:[#allocation2 + $0xe8] sm:$0xf]  ;;  %v1292_v8 = vor.u32 %v1403_v5, %v1289_v6  ;;  %v1406_v9 = vld [vmem:[#allocation2 + $0xf4] sm:$0xf0]  ;;  %s1569_s20 = smov 96  }
  0x15   : > { %s1171_s14 = sshll.u32 %s1774_s25, 3  ;;  %v1404_v10 = vld [vmem:[#allocation2 + $0xec] sm:$0xf]  ;;  %v1297_v11 = vld [vmem:[#allocation2 + $0xf8] sm:$0xf0]  ;;  %v1296_v12 = vor.u32 %v1406_v9, %v1295_v7  ;;  %s1570_s22 = smov 32  }
  0x16   : > { %s276_s17 = scalar_lea.vmem %s1765_s0, %s1171_s14  ;;  %504 = vmatpush.bf16.msra.mxu0 %v1288_v4  ;;  %v1300_v13 = vor.u32 %v1404_v10, %v1297_v11  ;;  %517 = vmatpush.bf16.msra.mxu1 %v1292_v8  ;;  %v1271_v14 = vld [vmem:[#allocation2 + $0xc0] sm:$0xf]  ;;  %v1401_v15 = vld [vmem:[#allocation2 + $0xcc] sm:$0xf0]  ;;  %v1399_v16 = vld [vmem:[#allocation2 + $0xc4] sm:$0xf]  ;;  %s280_s7 = scalar_lea.vmem %s1771_s6, %s1171_s14 }
  0x17   : > { %v1642_v0 = vld [vmem:[%s276_s17] sm:$0xff]  ;;  %530 = vmatpush.bf16.msra.mxu2 %v1296_v12  ;;  %v1272_v17 = vor.u32 %v1401_v15, %v1271_v14  ;;  %v1273_v18 = vld [vmem:[#allocation2 + $0xd0] sm:$0xf0]  ;;  %v1279_v19 = vld [vmem:[#allocation2 + $0xc8] sm:$0xf]  ;;  %vm663_vm4 = vcmask 1043456  }
  0x18   : > { %v284_v3 = vmul.f32 %v1642_v0, %v1642_v0  ;;  %543 = vmatpush.bf16.msra.mxu3 %v1300_v13  ;;  %v1402_v20 = vld [vmem:[#allocation2 + $0xd4] sm:$0xf0]  ;;  %v1276_v21 = vor.u32 %v1399_v16, %v1273_v18  ;;  %v1400_v23 = vld [vmem:[#allocation2 + $0xcc] sm:$0xf]  ;;  %v1281_v24 = vld [vmem:[#allocation2 + $0xd8] sm:$0xf0] }
  0x19   : > { %v1280_v22 = vor.u32 %v1402_v20, %v1279_v19  ;;  %v1284_v25 = vor.u32 %v1400_v23, %v1281_v24  ;;  %v1255_v26 = vld [vmem:[#allocation2 + $0xa0] sm:$0xf]  ;;  %v1397_v27 = vld [vmem:[#allocation2 + $0xac] sm:$0xf0]  ;;  %v1395_v28 = vld [vmem:[#allocation2 + $0xa4] sm:$0xf]  ;;  %v1646_v51 = vpop.eup %1466 }
  0x1a   : > { %285 = vadd.xlane.f32.xlu0 %v284_v3  ;;  %505 = vmatpush.bf16.msra.mxu0 %v1272_v17  ;;  %v1256_v29 = vor.u32 %v1397_v27, %v1255_v26  ;;  %v1257_v30 = vld [vmem:[#allocation2 + $0xb0] sm:$0xf0]  ;;  %v1263_v31 = vld [vmem:[#allocation2 + $0xa8] sm:$0xf]  ;;  %v1398_v32 = vld [vmem:[#allocation2 + $0xb4] sm:$0xf0]  ;;  %vm292_vm0 = vweird.f32 %v1646_v51 }
  0x1b   : > { %518 = vmatpush.bf16.msra.mxu1 %v1276_v21  ;;  %531 = vmatpush.bf16.msra.mxu2 %v1280_v22  ;;  %v1260_v34 = vor.u32 %v1395_v28, %v1257_v30  ;;  %v1264_v35 = vor.u32 %v1398_v32, %v1263_v31  ;;  %v1396_v36 = vld [vmem:[#allocation2 + $0xac] sm:$0xf]  ;;  %v1265_v37 = vld [vmem:[#allocation2 + $0xb8] sm:$0xf0]  ;;  %v1239_v39 = vld [vmem:[#allocation2 + $0x80] sm:$0xf] }
  0x1c   : > { %544 = vmatpush.bf16.msra.mxu3 %v1284_v25  ;;  %v1268_v38 = vor.u32 %v1396_v36, %v1265_v37  ;;  %v1393_v40 = vld [vmem:[#allocation2 + $0x8c] sm:$0xf0]  ;;  %v1391_v41 = vld [vmem:[#allocation2 + $0x84] sm:$0xf]  ;;  %v1241_v43 = vld [vmem:[#allocation2 + $0x90] sm:$0xf0] }
  0x1d   : > { %v1240_v42 = vor.u32 %v1393_v40, %v1239_v39  ;;  %v1247_v44 = vld [vmem:[#allocation2 + $0x88] sm:$0xf]  ;;  %v1394_v45 = vld [vmem:[#allocation2 + $0x94] sm:$0xf0]  ;;  %v1244_v46 = vor.u32 %v1391_v41, %v1241_v43  ;;  %v1392_v48 = vld [vmem:[#allocation2 + $0x8c] sm:$0xf] }
  0x1e   : > { %506 = vmatpush.bf16.msra.mxu0 %v1256_v29  ;;  %v1248_v47 = vor.u32 %v1394_v45, %v1247_v44  ;;  %v1249_v49 = vld [vmem:[#allocation2 + $0x98] sm:$0xf0]  ;;  %v1223_v52 = vld [vmem:[#allocation2 + $0x60] sm:$0xf]  ;;  %v1389_v53 = vld [vmem:[#allocation2 + $0x6c] sm:$0xf0] }
  0x1f   : > { %519 = vmatpush.bf16.msra.mxu1 %v1260_v34  ;;  %532 = vmatpush.bf16.msra.mxu2 %v1264_v35  ;;  %v1252_v50 = vor.u32 %v1392_v48, %v1249_v49  ;;  %v1387_v54 = vld [vmem:[#allocation2 + $0x64] sm:$0xf]  ;;  %v1224_v55 = vor.u32 %v1389_v53, %v1223_v52  ;;  %v1225_v56 = vld [vmem:[#allocation2 + $0x70] sm:$0xf0]  ;;  %v1231_v57 = vld [vmem:[#allocation2 + $0x68] sm:$0xf] }
  0x20   : > { %545 = vmatpush.bf16.msra.mxu3 %v1268_v38  ;;  %v1390_v58 = vld [vmem:[#allocation2 + $0x74] sm:$0xf0]  ;;  %v1228_v59 = vor.u32 %v1387_v54, %v1225_v56  ;;  %v1388_v61 = vld [vmem:[#allocation2 + $0x6c] sm:$0xf]  ;;  %v1233_v62 = vld [vmem:[#allocation2 + $0x78] sm:$0xf0] }
  0x21   : > { %v1232_v60 = vor.u32 %v1390_v58, %v1231_v57  ;;  %v288_v63 = vmul.f32 128.0, %v1646_v51  ;;  %v1236_v1 = vor.u32 %v1388_v61, %v1233_v62  ;;  %v1207_v2 = vld [vmem:[#allocation2 + $0x40] sm:$0xf]  ;;  %v1385_v3 = vld [vmem:[#allocation2 + $0x4c] sm:$0xf0]  ;;  %s1571_s26 = smov 64  }
  0x22   : > { %507 = vmatpush.bf16.msra.mxu0 %v1240_v42  ;;  %v1383_v4 = vld [vmem:[#allocation2 + $0x44] sm:$0xf]  ;;  %v1208_v5 = vor.u32 %v1385_v3, %v1207_v2  ;;  %v1209_v6 = vld [vmem:[#allocation2 + $0x50] sm:$0xf0]  ;;  %v1215_v7 = vld [vmem:[#allocation2 + $0x48] sm:$0xf] }
  0x23   : > { %520 = vmatpush.bf16.msra.mxu1 %v1244_v46  ;;  %533 = vmatpush.bf16.msra.mxu2 %v1248_v47  ;;  %v1386_v8 = vld [vmem:[#allocation2 + $0x54] sm:$0xf0]  ;;  %v1212_v9 = vor.u32 %v1383_v4, %v1209_v6  ;;  %v1384_v11 = vld [vmem:[#allocation2 + $0x4c] sm:$0xf]  ;;  %v1217_v12 = vld [vmem:[#allocation2 + $0x58] sm:$0xf0] }
  0x24   : > { %546 = vmatpush.bf16.msra.mxu3 %v1252_v50  ;;  %v1216_v10 = vor.u32 %v1386_v8, %v1215_v7  ;;  %v289_v13 = vsub.f32 1.0, %v288_v63  ;;  %v1220_v14 = vor.u32 %v1384_v11, %v1217_v12  ;;  %v1191_v15 = vld [vmem:[#allocation2 + $0x20] sm:$0xf]  ;;  %v1381_v16 = vld [vmem:[#allocation2 + $0x2c] sm:$0xf0]  ;;  %vm572_vm5 = vcmask 261120  }
  0x25   : > { %v1379_v17 = vld [vmem:[#allocation2 + $0x24] sm:$0xf]  ;;  %v1192_v18 = vor.u32 %v1381_v16, %v1191_v15  ;;  %v1193_v19 = vld [vmem:[#allocation2 + $0x30] sm:$0xf0]  ;;  %v1199_v20 = vld [vmem:[#allocation2 + $0x28] sm:$0xf] }
  0x26   : > { %508 = vmatpush.bf16.msra.mxu0 %v1224_v55  ;;  %v1382_v21 = vld [vmem:[#allocation2 + $0x34] sm:$0xf0]  ;;  %v1196_v22 = vor.u32 %v1379_v17, %v1193_v19  ;;  %v1380_v24 = vld [vmem:[#allocation2 + $0x2c] sm:$0xf]  ;;  %v1201_v25 = vld [vmem:[#allocation2 + $0x38] sm:$0xf0]  ;;  %v290_v26 = vmul.f32 %v1646_v51, %v289_v13 }
  0x27   : > { %521 = vmatpush.bf16.msra.mxu1 %v1228_v59  ;;  %534 = vmatpush.bf16.msra.mxu2 %v1232_v60  ;;  %v1200_v23 = vor.u32 %v1382_v21, %v1199_v20  ;;  %v1204_v27 = vor.u32 %v1380_v24, %v1201_v25  ;;  %v1175_v28 = vld [vmem:[#allocation2] sm:$0xf]  ;;  %v1377_v29 = vld [vmem:[#allocation2 + $0xc] sm:$0xf0]  ;;  %v1375_v30 = vld [vmem:[#allocation2 + $0x4] sm:$0xf] }
  0x28   : > { %547 = vmatpush.bf16.msra.mxu3 %v1236_v1  ;;  %v1176_v31 = vor.u32 %v1377_v29, %v1175_v28  ;;  %v1177_v32 = vld [vmem:[#allocation2 + $0x10] sm:$0xf0]  ;;  %v1183_v33 = vld [vmem:[#allocation2 + $0x8] sm:$0xf]  ;;  %v1378_v34 = vld [vmem:[#allocation2 + $0x14] sm:$0xf0]  ;;  %v291_v39 = vadd.f32 %v1646_v51, %v290_v26 }
  0x29   : > { %v1180_v35 = vor.u32 %v1375_v30, %v1177_v32  ;;  %v1184_v36 = vor.u32 %v1378_v34, %v1183_v33  ;;  %v1376_v37 = vld [vmem:[#allocation2 + $0xc] sm:$0xf]  ;;  %v1185_v38 = vld [vmem:[#allocation2 + $0x18] sm:$0xf0]  ;;  %v1465_v52 = vld [vmem:[%s1766_s1] ss:$0 sm:$0xff] }
  0x2a   : > { %509 = vmatpush.bf16.msra.mxu0 %v1208_v5  ;;  %v1188_v40 = vor.u32 %v1376_v37, %v1185_v38  ;;  %v293_v41 = vsel %vm292_vm0, %v1646_v51, %v291_v39  ;;  %v1680_v6 = vld [vmem:[%s1769_s4] sm:$0xff]  ;;  %vm612_vm6 = vcmask 523264   ;;  %vm634_vm8 = vcmask 64512  }
  0x2b   : > { %522 = vmatpush.bf16.msra.mxu1 %v1212_v9  ;;  %535 = vmatpush.bf16.msra.mxu2 %v1216_v10  ;;  %v1687_v8 = vld [vmem:[%s1770_s5] sm:$0xff] }
  0x2c   : > { %548 = vmatpush.bf16.msra.mxu3 %v1220_v14 }
  0x2e   : > { %510 = vmatpush.bf16.msra.mxu0 %v1192_v18 }
  0x2f   : > { %523 = vmatpush.bf16.msra.mxu1 %v1196_v22  ;;  %536 = vmatpush.bf16.msra.mxu2 %v1200_v23 }
  0x30   : > { %549 = vmatpush.bf16.msra.mxu3 %v1204_v27 }
  0x32   : > { %511 = vmatpush.bf16.msra.mxu0 %v1176_v31 }
  0x33   : > { %524 = vmatpush.bf16.msra.mxu1 %v1180_v35  ;;  %537 = vmatpush.bf16.msra.mxu2 %v1184_v36 }
  0x34   : > { %550 = vmatpush.bf16.msra.mxu3 %v1188_v40 }
  0x8d   : > { %v286_v42 = vpop.xlane.xlu0 %285 }
  0x8e   : > { %v294_v43 = vmul.f32 %v293_v41, %v286_v42 }
  0x90   : > { %v295_v44 = vadd.f32 1e-06, %v294_v43 }
  0x92   : > { %1468 = vrsqrt.f32 %v295_v44  ;;  %vm302_vm2 = vweird.f32 %v295_v44 }
  0x98   : > { %v1469_v45 = vpop.eup %1468 }
  0x99   : > { %v297_v46 = vmul.f32 %v1469_v45, %v295_v44  ;;  %vm303_vm1 = vweird.f32 %v1469_v45 }
  0x9a   : > { %vm304_vm3 = vmor %vm302_vm2, %vm303_vm1 }
  0x9b   : > { %v298_v47 = vmul.f32 %v1469_v45, %v297_v46 }
  0x9d   : > { %v299_v48 = vmul.f32 0.5, %v298_v47 }
  0x9f   : > { %v300_v49 = vsub.f32 1.5, %v299_v48 }
  0xa1   : > { %v301_v50 = vmul.f32 %v1469_v45, %v300_v49 }
  0xa3   : > { %v305_v53 = vsel %vm304_vm3, %v1469_v45, %v301_v50 }
  0xa4   : > { %v306_v51 = vmul.f32 %v305_v53, %v1642_v0 }
  0xa6   : > { %v310_v54 = vmul.f32 %v1465_v52, %v306_v51 }
  0xa8   : > { %v311_v55 = vpack.c.bf16 %v310_v54, %v310_v54 }
  0xaa   : > { %512 = vmatmul.bf16.vlgmr.msra.gmra.mxu0 %v311_v55  ;;  %525 = vmatmul.bf16.vlgmr.msra.gmra.mxu1 %v311_v55 }
  0xab   : > { %538 = vmatmul.bf16.vlgmr.msra.gmra.mxu2 %v311_v55  ;;  %551 = vmatmul.bf16.vlgmr.msra.gmra.mxu3 %v311_v55 }
 0x127   : > { %v1657_v56 = vpop.f32.mrf.mxu0  ;;  %v1659_v57 = vpop.f32.mrf.mxu1 }
 0x128   : > { %683 = vrot.lane.b32.xlu1 %v1657_v56, %s1569_s20  ;;  %v598_v58 = vsub.f32 0.0, %v1657_v56  ;;  %v757_v3 = vsub.f32 0.0, %v1659_v57  ;;  %v608_v44 = vmul.f32 %v1680_v6, %v1657_v56  ;;  %v767_v55 = vmul.f32 %v1680_v6, %v1659_v57 }
 0x12a   : > { %680 = vrot.lane.b32.xlu0 %v598_v58, %s1570_s22 }
 0x12e   : > { %v539_v59 = vpop.f32.mrf.mxu2  ;;  %v552_v60 = vpop.f32.mrf.mxu3 }
 0x12f   : > { %v1665_v61 = vpack.c.bf16 %v552_v60, %v552_v60  ;;  %582 = vrot.lane.b32.xlu2 %v539_v59, %s1569_s20  ;;  %v515_v62 = vpop.f32.mrf.mxu0  ;;  %v528_v63 = vpop.f32.mrf.mxu1  ;;  %v563_v1 = vsub.f32 0.0, %v539_v59  ;;  %v574_v37 = vmul.f32 %v1680_v6, %v539_v59  ;;  %v558_v60 = vlaneseq }
 0x131   : > { %579 = vrot.lane.b32.xlu1 %v563_v1, %s1570_s22  ;;  %v665_v2 = vsel %vm663_vm4, %v1665_v61, 0  ;;  %v559_v62 = vshrl.u32 %v558_v60, 7  ;;  %v561_v63 = vand.u32 127, %v558_v60 }
 0x132   : > { %674 = vmatpush.bf16.msrb.mxu3 %v665_v2  ;;  %565 = vrot.lane.b32.xlu0 %v563_v1, %s1569_s20 }
 0x133   : > { %vm562_vm7 = vcmp.le.s32.totalorder %v561_v63, %v559_v62 }
 0x136   : > { %751 = vmatpush.bf16.msra.mxu3 %v665_v2  ;;  %v541_v4 = vpop.f32.mrf.mxu2  ;;  %v554_v5 = vpop.f32.mrf.mxu3 }
 0x137   : > { %842 = vrot.lane.b32.xlu2 %v757_v3, %s1570_s22 }
 0x139   : > { %845 = vrot.lane.b32.xlu1 %v1659_v57, %s1569_s20 }
 0x13a   : > { %600 = vrot.lane.b32.xlu0 %v598_v58, %s1569_s20 }
 0x13f   : > { %587 = vrot.lane.b32.xlu2 %v1680_v6, %s1571_s26 }
 0x189   : > { %v583_v12 = vpop.permute.xlu2 %582 }
 0x191   : > { %v843_v16 = vpop.permute.xlu2 %842 }
 0x199   : > { %v588_v20 = vpop.permute.xlu2 %587 }
 0x19a   : > { %v684_v7 = vpop.permute.xlu1 %683  ;;  %v590_v21 = vmul.f32 %v588_v20, %v539_v59  ;;  %v849_v25 = vmul.f32 %v588_v20, %v1659_v57  ;;  %v687_v29 = vmul.f32 %v588_v20, %v1657_v56 }
 0x19c   : > { %v681_v9 = vpop.permute.xlu0 %680 }
 0x19d   : > { %v686_v10 = vsel %vm572_vm5, %v681_v9, %v684_v7 }
 0x19e   : > { %v688_v11 = vmul.f32 %v686_v10, %v1687_v8 }
 0x1a0   : > { %690 = vrot.lane.b32.xlu1 %v688_v11, %s1571_s26 }
 0x1a3   : > { %v580_v13 = vpop.permute.xlu1 %579 }
 0x1a4   : > { %v585_v14 = vsel %vm572_vm5, %v580_v13, %v583_v12  ;;  %v566_v33 = vpop.permute.xlu0 %565 }
 0x1a5   : > { %v591_v15 = vmul.f32 %v585_v14, %v1687_v8 }
 0x1a7   : > { %593 = vrot.lane.b32.xlu2 %v591_v15, %s1571_s26 }
 0x1a8   : > { %569 = vrot.lane.b32.xlu1 %v539_v59, %s1570_s22 }
 0x1ab   : > { %v846_v17 = vpop.permute.xlu1 %845 }
 0x1ac   : > { %v848_v18 = vsel %vm572_vm5, %v843_v16, %v846_v17  ;;  %v601_v40 = vpop.permute.xlu0 %600 }
 0x1ad   : > { %v850_v19 = vmul.f32 %v848_v18, %v1687_v8 }
 0x1af   : > { %852 = vrot.lane.b32.xlu2 %v850_v19, %s1571_s26 }
 0x1b0   : > { %604 = vrot.lane.b32.xlu1 %v1657_v56, %s1570_s22 }
 0x201   : > { %v594_v22 = vpop.permute.xlu2 %593 }
 0x202   : > { %v596_v23 = vadd.f32 %v594_v22, %v590_v21 }
 0x204   : > { %v597_v24 = vpack.c.bf16 %v596_v23, %v596_v23 }
 0x206   : > { %772 = vrot.lane.b32.xlu0 %v597_v24, %s1571_s26 }
 0x209   : > { %v853_v26 = vpop.permute.xlu2 %852 }
 0x20a   : > { %v855_v27 = vadd.f32 %v853_v26, %v849_v25 }
 0x20c   : > { %v856_v28 = vpack.c.bf16 %v855_v27, %v855_v27 }
 0x20e   : > { %763 = vrot.lane.b32.xlu0 %v1659_v57, %s1570_s22  ;;  %858 = vrot.lane.b32.xlu1 %v856_v28, %s1571_s26 }
 0x212   : > { %v691_v30 = vpop.permute.xlu1 %690 }
 0x213   : > { %v693_v31 = vadd.f32 %v691_v30, %v687_v29 }
 0x215   : > { %v694_v32 = vpack.c.bf16 %v693_v31, %v693_v31 }
 0x217   : > { %696 = vrot.lane.b32.xlu2 %v694_v32, %s1571_s26 }
 0x21a   : > { %v570_v34 = vpop.permute.xlu1 %569 }
 0x21b   : > { %v573_v35 = vsel %vm572_vm5, %v566_v33, %v570_v34 }
 0x21c   : > { %v575_v36 = vmul.f32 %v573_v35, %v1687_v8 }
 0x21e   : > { %v576_v38 = vadd.f32 %v575_v36, %v574_v37 }
 0x21f   : > { %759 = vrot.lane.b32.xlu2 %v757_v3, %s1569_s20 }
 0x220   : > { %v577_v39 = vpack.c.bf16 %v576_v38, %v576_v38 }
 0x222   : > { %v605_v41 = vpop.permute.xlu1 %604  ;;  %v617_v42 = vsel %vm612_vm6, %v577_v39, 0 }
 0x223   : > { %v607_v43 = vsel %vm572_vm5, %v601_v40, %v605_v41  ;;  %626 = vmatpush.bf16.xpose.msrb.mxu2 %v617_v42 }
 0x224   : > { %v609_v45 = vmul.f32 %v607_v43, %v1687_v8 }
 0x226   : > { %v610_v46 = vadd.f32 %v609_v45, %v608_v44 }
 0x228   : > { %v611_v47 = vpack.c.bf16 %v610_v46, %v610_v46 }
 0x22a   : > { %1301 = vmatmul.msk.bf16.vlgmr.msrb.gmra.mxu2 %vm612_vm6, %v611_v47 }
 0x22b   : > { %708 = vmatpush.bf16.xpose.msra.mxu2 %v617_v42 }
 0x271   : > { %v697_v48 = vpop.permute.xlu2 %696 }
 0x272   : > { %1303 = vmatmul.msk.bf16.vlgmr.msra.gmra.mxu2 %vm612_vm6, %v697_v48 }
 0x278   : > { %v773_v49 = vpop.permute.xlu0 %772 }
 0x279   : > { %v778_v50 = vsel %vm612_vm6, %v773_v49, 0  ;;  %v760_v52 = vpop.permute.xlu2 %759 }
 0x27a   : > { %787 = vmatpush.bf16.xpose.msrb.mxu0 %v778_v50  ;;  %870 = vmatpush.bf16.xpose.msrb.mxu2 %v778_v50 }
 0x280   : > { %v764_v53 = vpop.permute.xlu0 %763  ;;  %v859_v51 = vpop.permute.xlu1 %858 }
 0x281   : > { %v766_v54 = vsel %vm572_vm5, %v760_v52, %v764_v53 }
 0x282   : > { %v768_v56 = vmul.f32 %v766_v54, %v1687_v8  ;;  %1307 = vmatmul.msk.bf16.vlgmr.msrb.gmra.mxu2 %vm612_vm6, %v859_v51 }
 0x284   : > { %v769_v58 = vadd.f32 %v768_v56, %v767_v55 }
 0x286   : > { %v770_v59 = vpack.c.bf16 %v769_v58, %v769_v58 }
 0x288   : > { %1305 = vmatmul.msk.bf16.vlgmr.msrb.gmra.mxu0 %vm612_vm6, %v770_v59 }
 0x2ad   : > { %v628_v1 = vpop.f32.mrf.mxu2 }
 0x2ae   : > { %v632_v2 = vmul.f32 0.125, %v628_v1 }
 0x2b0   : > { %v633_v3 = vsel %vm562_vm7, %v632_v2, -1e+30 }
 0x2b1   : > { %v635_v4 = vsel %vm634_vm8, %v633_v3, -inf }
 0x2b2   : > { %636 = vmax.xlane.f32.xlu1 %v635_v4 }
 0x2b5   : > { %v630_v57 = vpop.f32.mrf.mxu2 }
 0x2f5   : > { %v710_v5 = vpop.f32.mrf.mxu2 }
 0x2f6   : > { %v714_v6 = vmul.f32 0.125, %v710_v5 }
 0x2f8   : > { %v715_v7 = vsel %vm562_vm7, %v714_v6, -1e+30 }
 0x2f9   : > { %v716_v8 = vsel %vm634_vm8, %v715_v7, -inf }
 0x2fa   : > { %717 = vmax.xlane.f32.xlu2 %v716_v8 }
 0x2fd   : > { %v712_v9 = vpop.f32.mrf.mxu2 }
 0x305   : > { %v789_v10 = vpop.f32.mrf.mxu0  ;;  %v872_v11 = vpop.f32.mrf.mxu2 }
 0x306   : > { %v876_v12 = vmul.f32 0.125, %v872_v11  ;;  %v793_v15 = vmul.f32 0.125, %v789_v10 }
 0x308   : > { %v877_v13 = vsel %vm562_vm7, %v876_v12, -1e+30  ;;  %v794_v18 = vsel %vm562_vm7, %v793_v15, -1e+30 }
 0x309   : > { %v878_v14 = vsel %vm634_vm8, %v877_v13, -inf  ;;  %v795_v19 = vsel %vm634_vm8, %v794_v18, -inf }
 0x30a   : > { %879 = vmax.xlane.f32.xlu0 %v878_v14 }
 0x30d   : > { %v791_v16 = vpop.f32.mrf.mxu0  ;;  %v874_v17 = vpop.f32.mrf.mxu2 }
 0x312   : > { %796 = vmax.xlane.f32.xlu0 %v795_v19 }
 0x325   : > { %v637_v20 = vpop.xlane.xlu1 %636 }
 0x326   : > { %v638_v21 = vsub.f32 %v633_v3, %v637_v20 }
 0x328   : > { %v639_v22 = vmul.f32 1.442695, %v638_v21 }
 0x32a   : > { %1470 = vpow2.f32 %v639_v22 }
 0x330   : > { %v1471_v23 = vpop.eup %1470 }
 0x331   : > { %v641_v24 = vsel %vm634_vm8, %v1471_v23, 0.0 }
 0x332   : > { %642 = vadd.xlane.f32.xlu2 %v641_v24 }
 0x36d   : > { %v718_v25 = vpop.xlane.xlu2 %717 }
 0x36e   : > { %v719_v26 = vsub.f32 %v715_v7, %v718_v25 }
 0x370   : > { %v720_v27 = vmul.f32 1.442695, %v719_v26 }
 0x372   : > { %1472 = vpow2.f32 %v720_v27 }
 0x378   : > { %v1473_v28 = vpop.eup %1472 }
 0x379   : > { %v722_v29 = vsel %vm634_vm8, %v1473_v28, 0.0 }
 0x37a   : > { %723 = vadd.xlane.f32.xlu1 %v722_v29 }
 0x37d   : > { %v880_v30 = vpop.xlane.xlu0 %879 }
 0x37e   : > { %v881_v31 = vsub.f32 %v877_v13, %v880_v30 }
 0x380   : > { %v882_v32 = vmul.f32 1.442695, %v881_v31 }
 0x382   : > { %1474 = vpow2.f32 %v882_v32 }
 0x385   : > { %v797_v33 = vpop.xlane.xlu0 %796 }
 0x386   : > { %v798_v34 = vsub.f32 %v794_v18, %v797_v33  ;;  %v1414_v33 = vld [vmem:[#allocation4 + $0x38] sm:$0xff] }
 0x387   : > { %1059 = vmatpush.bf16.msra.mxu0 %v1414_v33 }
 0x388   : > { %v1736_v35 = vpop.eup %1474  ;;  %v799_v36 = vmul.f32 1.442695, %v798_v34  ;;  %v1422_v34 = vld [vmem:[#allocation4 + $0x78] sm:$0xff] }
 0x389   : > { %v884_v37 = vsel %vm634_vm8, %v1736_v35, 0.0 }
 0x38a   : > { %1476 = vpow2.f32 %v799_v36  ;;  %885 = vadd.xlane.f32.xlu2 %v884_v37  ;;  %v1421_v36 = vld [vmem:[#allocation4 + $0x70] sm:$0xff] }
 0x390   : > { %v1740_v38 = vpop.eup %1476 }
 0x391   : > { %v801_v39 = vsel %vm634_vm8, %v1740_v38, 0.0 }
 0x392   : > { %802 = vadd.xlane.f32.xlu0 %v801_v39  ;;  %v1412_v39 = vld [vmem:[#allocation4 + $0x28] sm:$0xff] }
 0x393   : > { %821 = vrot.lane.b32.xlu1 %v1665_v61, %s1571_s26 }
 0x3a5   : > { %v643_v40 = vpop.xlane.xlu2 %642 }
 0x3a6   : > { %1478 = vrcp.f32 %v643_v40  ;;  %v655_v44 = vand.u32 2147483648, %v643_v40  ;;  %v653_v46 = vand.u32 2147483647, %v643_v40  ;;  %vm649_vm10 = vweird.f32 %v643_v40 }
 0x3a8   : > { %v656_v48 = vor.u32 1.1754944e-38, %v655_v44  ;;  %vm654_vm12 = vcmp.eq.f32.partialorder %v653_v46, 8.507059e+37  ;;  %v1418_v44 = vld [vmem:[#allocation4 + $0x58] sm:$0xff]  ;;  %v1417_v46 = vld [vmem:[#allocation4 + $0x50] sm:$0xff] }
 0x3ac   : > { %v1479_v41 = vpop.eup %1478 }
 0x3ad   : > { %v645_v42 = vmul.f32 %v1479_v41, %v643_v40  ;;  %vm650_vm9 = vweird.f32 %v1479_v41  ;;  %v1420_v40 = vld [vmem:[#allocation4 + $0x68] sm:$0xff] }
 0x3ae   : > { %vm651_vm11 = vmor %vm649_vm10, %vm650_vm9 }
 0x3af   : > { %v646_v43 = vsub.f32 1.0, %v645_v42 }
 0x3b1   : > { %v647_v45 = vmul.f32 %v1479_v41, %v646_v43  ;;  %v1410_v43 = vld [vmem:[#allocation4 + $0x18] sm:$0xff] }
 0x3b3   : > { %v648_v47 = vadd.f32 %v1479_v41, %v647_v45  ;;  %v1409_v45 = vld [vmem:[#allocation4 + $0x10] sm:$0xff] }
 0x3b5   : > { %v652_v49 = vsel %vm651_vm11, %v1479_v41, %v648_v47  ;;  %v1411_v41 = vld [vmem:[#allocation4 + $0x20] sm:$0xff] }
 0x3b6   : > { %v657_v50 = vsel %vm654_vm12, %v656_v48, %v652_v49  ;;  %v1408_v48 = vld [vmem:[#allocation4 + $0x8] sm:$0xff] }
 0x3b7   : > { %v658_v52 = vmul.f32 %v1471_v23, %v657_v50  ;;  %v1416_v49 = vld [vmem:[#allocation4 + $0x48] sm:$0xff] }
 0x3b9   : > { %v659_v53 = vpack.c.bf16 %v658_v52, %v658_v52 }
 0x3bb   : > { %1302 = vmatmul.msk.bf16.vlgmr.msrb.gmra.mxu3 %vm634_vm8, %v659_v53 }
 0x3ed   : > { %v724_v61 = vpop.xlane.xlu1 %723 }
 0x3ee   : > { %1480 = vrcp.f32 %v724_v61  ;;  %v736_v56 = vand.u32 2147483648, %v724_v61  ;;  %v734_v59 = vand.u32 2147483647, %v724_v61  ;;  %vm730_vm14 = vweird.f32 %v724_v61 }
 0x3f0   : > { %v737_v62 = vor.u32 1.1754944e-38, %v736_v56  ;;  %vm735_vm0 = vcmp.eq.f32.partialorder %v734_v59, 8.507059e+37 }
 0x3f4   : > { %v1481_v51 = vpop.eup %1480 }
 0x3f5   : > { %v726_v54 = vmul.f32 %v1481_v51, %v724_v61  ;;  %vm731_vm13 = vweird.f32 %v1481_v51 }
 0x3f6   : > { %vm732_vm15 = vmor %vm730_vm14, %vm731_vm13 }
 0x3f7   : > { %v727_v55 = vsub.f32 1.0, %v726_v54  ;;  %v1415_v54 = vld [vmem:[#allocation4 + $0x40] sm:$0xff] }
 0x3f9   : > { %v728_v58 = vmul.f32 %v1481_v51, %v727_v55 }
 0x3fb   : > { %v729_v60 = vadd.f32 %v1481_v51, %v728_v58 }
 0x3fd   : > { %v733_v63 = vsel %vm732_vm15, %v1481_v51, %v729_v60  ;;  %v886_v1 = vpop.xlane.xlu2 %885  ;;  %v1407_v51 = vld [vmem:[#allocation4] sm:$0xff] }
 0x3fe   : > { %v738_v2 = vsel %vm735_vm0, %v737_v62, %v733_v63  ;;  %1482 = vrcp.f32 %v886_v1  ;;  %v898_v10 = vand.u32 2147483648, %v886_v1  ;;  %v896_v12 = vand.u32 2147483647, %v886_v1 }
 0x3ff   : > { %v739_v3 = vmul.f32 %v1473_v28, %v738_v2  ;;  %vm892_vm2 = vweird.f32 %v886_v1 }
 0x400   : > { %v899_v15 = vor.u32 1.1754944e-38, %v898_v10  ;;  %vm897_vm5 = vcmp.eq.f32.partialorder %v896_v12, 8.507059e+37 }
 0x401   : > { %v740_v4 = vpack.c.bf16 %v739_v3, %v739_v3 }
 0x403   : > { %1304 = vmatmul.msk.bf16.vlgmr.msra.gmra.mxu3 %vm634_vm8, %v740_v4 }
 0x404   : > { %v1483_v57 = vpop.eup %1482 }
 0x405   : > { %v888_v5 = vmul.f32 %v1483_v57, %v886_v1  ;;  %v822_v6 = vpop.permute.xlu1 %821  ;;  %v803_v7 = vpop.xlane.xlu0 %802  ;;  %vm893_vm1 = vweird.f32 %v1483_v57 }
 0x406   : > { %1484 = vrcp.f32 %v803_v7  ;;  %v827_v9 = vsel %vm663_vm4, %v822_v6, 0  ;;  %vm894_vm3 = vmor %vm892_vm2, %vm893_vm1  ;;  %v815_v21 = vand.u32 2147483648, %v803_v7  ;;  %v813_v23 = vand.u32 2147483647, %v803_v7 }
 0x407   : > { %v889_v8 = vsub.f32 1.0, %v888_v5  ;;  %836 = vmatpush.bf16.msrb.mxu1 %v827_v9  ;;  %913 = vmatpush.bf16.msrb.mxu3 %v827_v9  ;;  %vm809_vm7 = vweird.f32 %v803_v7 }
 0x408   : > { %v816_v26 = vor.u32 1.1754944e-38, %v815_v21  ;;  %vm814_vm10 = vcmp.eq.f32.partialorder %v813_v23, 8.507059e+37 }
 0x409   : > { %v890_v11 = vmul.f32 %v1483_v57, %v889_v8 }
 0x40b   : > { %v891_v13 = vadd.f32 %v1483_v57, %v890_v11  ;;  %1072 = vmatpush.bf16.msra.mxu1 %v1422_v34 }
 0x40c   : > { %v1485_v14 = vpop.eup %1484 }
 0x40d   : > { %v895_v16 = vsel %vm894_vm3, %v1483_v57, %v891_v13  ;;  %v805_v17 = vmul.f32 %v1485_v14, %v803_v7  ;;  %vm810_vm4 = vweird.f32 %v1485_v14 }
 0x40e   : > { %v900_v18 = vsel %vm897_vm5, %v899_v15, %v895_v16  ;;  %vm811_vm9 = vmor %vm809_vm7, %vm810_vm4 }
 0x40f   : > { %v901_v19 = vmul.f32 %v1736_v35, %v900_v18  ;;  %v806_v20 = vsub.f32 1.0, %v805_v17  ;;  %v1413_v35 = vld [vmem:[#allocation4 + $0x30] sm:$0xff]  ;;  %1073 = vmatpush.bf16.msra.mxu1 %v1421_v36 }
 0x410   : > { %1060 = vmatpush.bf16.msra.mxu0 %v1413_v35 }
 0x411   : > { %v807_v22 = vmul.f32 %v1485_v14, %v806_v20  ;;  %v902_v24 = vpack.c.bf16 %v901_v19, %v901_v19 }
 0x413   : > { %v808_v25 = vadd.f32 %v1485_v14, %v807_v22  ;;  %1308 = vmatmul.msk.bf16.vlgmr.msrb.gmra.mxu3 %vm634_vm8, %v902_v24  ;;  %1074 = vmatpush.bf16.msra.mxu1 %v1420_v40 }
 0x414   : > { %1061 = vmatpush.bf16.msra.mxu0 %v1412_v39 }
 0x415   : > { %v812_v27 = vsel %vm811_vm9, %v1485_v14, %v808_v25 }
 0x416   : > { %v817_v28 = vsel %vm814_vm10, %v816_v26, %v812_v27 }
 0x417   : > { %v818_v29 = vmul.f32 %v1740_v38, %v817_v28  ;;  %v1419_v38 = vld [vmem:[#allocation4 + $0x60] sm:$0xff] }
 0x418   : > { %1062 = vmatpush.bf16.msra.mxu0 %v1411_v41  ;;  %1075 = vmatpush.bf16.msra.mxu1 %v1419_v38 }
 0x419   : > { %v819_v30 = vpack.c.bf16 %v818_v29, %v818_v29 }
 0x41b   : > { %1306 = vmatmul.msk.bf16.vlgmr.msrb.gmra.mxu1 %vm634_vm8, %v819_v30 }
 0x41c   : > { %1063 = vmatpush.bf16.msra.mxu0 %v1410_v43  ;;  %1076 = vmatpush.bf16.msra.mxu1 %v1418_v44 }
 0x420   : > { %1064 = vmatpush.bf16.msra.mxu0 %v1409_v45  ;;  %1077 = vmatpush.bf16.msra.mxu1 %v1417_v46 }
 0x424   : > { %1065 = vmatpush.bf16.msra.mxu0 %v1408_v48  ;;  %1078 = vmatpush.bf16.msra.mxu1 %v1416_v49 }
 0x428   : > { %1066 = vmatpush.bf16.msra.mxu0 %v1407_v51  ;;  %1079 = vmatpush.bf16.msra.mxu1 %v1415_v54 }
 0x43e   : > { %v676_v31 = vpop.f32.mrf.mxu3 }
 0x446   : > { %v678_v32 = vpop.f32.mrf.mxu3 }
 0x486   : > { %v753_v37 = vpop.f32.mrf.mxu3 }
 0x48e   : > { %v755_v42 = vpop.f32.mrf.mxu3 }
 0x496   : > { %v915_v47 = vpop.f32.mrf.mxu3 }
 0x497   : > { %v1460_v50 = vpack.i.bf16 %v915_v47, %v753_v37 }
 0x498   : > { %v838_v52 = vpop.f32.mrf.mxu1 }
 0x499   : > { %1461 = vrot.lane.b32.xlu2 %v1460_v50, %s1571_s26 }
 0x49e   : > { %v917_v53 = vpop.f32.mrf.mxu3 }
 0x4a0   : > { %v840_v61 = vpop.f32.mrf.mxu1 }
 0x4f3   : > { %v1462_v55 = vpop.permute.xlu2 %1461 }
 0x4f4   : > { %v1464_v56 = vunpack.i.h.bf16 %v1462_v55  ;;  %v1463_v58 = vunpack.i.l.bf16 %v1462_v55 }
 0x4f6   : > { %v927_v59 = vsel %vm612_vm6, %v676_v31, %v1463_v58  ;;  %v928_v60 = vsel %vm612_vm6, %v838_v52, %v1464_v56 }
 0x4f7   : > { %v929_v62 = vpack.c.bf16 %v927_v59, %v927_v59  ;;  %v930_v63 = vpack.c.bf16 %v928_v60, %v928_v60 }
 0x4f9   : > { %1067 = vmatmul.bf16.vlgmr.msra.gmra.mxu0 %v929_v62  ;;  %1080 = vmatmul.bf16.vlgmr.msra.gmra.mxu1 %v930_v63 }
 0x576   : > { %v1068_v1 = vpop.f32.mrf.mxu0  ;;  %v1081_v2 = vpop.f32.mrf.mxu1 }
 0x577   : > { %v1082_v3 = vadd.f32 %v1081_v2, %v1068_v1 }
 0x579   : > { %v1085_v4 = vadd.f32 %v1082_v3, %v1642_v0 }
 0x57b   : > { %1086 = vst [vmem:[%s280_s7] sm:$0xff] %v1085_v4 }
 0x57e   : > { %v1070_v57 = vpop.f32.mrf.mxu0  ;;  %v1083_v5 = vpop.f32.mrf.mxu1 }
 0x57f PF: > { %s18_s21 = sadd.s32 1, %s1560_s21  }
 0x580   : > { %p15_p7 = scmp.ge.s32.totalorder %s18_s21, 4  }
 0x582   :  { %17 = sbr.rel (!%p15_p7) target bundleno = 2 (0x2), region = 83 }
 0x587   :  { %1106 = vsyncpa [#allocation3], 1 }
 0x588   :  { %1108 = vsyncpa [#allocation3 + $0x1], 1 }
 0x589   :  { %1109 = vsyncpa [#allocation5], 1 }

// kernel: llama3_forward.5
= control target key start
LH: loop header
LB: loop body
LE: loop exit
PB: predicated region body
PF: predicated region fallthrough
CT: control target
= control target key end

     0   :  { %11 = vsyncpa [#allocation3], 0  ;;  %s1529_s21 = smov 0   ;;  %s1719_s0 = inlined_call_operand.vmem [shape: f32[2,8,128], index: 0, kind: input, shape index: {}]   ;;  %s1720_s1 = inlined_call_operand.vmem [shape: f32[1,128], index: 1, kind: input, shape index: {}]   ;;  %s1721_s2 = inlined_call_operand.hbm [shape: bf16[128,512], index: 2, kind: input, shape index: {}]   ;;  %s1722_s3 = inlined_call_operand.vmem [shape: bf16[256,128], index: 3, kind: input, shape index: {}]   ;;  %s1723_s4 = inlined_call_operand.vmem [shape: f32[8,64], index: 4, kind: input, shape index: {}]   ;;  %s1724_s5 = inlined_call_operand.vmem [shape: f32[8,64], index: 5, kind: input, shape index: {}]   ;;  %s1725_s6 = inlined_call_operand.vmem [shape: f32[2,8,128], index: 6, kind: output, shape index: {}]  }
   0x1 LB: > { %s193_s24 = sshll.u32 %s1721_s2, 4  ;;  %s1135_s25 = sadd.s32 4294967295, %s1485_s21   ;;  %s1485_s21 = sphi %s1529_s21, %s17_s21   ;;  %s194_s24 = int_to_ptr.hbm [resolvable:$true] %s193_s24 }
   0x2   : > { %p1137_p0 = scmp.ge.s32.totalorder %s1485_s21, 1  ;;  %p179_p1 = scmp.lt.s32.totalorder %s1485_s21, 3 }
   0x3   : > { %p1402_p2 = scmp.eq.s32.totalorder %s1135_s25, 0  ;;  %s1487_s26 = smov [#allocation2]  }
   0x4   : > { %p180_p3 = pnand %p1137_p0, %p179_p1  ;;  %s195_s27 = sshll.u32 %s1487_s26, 4  ;;  %s196_s27 = int_to_ptr.vmem [resolvable:$true] %s195_s27 }
   0x5   : > { %s1488_s28 = smov 256   ;;  %s1489_s29 = smov 16  }
   0x6   : > { %p1398_p4 = pneg %p180_p3  ;;  %227 = sbr.rel (%p180_p3) target bundleno = 1401 (0x579), region = 44 }
   0x8   : > { %p1399_p5 = pnand %p1402_p2, %p1398_p4 }
   0xa   : > { %1401 = dma.hbm_to_vmem [thread:$0]  (!%p1399_p5), %s194_s24, 4096, %s196_s27, [#allocation3], %s1488_s28, %s1488_s28, %s1489_s29  }
   0xb   : > { %1480 = dma.done.wait (%p1402_p2), [#allocation3], 4096  }
   0xc   : > { %1482 = vsyncadd (%p1402_p2), [#allocation3], 4294963200  ;;  %p256_p6 = scmp.lt.s32.totalorder %s1135_s25, 1  ;;  %v1258_v1 = vld [vmem:[#allocation2 + $0xe0] sm:$0xf]  ;;  %v1490_v33 = vmov 128.0  }
   0xd   : > { %v1376_v2 = vld [vmem:[#allocation2 + $0xec] sm:$0xf0]  ;;  %v1374_v5 = vld [vmem:[#allocation2 + $0xe4] sm:$0xf]  ;;  %v1260_v6 = vld [vmem:[#allocation2 + $0xf0] sm:$0xf0]  ;;  %1425 = vrcp.f32 %v1490_v33 }
   0xe   : > { %s1727_s25 = smov (!%p256_p6, %s1135_s25), 1  ;;  %v1259_v4 = vor.u32 %v1376_v2, %v1258_v1  ;;  %v1266_v7 = vld [vmem:[#allocation2 + $0xe8] sm:$0xf]  ;;  %v1263_v8 = vor.u32 %v1374_v5, %v1260_v6  ;;  %v1377_v9 = vld [vmem:[#allocation2 + $0xf4] sm:$0xf0]  ;;  %s1491_s12 = smov 96  }
   0xf   : > { %s1142_s30 = sshll.u32 %s1727_s25, 3  ;;  %v1375_v10 = vld [vmem:[#allocation2 + $0xec] sm:$0xf]  ;;  %v1268_v11 = vld [vmem:[#allocation2 + $0xf8] sm:$0xf0]  ;;  %v1267_v12 = vor.u32 %v1377_v9, %v1266_v7  ;;  %s1492_s13 = smov 32  }
  0x10   : > { %s259_s9 = scalar_lea.vmem %s1719_s0, %s1142_s30  ;;  %487 = vmatpush.bf16.msra.mxu0 %v1259_v4  ;;  %v1271_v13 = vor.u32 %v1375_v10, %v1268_v11  ;;  %500 = vmatpush.bf16.msra.mxu1 %v1263_v8  ;;  %v1242_v14 = vld [vmem:[#allocation2 + $0xc0] sm:$0xf]  ;;  %v1372_v15 = vld [vmem:[#allocation2 + $0xcc] sm:$0xf0]  ;;  %v1370_v16 = vld [vmem:[#allocation2 + $0xc4] sm:$0xf]  ;;  %s263_s11 = scalar_lea.vmem %s1725_s6, %s1142_s30 }
  0x11   : > { %v1548_v0 = vld [vmem:[%s259_s9] sm:$0xff]  ;;  %513 = vmatpush.bf16.msra.mxu2 %v1267_v12  ;;  %v1243_v17 = vor.u32 %v1372_v15, %v1242_v14  ;;  %v1244_v18 = vld [vmem:[#allocation2 + $0xd0] sm:$0xf0]  ;;  %v1250_v19 = vld [vmem:[#allocation2 + $0xc8] sm:$0xf]  ;;  %vm646_vm4 = vcmask 1043456  }
  0x12   : > { %v267_v3 = vmul.f32 %v1548_v0, %v1548_v0  ;;  %526 = vmatpush.bf16.msra.mxu3 %v1271_v13  ;;  %v1373_v20 = vld [vmem:[#allocation2 + $0xd4] sm:$0xf0]  ;;  %v1247_v21 = vor.u32 %v1370_v16, %v1244_v18  ;;  %v1371_v23 = vld [vmem:[#allocation2 + $0xcc] sm:$0xf]  ;;  %v1252_v24 = vld [vmem:[#allocation2 + $0xd8] sm:$0xf0] }
  0x13   : > { %v1251_v22 = vor.u32 %v1373_v20, %v1250_v19  ;;  %v1255_v25 = vor.u32 %v1371_v23, %v1252_v24  ;;  %v1226_v26 = vld [vmem:[#allocation2 + $0xa0] sm:$0xf]  ;;  %v1368_v27 = vld [vmem:[#allocation2 + $0xac] sm:$0xf0]  ;;  %v1366_v28 = vld [vmem:[#allocation2 + $0xa4] sm:$0xf]  ;;  %v1552_v51 = vpop.eup %1425 }
  0x14   : > { %268 = vadd.xlane.f32.xlu0 %v267_v3  ;;  %488 = vmatpush.bf16.msra.mxu0 %v1243_v17  ;;  %v1227_v29 = vor.u32 %v1368_v27, %v1226_v26  ;;  %v1228_v30 = vld [vmem:[#allocation2 + $0xb0] sm:$0xf0]  ;;  %v1234_v31 = vld [vmem:[#allocation2 + $0xa8] sm:$0xf]  ;;  %v1369_v32 = vld [vmem:[#allocation2 + $0xb4] sm:$0xf0]  ;;  %vm275_vm0 = vweird.f32 %v1552_v51 }
  0x15   : > { %501 = vmatpush.bf16.msra.mxu1 %v1247_v21  ;;  %514 = vmatpush.bf16.msra.mxu2 %v1251_v22  ;;  %v1231_v34 = vor.u32 %v1366_v28, %v1228_v30  ;;  %v1235_v35 = vor.u32 %v1369_v32, %v1234_v31  ;;  %v1367_v36 = vld [vmem:[#allocation2 + $0xac] sm:$0xf]  ;;  %v1236_v37 = vld [vmem:[#allocation2 + $0xb8] sm:$0xf0]  ;;  %v1210_v39 = vld [vmem:[#allocation2 + $0x80] sm:$0xf] }
  0x16   : > { %527 = vmatpush.bf16.msra.mxu3 %v1255_v25  ;;  %v1239_v38 = vor.u32 %v1367_v36, %v1236_v37  ;;  %v1364_v40 = vld [vmem:[#allocation2 + $0x8c] sm:$0xf0]  ;;  %v1362_v41 = vld [vmem:[#allocation2 + $0x84] sm:$0xf]  ;;  %v1212_v43 = vld [vmem:[#allocation2 + $0x90] sm:$0xf0] }
  0x17   : > { %v1211_v42 = vor.u32 %v1364_v40, %v1210_v39  ;;  %v1218_v44 = vld [vmem:[#allocation2 + $0x88] sm:$0xf]  ;;  %v1365_v45 = vld [vmem:[#allocation2 + $0x94] sm:$0xf0]  ;;  %v1215_v46 = vor.u32 %v1362_v41, %v1212_v43  ;;  %v1363_v48 = vld [vmem:[#allocation2 + $0x8c] sm:$0xf] }
  0x18   : > { %489 = vmatpush.bf16.msra.mxu0 %v1227_v29  ;;  %v1219_v47 = vor.u32 %v1365_v45, %v1218_v44  ;;  %v1220_v49 = vld [vmem:[#allocation2 + $0x98] sm:$0xf0]  ;;  %v1194_v52 = vld [vmem:[#allocation2 + $0x60] sm:$0xf]  ;;  %v1360_v53 = vld [vmem:[#allocation2 + $0x6c] sm:$0xf0] }
  0x19   : > { %502 = vmatpush.bf16.msra.mxu1 %v1231_v34  ;;  %515 = vmatpush.bf16.msra.mxu2 %v1235_v35  ;;  %v1223_v50 = vor.u32 %v1363_v48, %v1220_v49  ;;  %v1358_v54 = vld [vmem:[#allocation2 + $0x64] sm:$0xf]  ;;  %v1195_v55 = vor.u32 %v1360_v53, %v1194_v52  ;;  %v1196_v56 = vld [vmem:[#allocation2 + $0x70] sm:$0xf0]  ;;  %v1202_v57 = vld [vmem:[#allocation2 + $0x68] sm:$0xf] }
  0x1a   : > { %528 = vmatpush.bf16.msra.mxu3 %v1239_v38  ;;  %v1361_v58 = vld [vmem:[#allocation2 + $0x74] sm:$0xf0]  ;;  %v1199_v59 = vor.u32 %v1358_v54, %v1196_v56  ;;  %v1359_v61 = vld [vmem:[#allocation2 + $0x6c] sm:$0xf]  ;;  %v1204_v62 = vld [vmem:[#allocation2 + $0x78] sm:$0xf0] }
  0x1b   : > { %v1203_v60 = vor.u32 %v1361_v58, %v1202_v57  ;;  %v271_v63 = vmul.f32 128.0, %v1552_v51  ;;  %v1207_v1 = vor.u32 %v1359_v61, %v1204_v62  ;;  %v1178_v2 = vld [vmem:[#allocation2 + $0x40] sm:$0xf]  ;;  %v1356_v3 = vld [vmem:[#allocation2 + $0x4c] sm:$0xf0]  ;;  %s1493_s16 = smov 64  }
  0x1c   : > { %490 = vmatpush.bf16.msra.mxu0 %v1211_v42  ;;  %v1354_v4 = vld [vmem:[#allocation2 + $0x44] sm:$0xf]  ;;  %v1179_v5 = vor.u32 %v1356_v3, %v1178_v2  ;;  %v1180_v6 = vld [vmem:[#allocation2 + $0x50] sm:$0xf0]  ;;  %v1186_v7 = vld [vmem:[#allocation2 + $0x48] sm:$0xf] }
  0x1d   : > { %503 = vmatpush.bf16.msra.mxu1 %v1215_v46  ;;  %516 = vmatpush.bf16.msra.mxu2 %v1219_v47  ;;  %v1357_v8 = vld [vmem:[#allocation2 + $0x54] sm:$0xf0]  ;;  %v1183_v9 = vor.u32 %v1354_v4, %v1180_v6  ;;  %v1355_v11 = vld [vmem:[#allocation2 + $0x4c] sm:$0xf]  ;;  %v1188_v12 = vld [vmem:[#allocation2 + $0x58] sm:$0xf0] }
  0x1e   : > { %529 = vmatpush.bf16.msra.mxu3 %v1223_v50  ;;  %v1187_v10 = vor.u32 %v1357_v8, %v1186_v7  ;;  %v272_v13 = vsub.f32 1.0, %v271_v63  ;;  %v1191_v14 = vor.u32 %v1355_v11, %v1188_v12  ;;  %v1162_v15 = vld [vmem:[#allocation2 + $0x20] sm:$0xf]  ;;  %v1352_v16 = vld [vmem:[#allocation2 + $0x2c] sm:$0xf0]  ;;  %vm555_vm5 = vcmask 261120  }
  0x1f   : > { %v1350_v17 = vld [vmem:[#allocation2 + $0x24] sm:$0xf]  ;;  %v1163_v18 = vor.u32 %v1352_v16, %v1162_v15  ;;  %v1164_v19 = vld [vmem:[#allocation2 + $0x30] sm:$0xf0]  ;;  %v1170_v20 = vld [vmem:[#allocation2 + $0x28] sm:$0xf] }
  0x20   : > { %491 = vmatpush.bf16.msra.mxu0 %v1195_v55  ;;  %v1353_v21 = vld [vmem:[#allocation2 + $0x34] sm:$0xf0]  ;;  %v1167_v22 = vor.u32 %v1350_v17, %v1164_v19  ;;  %v1351_v24 = vld [vmem:[#allocation2 + $0x2c] sm:$0xf]  ;;  %v1172_v25 = vld [vmem:[#allocation2 + $0x38] sm:$0xf0]  ;;  %v273_v26 = vmul.f32 %v1552_v51, %v272_v13 }
  0x21   : > { %504 = vmatpush.bf16.msra.mxu1 %v1199_v59  ;;  %517 = vmatpush.bf16.msra.mxu2 %v1203_v60  ;;  %v1171_v23 = vor.u32 %v1353_v21, %v1170_v20  ;;  %v1175_v27 = vor.u32 %v1351_v24, %v1172_v25  ;;  %v1146_v28 = vld [vmem:[#allocation2] sm:$0xf]  ;;  %v1348_v29 = vld [vmem:[#allocation2 + $0xc] sm:$0xf0]  ;;  %v1346_v30 = vld [vmem:[#allocation2 + $0x4] sm:$0xf] }
  0x22   : > { %530 = vmatpush.bf16.msra.mxu3 %v1207_v1  ;;  %v1147_v31 = vor.u32 %v1348_v29, %v1146_v28  ;;  %v1148_v32 = vld [vmem:[#allocation2 + $0x10] sm:$0xf0]  ;;  %v1154_v33 = vld [vmem:[#allocation2 + $0x8] sm:$0xf]  ;;  %v1349_v34 = vld [vmem:[#allocation2 + $0x14] sm:$0xf0]  ;;  %v274_v39 = vadd.f32 %v1552_v51, %v273_v26 }
  0x23   : > { %v1151_v35 = vor.u32 %v1346_v30, %v1148_v32  ;;  %v1155_v36 = vor.u32 %v1349_v34, %v1154_v33  ;;  %v1347_v37 = vld [vmem:[#allocation2 + $0xc] sm:$0xf]  ;;  %v1156_v38 = vld [vmem:[#allocation2 + $0x18] sm:$0xf0]  ;;  %v1424_v52 = vld [vmem:[%s1720_s1] ss:$0 sm:$0xff] }
  0x24   : > { %492 = vmatpush.bf16.msra.mxu0 %v1179_v5  ;;  %v1159_v40 = vor.u32 %v1347_v37, %v1156_v38  ;;  %v276_v41 = vsel %vm275_vm0, %v1552_v51, %v274_v39  ;;  %v1586_v6 = vld [vmem:[%s1723_s4] sm:$0xff]  ;;  %vm595_vm6 = vcmask 523264   ;;  %vm617_vm8 = vcmask 64512  }
  0x25   : > { %505 = vmatpush.bf16.msra.mxu1 %v1183_v9  ;;  %518 = vmatpush.bf16.msra.mxu2 %v1187_v10  ;;  %v1593_v8 = vld [vmem:[%s1724_s5] sm:$0xff] }
  0x26   : > { %531 = vmatpush.bf16.msra.mxu3 %v1191_v14 }
  0x28   : > { %493 = vmatpush.bf16.msra.mxu0 %v1163_v18 }
  0x29   : > { %506 = vmatpush.bf16.msra.mxu1 %v1167_v22  ;;  %519 = vmatpush.bf16.msra.mxu2 %v1171_v23 }
  0x2a   : > { %532 = vmatpush.bf16.msra.mxu3 %v1175_v27 }
  0x2c   : > { %494 = vmatpush.bf16.msra.mxu0 %v1147_v31 }
  0x2d   : > { %507 = vmatpush.bf16.msra.mxu1 %v1151_v35  ;;  %520 = vmatpush.bf16.msra.mxu2 %v1155_v36 }
  0x2e   : > { %533 = vmatpush.bf16.msra.mxu3 %v1159_v40 }
  0x87   : > { %v269_v42 = vpop.xlane.xlu0 %268 }
  0x88   : > { %v277_v43 = vmul.f32 %v276_v41, %v269_v42 }
  0x8a   : > { %v278_v44 = vadd.f32 1e-06, %v277_v43 }
  0x8c   : > { %1427 = vrsqrt.f32 %v278_v44  ;;  %vm285_vm2 = vweird.f32 %v278_v44 }
  0x92   : > { %v1428_v45 = vpop.eup %1427 }
  0x93   : > { %v280_v46 = vmul.f32 %v1428_v45, %v278_v44  ;;  %vm286_vm1 = vweird.f32 %v1428_v45 }
  0x94   : > { %vm287_vm3 = vmor %vm285_vm2, %vm286_vm1 }
  0x95   : > { %v281_v47 = vmul.f32 %v1428_v45, %v280_v46 }
  0x97   : > { %v282_v48 = vmul.f32 0.5, %v281_v47 }
  0x99   : > { %v283_v49 = vsub.f32 1.5, %v282_v48 }
  0x9b   : > { %v284_v50 = vmul.f32 %v1428_v45, %v283_v49 }
  0x9d   : > { %v288_v53 = vsel %vm287_vm3, %v1428_v45, %v284_v50 }
  0x9e   : > { %v289_v51 = vmul.f32 %v288_v53, %v1548_v0 }
  0xa0   : > { %v293_v54 = vmul.f32 %v1424_v52, %v289_v51 }
  0xa2   : > { %v294_v55 = vpack.c.bf16 %v293_v54, %v293_v54 }
  0xa4   : > { %495 = vmatmul.bf16.vlgmr.msra.gmra.mxu0 %v294_v55  ;;  %508 = vmatmul.bf16.vlgmr.msra.gmra.mxu1 %v294_v55 }
  0xa5   : > { %521 = vmatmul.bf16.vlgmr.msra.gmra.mxu2 %v294_v55  ;;  %534 = vmatmul.bf16.vlgmr.msra.gmra.mxu3 %v294_v55 }
 0x121   : > { %v1563_v56 = vpop.f32.mrf.mxu0  ;;  %v1565_v57 = vpop.f32.mrf.mxu1 }
 0x122   : > { %666 = vrot.lane.b32.xlu1 %v1563_v56, %s1491_s12  ;;  %v581_v58 = vsub.f32 0.0, %v1563_v56  ;;  %v740_v3 = vsub.f32 0.0, %v1565_v57  ;;  %v591_v44 = vmul.f32 %v1586_v6, %v1563_v56  ;;  %v750_v55 = vmul.f32 %v1586_v6, %v1565_v57 }
 0x124   : > { %663 = vrot.lane.b32.xlu0 %v581_v58, %s1492_s13 }
 0x128   : > { %v522_v59 = vpop.f32.mrf.mxu2  ;;  %v535_v60 = vpop.f32.mrf.mxu3 }
 0x129   : > { %v1571_v61 = vpack.c.bf16 %v535_v60, %v535_v60  ;;  %565 = vrot.lane.b32.xlu2 %v522_v59, %s1491_s12  ;;  %v498_v62 = vpop.f32.mrf.mxu0  ;;  %v511_v63 = vpop.f32.mrf.mxu1  ;;  %v546_v1 = vsub.f32 0.0, %v522_v59  ;;  %v557_v37 = vmul.f32 %v1586_v6, %v522_v59  ;;  %v541_v60 = vlaneseq }
 0x12b   : > { %562 = vrot.lane.b32.xlu1 %v546_v1, %s1492_s13  ;;  %v648_v2 = vsel %vm646_vm4, %v1571_v61, 0  ;;  %v542_v62 = vshrl.u32 %v541_v60, 7  ;;  %v544_v63 = vand.u32 127, %v541_v60 }
 0x12c   : > { %657 = vmatpush.bf16.msrb.mxu3 %v648_v2  ;;  %548 = vrot.lane.b32.xlu0 %v546_v1, %s1491_s12 }
 0x12d   : > { %vm545_vm7 = vcmp.le.s32.totalorder %v544_v63, %v542_v62 }
 0x130   : > { %734 = vmatpush.bf16.msra.mxu3 %v648_v2  ;;  %v524_v4 = vpop.f32.mrf.mxu2  ;;  %v537_v5 = vpop.f32.mrf.mxu3 }
 0x131   : > { %825 = vrot.lane.b32.xlu2 %v740_v3, %s1492_s13 }
 0x133   : > { %828 = vrot.lane.b32.xlu1 %v1565_v57, %s1491_s12 }
 0x134   : > { %583 = vrot.lane.b32.xlu0 %v581_v58, %s1491_s12 }
 0x139   : > { %570 = vrot.lane.b32.xlu2 %v1586_v6, %s1493_s16 }
 0x183   : > { %v566_v12 = vpop.permute.xlu2 %565 }
 0x18b   : > { %v826_v16 = vpop.permute.xlu2 %825 }
 0x193   : > { %v571_v20 = vpop.permute.xlu2 %570 }
 0x194   : > { %v667_v7 = vpop.permute.xlu1 %666  ;;  %v573_v21 = vmul.f32 %v571_v20, %v522_v59  ;;  %v832_v25 = vmul.f32 %v571_v20, %v1565_v57  ;;  %v670_v29 = vmul.f32 %v571_v20, %v1563_v56 }
 0x196   : > { %v664_v9 = vpop.permute.xlu0 %663 }
 0x197   : > { %v669_v10 = vsel %vm555_vm5, %v664_v9, %v667_v7 }
 0x198   : > { %v671_v11 = vmul.f32 %v669_v10, %v1593_v8 }
 0x19a   : > { %673 = vrot.lane.b32.xlu1 %v671_v11, %s1493_s16 }
 0x19d   : > { %v563_v13 = vpop.permute.xlu1 %562 }
 0x19e   : > { %v568_v14 = vsel %vm555_vm5, %v563_v13, %v566_v12  ;;  %v549_v33 = vpop.permute.xlu0 %548 }
 0x19f   : > { %v574_v15 = vmul.f32 %v568_v14, %v1593_v8 }
 0x1a1   : > { %576 = vrot.lane.b32.xlu2 %v574_v15, %s1493_s16 }
 0x1a2   : > { %552 = vrot.lane.b32.xlu1 %v522_v59, %s1492_s13 }
 0x1a5   : > { %v829_v17 = vpop.permute.xlu1 %828 }
 0x1a6   : > { %v831_v18 = vsel %vm555_vm5, %v826_v16, %v829_v17  ;;  %v584_v40 = vpop.permute.xlu0 %583 }
 0x1a7   : > { %v833_v19 = vmul.f32 %v831_v18, %v1593_v8 }
 0x1a9   : > { %835 = vrot.lane.b32.xlu2 %v833_v19, %s1493_s16 }
 0x1aa   : > { %587 = vrot.lane.b32.xlu1 %v1563_v56, %s1492_s13 }
 0x1fb   : > { %v577_v22 = vpop.permute.xlu2 %576 }
 0x1fc   : > { %v579_v23 = vadd.f32 %v577_v22, %v573_v21 }
 0x1fe   : > { %v580_v24 = vpack.c.bf16 %v579_v23, %v579_v23 }
 0x200   : > { %755 = vrot.lane.b32.xlu0 %v580_v24, %s1493_s16 }
 0x203   : > { %v836_v26 = vpop.permute.xlu2 %835 }
 0x204   : > { %v838_v27 = vadd.f32 %v836_v26, %v832_v25 }
 0x206   : > { %v839_v28 = vpack.c.bf16 %v838_v27, %v838_v27 }
 0x208   : > { %746 = vrot.lane.b32.xlu0 %v1565_v57, %s1492_s13  ;;  %841 = vrot.lane.b32.xlu1 %v839_v28, %s1493_s16 }
 0x20c   : > { %v674_v30 = vpop.permute.xlu1 %673 }
 0x20d   : > { %v676_v31 = vadd.f32 %v674_v30, %v670_v29 }
 0x20f   : > { %v677_v32 = vpack.c.bf16 %v676_v31, %v676_v31 }
 0x211   : > { %679 = vrot.lane.b32.xlu2 %v677_v32, %s1493_s16 }
 0x214   : > { %v553_v34 = vpop.permute.xlu1 %552 }
 0x215   : > { %v556_v35 = vsel %vm555_vm5, %v549_v33, %v553_v34 }
 0x216   : > { %v558_v36 = vmul.f32 %v556_v35, %v1593_v8 }
 0x218   : > { %v559_v38 = vadd.f32 %v558_v36, %v557_v37 }
 0x219   : > { %742 = vrot.lane.b32.xlu2 %v740_v3, %s1491_s12 }
 0x21a   : > { %v560_v39 = vpack.c.bf16 %v559_v38, %v559_v38 }
 0x21c   : > { %v588_v41 = vpop.permute.xlu1 %587  ;;  %v600_v42 = vsel %vm595_vm6, %v560_v39, 0 }
 0x21d   : > { %v590_v43 = vsel %vm555_vm5, %v584_v40, %v588_v41  ;;  %609 = vmatpush.bf16.xpose.msrb.mxu2 %v600_v42 }
 0x21e   : > { %v592_v45 = vmul.f32 %v590_v43, %v1593_v8 }
 0x220   : > { %v593_v46 = vadd.f32 %v592_v45, %v591_v44 }
 0x222   : > { %v594_v47 = vpack.c.bf16 %v593_v46, %v593_v46 }
 0x224   : > { %1272 = vmatmul.msk.bf16.vlgmr.msrb.gmra.mxu2 %vm595_vm6, %v594_v47 }
 0x225   : > { %691 = vmatpush.bf16.xpose.msra.mxu2 %v600_v42 }
 0x26b   : > { %v680_v48 = vpop.permute.xlu2 %679 }
 0x26c   : > { %1274 = vmatmul.msk.bf16.vlgmr.msra.gmra.mxu2 %vm595_vm6, %v680_v48 }
 0x272   : > { %v756_v49 = vpop.permute.xlu0 %755 }
 0x273   : > { %v761_v50 = vsel %vm595_vm6, %v756_v49, 0  ;;  %v743_v52 = vpop.permute.xlu2 %742 }
 0x274   : > { %770 = vmatpush.bf16.xpose.msrb.mxu0 %v761_v50  ;;  %853 = vmatpush.bf16.xpose.msrb.mxu2 %v761_v50 }
 0x27a   : > { %v747_v53 = vpop.permute.xlu0 %746  ;;  %v842_v51 = vpop.permute.xlu1 %841 }
 0x27b   : > { %v749_v54 = vsel %vm555_vm5, %v743_v52, %v747_v53 }
 0x27c   : > { %v751_v56 = vmul.f32 %v749_v54, %v1593_v8  ;;  %1278 = vmatmul.msk.bf16.vlgmr.msrb.gmra.mxu2 %vm595_vm6, %v842_v51 }
 0x27e   : > { %v752_v58 = vadd.f32 %v751_v56, %v750_v55 }
 0x280   : > { %v753_v59 = vpack.c.bf16 %v752_v58, %v752_v58 }
 0x282   : > { %1276 = vmatmul.msk.bf16.vlgmr.msrb.gmra.mxu0 %vm595_vm6, %v753_v59 }
 0x2a7   : > { %v611_v1 = vpop.f32.mrf.mxu2 }
 0x2a8   : > { %v615_v2 = vmul.f32 0.125, %v611_v1 }
 0x2aa   : > { %v616_v3 = vsel %vm545_vm7, %v615_v2, -1e+30 }
 0x2ab   : > { %v618_v4 = vsel %vm617_vm8, %v616_v3, -inf }
 0x2ac   : > { %619 = vmax.xlane.f32.xlu1 %v618_v4 }
 0x2af   : > { %v613_v57 = vpop.f32.mrf.mxu2 }
 0x2ef   : > { %v693_v5 = vpop.f32.mrf.mxu2 }
 0x2f0   : > { %v697_v6 = vmul.f32 0.125, %v693_v5 }
 0x2f2   : > { %v698_v7 = vsel %vm545_vm7, %v697_v6, -1e+30 }
 0x2f3   : > { %v699_v8 = vsel %vm617_vm8, %v698_v7, -inf }
 0x2f4   : > { %700 = vmax.xlane.f32.xlu2 %v699_v8 }
 0x2f7   : > { %v695_v9 = vpop.f32.mrf.mxu2 }
 0x2ff   : > { %v772_v10 = vpop.f32.mrf.mxu0  ;;  %v855_v11 = vpop.f32.mrf.mxu2 }
 0x300   : > { %v859_v12 = vmul.f32 0.125, %v855_v11  ;;  %v776_v15 = vmul.f32 0.125, %v772_v10 }
 0x302   : > { %v860_v13 = vsel %vm545_vm7, %v859_v12, -1e+30  ;;  %v777_v18 = vsel %vm545_vm7, %v776_v15, -1e+30 }
 0x303   : > { %v861_v14 = vsel %vm617_vm8, %v860_v13, -inf  ;;  %v778_v19 = vsel %vm617_vm8, %v777_v18, -inf }
 0x304   : > { %862 = vmax.xlane.f32.xlu0 %v861_v14 }
 0x307   : > { %v774_v16 = vpop.f32.mrf.mxu0  ;;  %v857_v17 = vpop.f32.mrf.mxu2 }
 0x30c   : > { %779 = vmax.xlane.f32.xlu0 %v778_v19 }
 0x31f   : > { %v620_v20 = vpop.xlane.xlu1 %619 }
 0x320   : > { %v621_v21 = vsub.f32 %v616_v3, %v620_v20 }
 0x322   : > { %v622_v22 = vmul.f32 1.442695, %v621_v21 }
 0x324   : > { %1429 = vpow2.f32 %v622_v22 }
 0x32a   : > { %v1430_v23 = vpop.eup %1429 }
 0x32b   : > { %v624_v24 = vsel %vm617_vm8, %v1430_v23, 0.0 }
 0x32c   : > { %625 = vadd.xlane.f32.xlu2 %v624_v24 }
 0x367   : > { %v701_v25 = vpop.xlane.xlu2 %700 }
 0x368   : > { %v702_v26 = vsub.f32 %v698_v7, %v701_v25 }
 0x36a   : > { %v703_v27 = vmul.f32 1.442695, %v702_v26 }
 0x36c   : > { %1431 = vpow2.f32 %v703_v27 }
 0x372   : > { %v1432_v28 = vpop.eup %1431 }
 0x373   : > { %v705_v29 = vsel %vm617_vm8, %v1432_v28, 0.0 }
 0x374   : > { %706 = vadd.xlane.f32.xlu1 %v705_v29 }
 0x377   : > { %v863_v30 = vpop.xlane.xlu0 %862 }
 0x378   : > { %v864_v31 = vsub.f32 %v860_v13, %v863_v30 }
 0x37a   : > { %v865_v32 = vmul.f32 1.442695, %v864_v31 }
 0x37c   : > { %1433 = vpow2.f32 %v865_v32 }
 0x37f   : > { %v780_v33 = vpop.xlane.xlu0 %779 }
 0x380   : > { %v781_v34 = vsub.f32 %v777_v18, %v780_v33  ;;  %v1385_v33 = vld [vmem:[%s1722_s3 + $0x38] sm:$0xff] }
 0x381   : > { %1042 = vmatpush.bf16.msra.mxu0 %v1385_v33 }
 0x382   : > { %v1642_v35 = vpop.eup %1433  ;;  %v782_v36 = vmul.f32 1.442695, %v781_v34  ;;  %v1393_v34 = vld [vmem:[%s1722_s3 + $0x78] sm:$0xff] }
 0x383   : > { %v867_v37 = vsel %vm617_vm8, %v1642_v35, 0.0 }
 0x384   : > { %1435 = vpow2.f32 %v782_v36  ;;  %868 = vadd.xlane.f32.xlu2 %v867_v37  ;;  %v1392_v36 = vld [vmem:[%s1722_s3 + $0x70] sm:$0xff] }
 0x38a   : > { %v1646_v38 = vpop.eup %1435 }
 0x38b   : > { %v784_v39 = vsel %vm617_vm8, %v1646_v38, 0.0 }
 0x38c   : > { %785 = vadd.xlane.f32.xlu0 %v784_v39  ;;  %v1391_v39 = vld [vmem:[%s1722_s3 + $0x68] sm:$0xff] }
 0x38d   : > { %804 = vrot.lane.b32.xlu1 %v1571_v61, %s1493_s16 }
 0x39f   : > { %v626_v40 = vpop.xlane.xlu2 %625 }
 0x3a0   : > { %1437 = vrcp.f32 %v626_v40  ;;  %v638_v44 = vand.u32 2147483648, %v626_v40  ;;  %v636_v46 = vand.u32 2147483647, %v626_v40  ;;  %vm632_vm10 = vweird.f32 %v626_v40 }
 0x3a2   : > { %v639_v48 = vor.u32 1.1754944e-38, %v638_v44  ;;  %vm637_vm12 = vcmp.eq.f32.partialorder %v636_v46, 8.507059e+37  ;;  %v1389_v44 = vld [vmem:[%s1722_s3 + $0x58] sm:$0xff]  ;;  %v1388_v46 = vld [vmem:[%s1722_s3 + $0x50] sm:$0xff] }
 0x3a6   : > { %v1438_v41 = vpop.eup %1437 }
 0x3a7   : > { %v628_v42 = vmul.f32 %v1438_v41, %v626_v40  ;;  %vm633_vm9 = vweird.f32 %v1438_v41  ;;  %v1382_v40 = vld [vmem:[%s1722_s3 + $0x20] sm:$0xff] }
 0x3a8   : > { %vm634_vm11 = vmor %vm632_vm10, %vm633_vm9 }
 0x3a9   : > { %v629_v43 = vsub.f32 1.0, %v628_v42 }
 0x3ab   : > { %v630_v45 = vmul.f32 %v1438_v41, %v629_v43  ;;  %v1381_v43 = vld [vmem:[%s1722_s3 + $0x18] sm:$0xff] }
 0x3ad   : > { %v631_v47 = vadd.f32 %v1438_v41, %v630_v45  ;;  %v1380_v45 = vld [vmem:[%s1722_s3 + $0x10] sm:$0xff] }
 0x3af   : > { %v635_v49 = vsel %vm634_vm11, %v1438_v41, %v631_v47  ;;  %v1390_v41 = vld [vmem:[%s1722_s3 + $0x60] sm:$0xff] }
 0x3b0   : > { %v640_v50 = vsel %vm637_vm12, %v639_v48, %v635_v49  ;;  %v1379_v48 = vld [vmem:[%s1722_s3 + $0x8] sm:$0xff] }
 0x3b1   : > { %v641_v52 = vmul.f32 %v1430_v23, %v640_v50  ;;  %v1387_v49 = vld [vmem:[%s1722_s3 + $0x48] sm:$0xff] }
 0x3b3   : > { %v642_v53 = vpack.c.bf16 %v641_v52, %v641_v52 }
 0x3b5   : > { %1273 = vmatmul.msk.bf16.vlgmr.msrb.gmra.mxu3 %vm617_vm8, %v642_v53 }
 0x3e7   : > { %v707_v61 = vpop.xlane.xlu1 %706 }
 0x3e8   : > { %1439 = vrcp.f32 %v707_v61  ;;  %v719_v56 = vand.u32 2147483648, %v707_v61  ;;  %v717_v59 = vand.u32 2147483647, %v707_v61  ;;  %vm713_vm14 = vweird.f32 %v707_v61 }
 0x3ea   : > { %v720_v62 = vor.u32 1.1754944e-38, %v719_v56  ;;  %vm718_vm0 = vcmp.eq.f32.partialorder %v717_v59, 8.507059e+37 }
 0x3ee   : > { %v1440_v51 = vpop.eup %1439 }
 0x3ef   : > { %v709_v54 = vmul.f32 %v1440_v51, %v707_v61  ;;  %vm714_vm13 = vweird.f32 %v1440_v51 }
 0x3f0   : > { %vm715_vm15 = vmor %vm713_vm14, %vm714_vm13 }
 0x3f1   : > { %v710_v55 = vsub.f32 1.0, %v709_v54  ;;  %v1386_v54 = vld [vmem:[%s1722_s3 + $0x40] sm:$0xff] }
 0x3f3   : > { %v711_v58 = vmul.f32 %v1440_v51, %v710_v55 }
 0x3f5   : > { %v712_v60 = vadd.f32 %v1440_v51, %v711_v58 }
 0x3f7   : > { %v716_v63 = vsel %vm715_vm15, %v1440_v51, %v712_v60  ;;  %v869_v1 = vpop.xlane.xlu2 %868  ;;  %v1378_v51 = vld [vmem:[%s1722_s3] sm:$0xff] }
 0x3f8   : > { %v721_v2 = vsel %vm718_vm0, %v720_v62, %v716_v63  ;;  %1441 = vrcp.f32 %v869_v1  ;;  %v881_v10 = vand.u32 2147483648, %v869_v1  ;;  %v879_v12 = vand.u32 2147483647, %v869_v1 }
 0x3f9   : > { %v722_v3 = vmul.f32 %v1432_v28, %v721_v2  ;;  %vm875_vm2 = vweird.f32 %v869_v1 }
 0x3fa   : > { %v882_v15 = vor.u32 1.1754944e-38, %v881_v10  ;;  %vm880_vm5 = vcmp.eq.f32.partialorder %v879_v12, 8.507059e+37 }
 0x3fb   : > { %v723_v4 = vpack.c.bf16 %v722_v3, %v722_v3 }
 0x3fd   : > { %1275 = vmatmul.msk.bf16.vlgmr.msra.gmra.mxu3 %vm617_vm8, %v723_v4 }
 0x3fe   : > { %v1442_v57 = vpop.eup %1441 }
 0x3ff   : > { %v871_v5 = vmul.f32 %v1442_v57, %v869_v1  ;;  %v805_v6 = vpop.permute.xlu1 %804  ;;  %v786_v7 = vpop.xlane.xlu0 %785  ;;  %vm876_vm1 = vweird.f32 %v1442_v57 }
 0x400   : > { %1443 = vrcp.f32 %v786_v7  ;;  %v810_v9 = vsel %vm646_vm4, %v805_v6, 0  ;;  %vm877_vm3 = vmor %vm875_vm2, %vm876_vm1  ;;  %v798_v21 = vand.u32 2147483648, %v786_v7  ;;  %v796_v23 = vand.u32 2147483647, %v786_v7 }
 0x401   : > { %v872_v8 = vsub.f32 1.0, %v871_v5  ;;  %819 = vmatpush.bf16.msrb.mxu1 %v810_v9  ;;  %896 = vmatpush.bf16.msrb.mxu3 %v810_v9  ;;  %vm792_vm7 = vweird.f32 %v786_v7 }
 0x402   : > { %v799_v26 = vor.u32 1.1754944e-38, %v798_v21  ;;  %vm797_vm10 = vcmp.eq.f32.partialorder %v796_v23, 8.507059e+37 }
 0x403   : > { %v873_v11 = vmul.f32 %v1442_v57, %v872_v8 }
 0x405   : > { %v874_v13 = vadd.f32 %v1442_v57, %v873_v11  ;;  %1055 = vmatpush.bf16.msra.mxu1 %v1393_v34 }
 0x406   : > { %v1444_v14 = vpop.eup %1443 }
 0x407   : > { %v878_v16 = vsel %vm877_vm3, %v1442_v57, %v874_v13  ;;  %v788_v17 = vmul.f32 %v1444_v14, %v786_v7  ;;  %vm793_vm4 = vweird.f32 %v1444_v14 }
 0x408   : > { %v883_v18 = vsel %vm880_vm5, %v882_v15, %v878_v16  ;;  %vm794_vm9 = vmor %vm792_vm7, %vm793_vm4 }
 0x409   : > { %v884_v19 = vmul.f32 %v1642_v35, %v883_v18  ;;  %v789_v20 = vsub.f32 1.0, %v788_v17  ;;  %v1384_v35 = vld [vmem:[%s1722_s3 + $0x30] sm:$0xff]  ;;  %1056 = vmatpush.bf16.msra.mxu1 %v1392_v36 }
 0x40a   : > { %1043 = vmatpush.bf16.msra.mxu0 %v1384_v35 }
 0x40b   : > { %v790_v22 = vmul.f32 %v1444_v14, %v789_v20  ;;  %v885_v24 = vpack.c.bf16 %v884_v19, %v884_v19 }
 0x40d   : > { %v791_v25 = vadd.f32 %v1444_v14, %v790_v22  ;;  %1279 = vmatmul.msk.bf16.vlgmr.msrb.gmra.mxu3 %vm617_vm8, %v885_v24  ;;  %1057 = vmatpush.bf16.msra.mxu1 %v1391_v39 }
 0x40f   : > { %v795_v27 = vsel %vm794_vm9, %v1444_v14, %v791_v25 }
 0x410   : > { %v800_v28 = vsel %vm797_vm10, %v799_v26, %v795_v27 }
 0x411   : > { %v801_v29 = vmul.f32 %v1646_v38, %v800_v28  ;;  %v1383_v38 = vld [vmem:[%s1722_s3 + $0x28] sm:$0xff]  ;;  %1058 = vmatpush.bf16.msra.mxu1 %v1390_v41 }
 0x412   : > { %1044 = vmatpush.bf16.msra.mxu0 %v1383_v38 }
 0x413   : > { %v802_v30 = vpack.c.bf16 %v801_v29, %v801_v29 }
 0x415   : > { %1277 = vmatmul.msk.bf16.vlgmr.msrb.gmra.mxu1 %vm617_vm8, %v802_v30 }
 0x416   : > { %1045 = vmatpush.bf16.msra.mxu0 %v1382_v40  ;;  %1059 = vmatpush.bf16.msra.mxu1 %v1389_v44 }
 0x41a   : > { %1046 = vmatpush.bf16.msra.mxu0 %v1381_v43  ;;  %1060 = vmatpush.bf16.msra.mxu1 %v1388_v46 }
 0x41e   : > { %1047 = vmatpush.bf16.msra.mxu0 %v1380_v45  ;;  %1061 = vmatpush.bf16.msra.mxu1 %v1387_v49 }
 0x422   : > { %1048 = vmatpush.bf16.msra.mxu0 %v1379_v48  ;;  %1062 = vmatpush.bf16.msra.mxu1 %v1386_v54 }
 0x426   : > { %1049 = vmatpush.bf16.msra.mxu0 %v1378_v51 }
 0x438   : > { %v659_v31 = vpop.f32.mrf.mxu3 }
 0x440   : > { %v661_v32 = vpop.f32.mrf.mxu3 }
 0x480   : > { %v736_v37 = vpop.f32.mrf.mxu3 }
 0x488   : > { %v738_v42 = vpop.f32.mrf.mxu3 }
 0x490   : > { %v898_v47 = vpop.f32.mrf.mxu3 }
 0x491   : > { %v1419_v50 = vpack.i.bf16 %v898_v47, %v736_v37 }
 0x492   : > { %v821_v52 = vpop.f32.mrf.mxu1 }
 0x493   : > { %1420 = vrot.lane.b32.xlu2 %v1419_v50, %s1493_s16 }
 0x498   : > { %v900_v53 = vpop.f32.mrf.mxu3 }
 0x49a   : > { %v823_v61 = vpop.f32.mrf.mxu1 }
 0x4ed   : > { %v1421_v55 = vpop.permute.xlu2 %1420 }
 0x4ee   : > { %v1423_v56 = vunpack.i.h.bf16 %v1421_v55  ;;  %v1422_v58 = vunpack.i.l.bf16 %v1421_v55 }
 0x4f0   : > { %v910_v59 = vsel %vm595_vm6, %v659_v31, %v1422_v58  ;;  %v911_v60 = vsel %vm595_vm6, %v821_v52, %v1423_v56 }
 0x4f1   : > { %v912_v62 = vpack.c.bf16 %v910_v59, %v910_v59  ;;  %v913_v63 = vpack.c.bf16 %v911_v60, %v911_v60 }
 0x4f3   : > { %1050 = vmatmul.bf16.vlgmr.msra.gmra.mxu0 %v912_v62  ;;  %1063 = vmatmul.bf16.vlgmr.msra.gmra.mxu1 %v913_v63 }
 0x570   : > { %v1051_v1 = vpop.f32.mrf.mxu0  ;;  %v1064_v2 = vpop.f32.mrf.mxu1 }
 0x571   : > { %v1065_v3 = vadd.f32 %v1064_v2, %v1051_v1 }
 0x573   : > { %v1068_v4 = vadd.f32 %v1065_v3, %v1548_v0 }
 0x575   : > { %1069 = vst [vmem:[%s263_s11] sm:$0xff] %v1068_v4 }
 0x578   : > { %v1053_v57 = vpop.f32.mrf.mxu0  ;;  %v1066_v5 = vpop.f32.mrf.mxu1 }
 0x579 PF: > { %s17_s21 = sadd.s32 1, %s1485_s21  }
 0x57a   : > { %p14_p7 = scmp.ge.s32.totalorder %s17_s21, 4  }
 0x57c   :  { %16 = sbr.rel (!%p14_p7) target bundleno = 1 (0x1), region = 79 }
 0x581   :  { %1089 = vsyncpa [#allocation3], 1 }
 0x582   :  { %1091 = vsyncpa [#allocation3 + $0x1], 1 }

</bundles_post_ra>
